<compile_context>
chip_gen: v7x
topology: tpu7x:2x2x1
jax: 0.10.0
libtpu: 0.0.40
codegen_flags: <defaults>
</compile_context>

<pallas_src>
import jax
import jax.numpy as jnp
import numpy as np
from jax import lax
from jax.experimental import pallas as pl
from jax.experimental.pallas import tpu as pltpu

LN_EPS = 1e-5
BN_EPS = 1e-5


def _round_up(x, m):
    return ((x + m - 1) // m) * m


def _pad_last(a, n):
    pad = n - a.shape[-1]
    if pad == 0:
        return a
    cfg = [(0, 0)] * (a.ndim - 1) + [(0, pad)]
    return jnp.pad(a, cfg)


def _make_kernel(H, W, HW, T, Tp, TQ, S0):
    """Build the fused per-batch GRRM kernel (closes over static dims).

    S0: sublane-aligned (multiple of 8) start row of the image interior inside
        the row-padded flat buffer; rows [0, S0) and [S0+HW, S0+HW+W+1) are the
        zero halo for the 3x3 convolutions.
    """
    n_qt = HW // TQ
    halo = W + 1

    def ln(x, g, b, n):
        # LayerNorm over the last dim; `n` is the number of *real* channels.
        # Padded channels are exactly zero (weights/bias/affines zero-padded),
        # so sums over the padded width equal sums over the real width.
        s1 = jnp.sum(x, axis=-1, keepdims=True)
        s2 = jnp.sum(x * x, axis=-1, keepdims=True)
        mu = s1 * (1.0 / n)
        var = jnp.maximum(s2 * (1.0 / n) - mu * mu, 0.0)
        return (x - mu) * lax.rsqrt(var + LN_EPS) * g + b

    def kernel(ec_ref, dm_ref,
               w_skip_ref, b_skip_ref,
               w_enc_ref, b_enc_ref,
               w_dpm_ref, b_dpm_ref,
               g_dec_ref, be_dec_ref,
               g_dpm_ref, be_dpm_ref,
               g_pm_ref, be_pm_ref,
               w_c0_ref, b_c0_ref,
               w_c1_ref, s_c1_ref, sh_c1_ref,
               w_c2_ref, s_c2_ref, sh_c2_ref,
               out_ref, xpad_ref, en_ref):
        f32 = jnp.float32
        bf16 = jnp.bfloat16

        # Zero only the halo rows of the conv pad buffer; the interior is fully
        # rewritten before every conv.  (Per grid step so the kernel stays
        # correct when the batch axis is megacore-sharded.)
        xpad_ref[0:S0, :] = jnp.zeros((S0, Tp), f32)
        xpad_ref[S0 + HW:S0 + HW + halo, :] = jnp.zeros((halo, Tp), f32)

        # ---- 1x1 convs as MXU matmuls (topo_enc, topo_dpmp) ----
        e = jnp.dot(ec_ref[0], w_enc_ref[...],
                    preferred_element_type=f32) + b_enc_ref[...]
        m = jnp.dot(dm_ref[0], w_dpm_ref[...],
                    preferred_element_type=f32) + b_dpm_ref[...]

        e_n = ln(e, g_dec_ref[...], be_dec_ref[...], T).astype(bf16)  # (HW,Tp)
        m_n = ln(m, g_dpm_ref[...], be_dpm_ref[...], T)               # (HW,Tp)
        # bf16 *before* the once-per-batch transpose: half the XLU data volume.
        m_nT = jnp.transpose(m_n.astype(bf16))                        # (Tp,HW)

        en_ref[...] = e_n          # e_n lives in a bf16 scratch for ref-slicing

        g_pm = g_pm_ref[...]       # (1, HW)
        be_pm = be_pm_ref[...]
        w_c0 = w_c0_ref[...]       # (HW, Tp) bf16
        b_c0 = b_c0_ref[...]

        # ---- flash-style row tiling of poe -> norm_pm -> conv0[0] -> ReLU.
        # The (HW, HW) poe map is never materialized; each q-tile produces a
        # (TQ, Tp) slab written straight into the conv pad-buffer interior.
        # fori_loop (not a Python loop) keeps live ranges bounded; the small
        # (1,*) affines are broadcast inside the single traced body (no
        # per-iteration re-broadcast code, no large hoisted broadcast pinned
        # live across the loop).
        def q_body(qi, carry):
            q0 = pl.multiple_of(qi * TQ, TQ)
            s = jnp.dot(en_ref[pl.ds(q0, TQ), :], m_nT,
                        preferred_element_type=f32)            # (TQ, HW)
            s = ln(s, g_pm, be_pm, HW)                          # norm_pm
            y = jnp.dot(s.astype(bf16), w_c0,
                        preferred_element_type=f32) + b_c0      # (TQ, Tp)
            xpad_ref[pl.ds(S0 + q0, TQ), :] = jnp.maximum(y, 0.0)
            return carry

        lax.fori_loop(0, n_qt, q_body, 0, unroll=(n_qt <= 4))

        # Column-edge masks generated in-kernel (cheap VPU iota+compare).
        cols = lax.broadcasted_iota(jnp.int32, (HW, 1), 0) % W
        mask_l = (cols > 0).astype(f32)       # 1.0 where column-1 is in-bounds
        mask_r = (cols < (W - 1)).astype(f32)  # 1.0 where column+1 is in-bounds

        def conv3x3(w_ref):
            # 3x3 conv (padding=1) as 9 accumulating (HW,Tp)@(Tp,Tp) matmuls
            # read directly from the row-padded image buffer (no im2col).
            # Halo rows are zero so row under/overflow reads zeros; column
            # wrap is removed by the edge masks.
            acc = jnp.zeros((HW, Tp), f32)
            for k in range(9):
                dy, dx = k // 3 - 1, k % 3 - 1
                start = S0 + dy * W + dx
                win = xpad_ref[start:start + HW, :]
                if dx == -1:
                    win = win * mask_l
                elif dx == 1:
                    win = win * mask_r
                acc = acc + jnp.dot(win.astype(bf16),
                                    w_ref[k * Tp:(k + 1) * Tp, :],
                                    preferred_element_type=f32)
            return acc

        # conv0[2..4]: 3x3 conv + BatchNorm(eval, folded affine) + ReLU
        y1 = jnp.maximum(conv3x3(w_c1_ref) * s_c1_ref[...] + sh_c1_ref[...],
                         0.0)
        xpad_ref[S0:S0 + HW, :] = y1
        # conv0[5..6]: 3x3 conv + BatchNorm(eval, folded affine)
        y2 = conv3x3(w_c2_ref) * s_c2_ref[...] + sh_c2_ref[...]

        # skip_cn matmul deferred here so no (HW,Tp) f32 intermediate is live
        # across the q-loop / convs (ec's block is resident in VMEM anyway).
        identity = jnp.dot(ec_ref[0], w_skip_ref[...],
                           preferred_element_type=f32) + b_skip_ref[...]

        # residual + final ReLU
        out_ref[0] = jnp.maximum(y2 + identity, 0.0).astype(out_ref.dtype)

    return kernel


def grrm_forward(ec, dm, p, q_tile=None):
    """ec, dm: NCHW float32. Returns NCHW float32 (B, tg_dim, H, W)."""
    B, Cec, H, W = ec.shape
    Cdm = dm.shape[1]
    HW = H * W
    T = p['w_enc'].shape[1]
    Tp = _round_up(T, 128)         # lane-dense channel padding (no-op if T%128==0)

    # q-tile: largest of {512,256,128} dividing HW whose f32 (TQ,HW) slab stays
    # <= ~2 MiB; else the smallest divisor; else the whole image.
    if q_tile is not None and HW % q_tile == 0:
        TQ = q_tile
    else:
        divs = [c for c in (512, 256, 128) if HW % c == 0]
        if not divs:
            TQ = HW
        else:
            fits = [c for c in divs if c * HW * 4 <= (2 << 20)]
            TQ = max(fits) if fits else min(divs)

    bf16 = jnp.bfloat16
    wpad = lambda a: _pad_last(a, Tp).astype(bf16)    # matmul weights -> bf16
    fpad = lambda a: _pad_last(a, Tp)                 # biases / affines  -> f32

    def prep_conv3(w):             # (9, T, T) -> (9*Tp, Tp) bf16 tap-stacked
        w = _pad_last(w, Tp)                               # out channels
        w = jnp.pad(w, ((0, 0), (0, Tp - T), (0, 0)))      # in channels
        return w.reshape(9 * Tp, Tp).astype(bf16)

    # NCHW -> (B, HW, C) channel-last, bf16 (MXU operands; f32 accumulation)
    ec_f = ec.reshape(B, Cec, HW).transpose(0, 2, 1).astype(bf16)
    dm_f = dm.reshape(B, Cdm, HW).transpose(0, 2, 1).astype(bf16)

    S0 = _round_up(W + 1, 8)       # sublane-aligned interior start row
    kernel = _make_kernel(H, W, HW, T, Tp, TQ, S0)

    scratch_shapes = [
        pltpu.VMEM((S0 + HW + W + 1, Tp), jnp.float32),   # row-padded image
        pltpu.VMEM((HW, Tp), jnp.bfloat16),               # e_n (poe LHS rows)
    ]

    # Rough working-set estimate (bytes) used only to decide whether to lift
    # the default scoped-VMEM limit.
    est_bytes = (
        2 * 2 * HW * (Cec + Cdm)                               # bf16 inputs x2
        + 2 * (2 * 9 * Tp * Tp + HW * Tp + (2 * Cec + Cdm) * Tp)  # bf16 weights
        + 4 * (S0 + HW + W + 1) * Tp                           # xpad scratch
        + 2 * HW * Tp                                          # e_n scratch
        + 4 * HW * Tp * 6                                      # f32 intermediates
        + 4 * TQ * HW * 2                                      # poe q-tile slab
    )
    cp_kwargs = dict(dimension_semantics=("parallel",))
    if est_bytes > (8 << 20):
        try:
            cap = int(pltpu.get_tpu_info().vmem_capacity_bytes)
        except Exception:
            cap = 64 << 20                                     # conservative (v7x)
        # ~56 MiB on v7x (64 MiB phys), ~108 MiB on v5e/v6e (128 MiB phys).
        cp_kwargs["vmem_limit_bytes"] = int(min(cap - (8 << 20), 0.85 * cap))

    batch3 = lambda b: (b, 0, 0)

    def build(const_pipeline_mode):
        def cs(shape):
            if const_pipeline_mode is None:
                return pl.BlockSpec(shape, lambda b: (0, 0))
            return pl.BlockSpec(shape, lambda b: (0, 0),
                                pipeline_mode=const_pipeline_mode)

        in_specs = [
            pl.BlockSpec((1, HW, Cec), batch3),                # ec
            pl.BlockSpec((1, HW, Cdm), batch3),                # dm
            cs((Cec, Tp)), cs((1, Tp)),                        # skip_cn
            cs((Cec, Tp)), cs((1, Tp)),                        # topo_enc
            cs((Cdm, Tp)), cs((1, Tp)),                        # topo_dpmp
            cs((1, Tp)), cs((1, Tp)),                          # norm_dec
            cs((1, Tp)), cs((1, Tp)),                          # norm_dpmp
            cs((1, HW)), cs((1, HW)),                          # norm_pm
            cs((HW, Tp)), cs((1, Tp)),                         # conv0[0]
            cs((9 * Tp, Tp)), cs((1, Tp)), cs((1, Tp)),        # conv0[2] + BN1
            cs((9 * Tp, Tp)), cs((1, Tp)), cs((1, Tp)),        # conv0[5] + BN2
        ]
        return pl.pallas_call(
            kernel,
            out_shape=jax.ShapeDtypeStruct((B, HW, Tp), jnp.float32),
            grid_spec=pltpu.PrefetchScalarGridSpec(
                num_scalar_prefetch=0,
                grid=(B,),
                in_specs=in_specs,
                out_specs=pl.BlockSpec((1, HW, Tp), batch3),
                scratch_shapes=scratch_shapes,
            ),
            compiler_params=pltpu.CompilerParams(**cp_kwargs),
        )

    args = (ec_f, dm_f,
            wpad(p['w_skip']), fpad(p['b_skip']),
            wpad(p['w_enc']), fpad(p['b_enc']),
            wpad(p['w_dpm']), fpad(p['b_dpm']),
            fpad(p['g_dec']), fpad(p['be_dec']),
            fpad(p['g_dpm']), fpad(p['be_dpm']),
            p['g_pm'], p['be_pm'],
            wpad(p['w_c0']), fpad(p['b_c0']),
            prep_conv3(p['w_c1']), fpad(p['s_c1']), fpad(p['sh_c1']),
            prep_conv3(p['w_c2']), fpad(p['s_c2']), fpad(p['sh_c2']))

    try:
        # Constant-index blocks never change across the grid: single-buffer
        # them to reclaim VMEM (biggest win under v7x's 64 MiB).
        out = build(pl.Buffered(buffer_count=1))(*args)
    except Exception:
        # pipeline_mode single-buffering unavailable in this JAX version:
        # fall back to default double-buffered constant blocks.
        out = build(None)(*args)

    # (B, HW, Tp) channel-last -> drop channel padding -> NCHW (B, T, H, W)
    return out[:, :, :T].transpose(0, 2, 1).reshape(B, T, H, W)


def grrm_reference(ec, dm, p):
    """Pure-JAX reference mirroring the PyTorch forward (eval-mode BN).

    Matmul operands are cast to bfloat16 with float32 accumulation to mirror
    the kernel's MXU feeding; drop the casts for exact f32 semantics.
    """
    B, Cec, H, W = ec.shape
    Cdm = dm.shape[1]
    HW = H * W
    T = p['w_enc'].shape[1]
    ecf = ec.reshape(B, Cec, HW).transpose(0, 2, 1)
    dmf = dm.reshape(B, Cdm, HW).transpose(0, 2, 1)

    bf = lambda x: x.astype(jnp.bfloat16)

    def mm(a, b):
        return jnp.einsum('...k,kn->...n', bf(a), bf(b),
                          preferred_element_type=jnp.float32)

    def ln(x, g, b):
        mu = x.mean(-1, keepdims=True)
        var = ((x - mu) ** 2).mean(-1, keepdims=True)
        return (x - mu) / jnp.sqrt(var + LN_EPS) * g + b

    identity = mm(ecf, p['w_skip']) + p['b_skip']
    e = mm(ecf, p['w_enc']) + p['b_enc']
    m = mm(dmf, p['w_dpm']) + p['b_dpm']
    e_n = ln(e, p['g_dec'], p['be_dec'])
    m_n = ln(m, p['g_dpm'], p['be_dpm'])
    poe = jnp.einsum('bqc,bkc->bqk', bf(e_n), bf(m_n),
                     preferred_element_type=jnp.float32)
    poe = ln(poe, p['g_pm'], p['be_pm'])

    y = jnp.maximum(mm(poe, p['w_c0']) + p['b_c0'], 0.0)

    def conv3x3(x, w):
        x3 = x.reshape(B, H, W, T)
        xp = jnp.pad(x3, ((0, 0), (1, 1), (1, 1), (0, 0)))
        acc = jnp.zeros((B, HW, T), jnp.float32)
        for k in range(9):
            ky, kx = k // 3, k % 3
            win = xp[:, ky:ky + H, kx:kx + W, :].reshape(B, HW, T)
            acc = acc + mm(win, w[k])
        return acc

    y = jnp.maximum(conv3x3(y, p['w_c1']) * p['s_c1'] + p['sh_c1'], 0.0)
    y = conv3x3(y, p['w_c2']) * p['s_c2'] + p['sh_c2']
    out = jnp.maximum(y + identity, 0.0)
    return out.transpose(0, 2, 1).reshape(B, T, H, W)


def init_params(key, dim_ec, dim_dm, tg, size):
    ks = jax.random.split(key, 28)
    rn = lambda k, shape, s=0.1: jax.random.normal(k, shape, jnp.float32) * s
    p = {}
    # 1x1 convs stored as (Cin, Cout) for channel-last matmul; biases (1, Cout)
    p['w_skip'] = rn(ks[0], (dim_ec, tg)); p['b_skip'] = rn(ks[1], (1, tg))
    p['w_enc'] = rn(ks[2], (dim_ec, tg));  p['b_enc'] = rn(ks[3], (1, tg))
    p['w_dpm'] = rn(ks[4], (dim_dm, tg));  p['b_dpm'] = rn(ks[5], (1, tg))
    p['g_dec'] = 1.0 + rn(ks[6], (1, tg));  p['be_dec'] = rn(ks[7], (1, tg))
    p['g_dpm'] = 1.0 + rn(ks[8], (1, tg));  p['be_dpm'] = rn(ks[9], (1, tg))
    p['g_pm'] = 1.0 + rn(ks[10], (1, size)); p['be_pm'] = rn(ks[11], (1, size))
    p['w_c0'] = rn(ks[12], (size, tg)); p['b_c0'] = rn(ks[13], (1, tg))

    # TODO(synk): BatchNorm2d is implemented in eval mode (running stats folded
    # into per-channel affine); training-mode batch statistics and the backward
    # pass are not computed.
    def fold_bn(kw, kb, kg, kbt, km, kv):
        w = rn(kw, (9, tg, tg))                     # (3*3, Cin, Cout) taps
        b = rn(kb, (1, tg))
        g = 1.0 + rn(kg, (1, tg))
        bt = rn(kbt, (1, tg))
        mean = rn(km, (1, tg))
        var = 0.5 + jax.random.uniform(kv, (1, tg), jnp.float32)
        scale = g / jnp.sqrt(var + BN_EPS)
        shift = (b - mean) * scale + bt
        return w, scale, shift

    p['w_c1'], p['s_c1'], p['sh_c1'] = fold_bn(*ks[14:20])
    p['w_c2'], p['s_c2'], p['sh_c2'] = fold_bn(*ks[20:26])
    return p


if __name__ == "__main__":
    # Small, self-consistent shapes: GRRM requires size == H*W.
    # B=2 also exercises the "parallel" batch axis on both v7x TensorCores.
    B, H, W = 2, 4, 8
    dim_ec, dim_dm, tg_dim = 8, 16, 8
    size = H * W

    key = jax.random.PRNGKey(0)
    k_ec, k_dm, k_p = jax.random.split(key, 3)
    ec = jax.random.normal(k_ec, (B, dim_ec, H, W), jnp.float32)
    dm = jax.random.normal(k_dm, (B, dim_dm, H, W), jnp.float32)
    params = init_params(k_p, dim_ec, dim_dm, tg_dim, size)

    # q_tile=16 forces two poe row tiles so the fori_loop path is exercised.
    out = grrm_forward(ec, dm, params, q_tile=16)
    out = jax.block_until_ready(out)

    ref = jax.block_until_ready(grrm_reference(ec, dm, params))
    assert out.shape == (B, tg_dim, H, W), out.shape
    assert np.all(np.isfinite(np.asarray(out)))
    np.testing.assert_allclose(np.asarray(out), np.asarray(ref),
                               atol=1e-2, rtol=1e-2)
    print("KERNEL_OK")
</pallas_src>

<mosaic_0001>
module attributes {stable_mosaic.version = 11 : i64} {
  func.func @kernel(%arg0: i32, %arg1: memref<1x32x8xbf16, #tpu.memory_space<vmem>>, %arg2: memref<1x32x16xbf16, #tpu.memory_space<vmem>>, %arg3: memref<8x128xbf16, #tpu.memory_space<vmem>>, %arg4: memref<1x128xf32, #tpu.memory_space<vmem>>, %arg5: memref<8x128xbf16, #tpu.memory_space<vmem>>, %arg6: memref<1x128xf32, #tpu.memory_space<vmem>>, %arg7: memref<16x128xbf16, #tpu.memory_space<vmem>>, %arg8: memref<1x128xf32, #tpu.memory_space<vmem>>, %arg9: memref<1x128xf32, #tpu.memory_space<vmem>>, %arg10: memref<1x128xf32, #tpu.memory_space<vmem>>, %arg11: memref<1x128xf32, #tpu.memory_space<vmem>>, %arg12: memref<1x128xf32, #tpu.memory_space<vmem>>, %arg13: memref<1x32xf32, #tpu.memory_space<vmem>>, %arg14: memref<1x32xf32, #tpu.memory_space<vmem>>, %arg15: memref<32x128xbf16, #tpu.memory_space<vmem>>, %arg16: memref<1x128xf32, #tpu.memory_space<vmem>>, %arg17: memref<1152x128xbf16, #tpu.memory_space<vmem>>, %arg18: memref<1x128xf32, #tpu.memory_space<vmem>>, %arg19: memref<1x128xf32, #tpu.memory_space<vmem>>, %arg20: memref<1152x128xbf16, #tpu.memory_space<vmem>>, %arg21: memref<1x128xf32, #tpu.memory_space<vmem>>, %arg22: memref<1x128xf32, #tpu.memory_space<vmem>>, %arg23: memref<1x32x128xf32, #tpu.memory_space<vmem>>, %arg24: memref<57x128xf32, #tpu.memory_space<vmem>>, %arg25: memref<32x128xbf16, #tpu.memory_space<vmem>>) attributes {dimension_semantics = [#tpu.dimension_semantics<parallel>], iteration_bounds = array<i64: 2>, scalar_prefetch = 0 : i64, scratch_operands = 2 : i64, tpu.core_type = #tpu.core_type<tc>, window_params = [{transform_indices = @transform_0, window_bounds = array<i64: 1, 32, 8>}, {transform_indices = @transform_1, window_bounds = array<i64: 1, 32, 16>}, {pipeline_mode = #tpu.pipeline_mode<synchronous>, transform_indices = @transform_2, window_bounds = array<i64: 8, 128>}, {pipeline_mode = #tpu.pipeline_mode<synchronous>, transform_indices = @transform_3, window_bounds = array<i64: 1, 128>}, {pipeline_mode = #tpu.pipeline_mode<synchronous>, transform_indices = @transform_4, window_bounds = array<i64: 8, 128>}, {pipeline_mode = #tpu.pipeline_mode<synchronous>, transform_indices = @transform_5, window_bounds = array<i64: 1, 128>}, {pipeline_mode = #tpu.pipeline_mode<synchronous>, transform_indices = @transform_6, window_bounds = array<i64: 16, 128>}, {pipeline_mode = #tpu.pipeline_mode<synchronous>, transform_indices = @transform_7, window_bounds = array<i64: 1, 128>}, {pipeline_mode = #tpu.pipeline_mode<synchronous>, transform_indices = @transform_8, window_bounds = array<i64: 1, 128>}, {pipeline_mode = #tpu.pipeline_mode<synchronous>, transform_indices = @transform_9, window_bounds = array<i64: 1, 128>}, {pipeline_mode = #tpu.pipeline_mode<synchronous>, transform_indices = @transform_10, window_bounds = array<i64: 1, 128>}, {pipeline_mode = #tpu.pipeline_mode<synchronous>, transform_indices = @transform_11, window_bounds = array<i64: 1, 128>}, {pipeline_mode = #tpu.pipeline_mode<synchronous>, transform_indices = @transform_12, window_bounds = array<i64: 1, 32>}, {pipeline_mode = #tpu.pipeline_mode<synchronous>, transform_indices = @transform_13, window_bounds = array<i64: 1, 32>}, {pipeline_mode = #tpu.pipeline_mode<synchronous>, transform_indices = @transform_14, window_bounds = array<i64: 32, 128>}, {pipeline_mode = #tpu.pipeline_mode<synchronous>, transform_indices = @transform_15, window_bounds = array<i64: 1, 128>}, {pipeline_mode = #tpu.pipeline_mode<synchronous>, transform_indices = @transform_16, window_bounds = array<i64: 1152, 128>}, {pipeline_mode = #tpu.pipeline_mode<synchronous>, transform_indices = @transform_17, window_bounds = array<i64: 1, 128>}, {pipeline_mode = #tpu.pipeline_mode<synchronous>, transform_indices = @transform_18, window_bounds = array<i64: 1, 128>}, {pipeline_mode = #tpu.pipeline_mode<synchronous>, transform_indices = @transform_19, window_bounds = array<i64: 1152, 128>}, {pipeline_mode = #tpu.pipeline_mode<synchronous>, transform_indices = @transform_20, window_bounds = array<i64: 1, 128>}, {pipeline_mode = #tpu.pipeline_mode<synchronous>, transform_indices = @transform_21, window_bounds = array<i64: 1, 128>}, {transform_indices = @transform_22, window_bounds = array<i64: 1, 32, 128>}]} {
    %cst = arith.constant 0.000000e+00 : f32
    %0 = vector.broadcast %cst : f32 to vector<16x128xf32>
    %c0 = arith.constant 0 : index
    %c0_0 = arith.constant 0 : index
    %1 = vector.load %arg24[%c0, %c0_0] : memref<57x128xf32, #tpu.memory_space<vmem>>, vector<16x128xf32>
    tpu.vector_store %arg24[%c0, %c0_0], %0 {strides = array<i32>} : memref<57x128xf32, #tpu.memory_space<vmem>>, vector<16x128xf32>,
    %cst_1 = arith.constant 0.000000e+00 : f32
    %2 = vector.broadcast %cst_1 : f32 to vector<9x128xf32>
    %c48 = arith.constant 48 : index
    %c0_2 = arith.constant 0 : index
    %3 = vector.load %arg24[%c48, %c0_2] : memref<57x128xf32, #tpu.memory_space<vmem>>, vector<9x128xf32>
    tpu.vector_store %arg24[%c48, %c0_2], %2 {strides = array<i32>} : memref<57x128xf32, #tpu.memory_space<vmem>>, vector<9x128xf32>,
    %c0_3 = arith.constant 0 : index
    %c0_4 = arith.constant 0 : index
    %c0_5 = arith.constant 0 : index
    %4 = vector.load %arg1[%c0_3, %c0_4, %c0_5] : memref<1x32x8xbf16, #tpu.memory_space<vmem>>, vector<1x32x8xbf16>
    %5 = vector.shape_cast %4 : vector<1x32x8xbf16> to vector<32x8xbf16>
    %c0_6 = arith.constant 0 : index
    %c0_7 = arith.constant 0 : index
    %6 = vector.load %arg5[%c0_6, %c0_7] : memref<8x128xbf16, #tpu.memory_space<vmem>>, vector<8x128xbf16>
    %cst_8 = arith.constant dense<0.000000e+00> : vector<32x128xf32>
    %7 = tpu.matmul %5, %6, %cst_8 {dimension_numbers = #tpu.dot_dimension_numbers<[1], [0], [0], [1], [0, 0, 1, 1], [], []>} : vector<32x8xbf16>, vector<8x128xbf16>, vector<32x128xf32> -> vector<32x128xf32>
    %c0_9 = arith.constant 0 : index
    %c0_10 = arith.constant 0 : index
    %8 = vector.load %arg6[%c0_9, %c0_10] : memref<1x128xf32, #tpu.memory_space<vmem>>, vector<1x128xf32>
    %9 = vector.broadcast %8 : vector<1x128xf32> to vector<32x128xf32>
    %10 = arith.addf %7, %9 : vector<32x128xf32>
    %c0_11 = arith.constant 0 : index
    %c0_12 = arith.constant 0 : index
    %c0_13 = arith.constant 0 : index
    %11 = vector.load %arg2[%c0_11, %c0_12, %c0_13] : memref<1x32x16xbf16, #tpu.memory_space<vmem>>, vector<1x32x16xbf16>
    %12 = vector.shape_cast %11 : vector<1x32x16xbf16> to vector<32x16xbf16>
    %c0_14 = arith.constant 0 : index
    %c0_15 = arith.constant 0 : index
    %13 = vector.load %arg7[%c0_14, %c0_15] : memref<16x128xbf16, #tpu.memory_space<vmem>>, vector<16x128xbf16>
    %cst_16 = arith.constant dense<0.000000e+00> : vector<32x128xf32>
    %14 = tpu.matmul %12, %13, %cst_16 {dimension_numbers = #tpu.dot_dimension_numbers<[1], [0], [0], [1], [0, 0, 1, 1], [], []>} : vector<32x16xbf16>, vector<16x128xbf16>, vector<32x128xf32> -> vector<32x128xf32>
    %c0_17 = arith.constant 0 : index
    %c0_18 = arith.constant 0 : index
    %15 = vector.load %arg8[%c0_17, %c0_18] : memref<1x128xf32, #tpu.memory_space<vmem>>, vector<1x128xf32>
    %16 = vector.broadcast %15 : vector<1x128xf32> to vector<32x128xf32>
    %17 = arith.addf %14, %16 : vector<32x128xf32>
    %c0_19 = arith.constant 0 : index
    %c0_20 = arith.constant 0 : index
    %18 = vector.load %arg9[%c0_19, %c0_20] : memref<1x128xf32, #tpu.memory_space<vmem>>, vector<1x128xf32>
    %c0_21 = arith.constant 0 : index
    %c0_22 = arith.constant 0 : index
    %19 = vector.load %arg10[%c0_21, %c0_22] : memref<1x128xf32, #tpu.memory_space<vmem>>, vector<1x128xf32>
    %cst_23 = arith.constant dense<0.000000e+00> : vector<32xf32>
    %20 = vector.multi_reduction <add>, %10, %cst_23 [1] : vector<32x128xf32> to vector<32xf32>
    %21 = vector.shape_cast %20 : vector<32xf32> to vector<32x1xf32>
    %22 = arith.mulf %10, %10 : vector<32x128xf32>
    %cst_24 = arith.constant dense<0.000000e+00> : vector<32xf32>
    %23 = vector.multi_reduction <add>, %22, %cst_24 [1] : vector<32x128xf32> to vector<32xf32>
    %24 = vector.shape_cast %23 : vector<32xf32> to vector<32x1xf32>
    %cst_25 = arith.constant 1.250000e-01 : f32
    %25 = vector.broadcast %cst_25 : f32 to vector<32x1xf32>
    %26 = arith.mulf %21, %25 : vector<32x1xf32>
    %cst_26 = arith.constant 1.250000e-01 : f32
    %27 = vector.broadcast %cst_26 : f32 to vector<32x1xf32>
    %28 = arith.mulf %24, %27 : vector<32x1xf32>
    %29 = arith.mulf %26, %26 : vector<32x1xf32>
    %30 = arith.subf %28, %29 : vector<32x1xf32>
    %cst_27 = arith.constant 0.000000e+00 : f32
    %31 = vector.broadcast %cst_27 : f32 to vector<32x1xf32>
    %32 = arith.maximumf %30, %31 : vector<32x1xf32>
    %33 = vector.broadcast %26 : vector<32x1xf32> to vector<32x128xf32>
    %34 = arith.subf %10, %33 : vector<32x128xf32>
    %cst_28 = arith.constant 9.99999974E-6 : f32
    %35 = vector.broadcast %cst_28 : f32 to vector<32x1xf32>
    %36 = arith.addf %32, %35 : vector<32x1xf32>
    %37 = math.rsqrt %36 : vector<32x1xf32>
    %38 = vector.broadcast %37 : vector<32x1xf32> to vector<32x128xf32>
    %39 = arith.mulf %34, %38 : vector<32x128xf32>
    %40 = vector.broadcast %18 : vector<1x128xf32> to vector<32x128xf32>
    %41 = arith.mulf %39, %40 : vector<32x128xf32>
    %42 = vector.broadcast %19 : vector<1x128xf32> to vector<32x128xf32>
    %43 = arith.addf %41, %42 : vector<32x128xf32>
    %44 = arith.truncf %43 : vector<32x128xf32> to vector<32x128xbf16>
    %c0_29 = arith.constant 0 : index
    %c0_30 = arith.constant 0 : index
    %45 = vector.load %arg11[%c0_29, %c0_30] : memref<1x128xf32, #tpu.memory_space<vmem>>, vector<1x128xf32>
    %c0_31 = arith.constant 0 : index
    %c0_32 = arith.constant 0 : index
    %46 = vector.load %arg12[%c0_31, %c0_32] : memref<1x128xf32, #tpu.memory_space<vmem>>, vector<1x128xf32>
    %cst_33 = arith.constant dense<0.000000e+00> : vector<32xf32>
    %47 = vector.multi_reduction <add>, %17, %cst_33 [1] : vector<32x128xf32> to vector<32xf32>
    %48 = vector.shape_cast %47 : vector<32xf32> to vector<32x1xf32>
    %49 = arith.mulf %17, %17 : vector<32x128xf32>
    %cst_34 = arith.constant dense<0.000000e+00> : vector<32xf32>
    %50 = vector.multi_reduction <add>, %49, %cst_34 [1] : vector<32x128xf32> to vector<32xf32>
    %51 = vector.shape_cast %50 : vector<32xf32> to vector<32x1xf32>
    %cst_35 = arith.constant 1.250000e-01 : f32
    %52 = vector.broadcast %cst_35 : f32 to vector<32x1xf32>
    %53 = arith.mulf %48, %52 : vector<32x1xf32>
    %cst_36 = arith.constant 1.250000e-01 : f32
    %54 = vector.broadcast %cst_36 : f32 to vector<32x1xf32>
    %55 = arith.mulf %51, %54 : vector<32x1xf32>
    %56 = arith.mulf %53, %53 : vector<32x1xf32>
    %57 = arith.subf %55, %56 : vector<32x1xf32>
    %cst_37 = arith.constant 0.000000e+00 : f32
    %58 = vector.broadcast %cst_37 : f32 to vector<32x1xf32>
    %59 = arith.maximumf %57, %58 : vector<32x1xf32>
    %60 = vector.broadcast %53 : vector<32x1xf32> to vector<32x128xf32>
    %61 = arith.subf %17, %60 : vector<32x128xf32>
    %cst_38 = arith.constant 9.99999974E-6 : f32
    %62 = vector.broadcast %cst_38 : f32 to vector<32x1xf32>
    %63 = arith.addf %59, %62 : vector<32x1xf32>
    %64 = math.rsqrt %63 : vector<32x1xf32>
    %65 = vector.broadcast %64 : vector<32x1xf32> to vector<32x128xf32>
    %66 = arith.mulf %61, %65 : vector<32x128xf32>
    %67 = vector.broadcast %45 : vector<1x128xf32> to vector<32x128xf32>
    %68 = arith.mulf %66, %67 : vector<32x128xf32>
    %69 = vector.broadcast %46 : vector<1x128xf32> to vector<32x128xf32>
    %70 = arith.addf %68, %69 : vector<32x128xf32>
    %71 = arith.truncf %70 : vector<32x128xf32> to vector<32x128xbf16>
    %72 = tpu.transpose %71, [1, 0] : vector<32x128xbf16> -> vector<128x32xbf16>
    %c0_39 = arith.constant 0 : index
    %c0_40 = arith.constant 0 : index
    %73 = vector.load %arg25[%c0_39, %c0_40] : memref<32x128xbf16, #tpu.memory_space<vmem>>, vector<32x128xbf16>
    tpu.vector_store %arg25[%c0_39, %c0_40], %44 {strides = array<i32>} : memref<32x128xbf16, #tpu.memory_space<vmem>>, vector<32x128xbf16>,
    %c0_41 = arith.constant 0 : index
    %c0_42 = arith.constant 0 : index
    %74 = vector.load %arg13[%c0_41, %c0_42] : memref<1x32xf32, #tpu.memory_space<vmem>>, vector<1x32xf32>
    %c0_43 = arith.constant 0 : index
    %c0_44 = arith.constant 0 : index
    %75 = vector.load %arg14[%c0_43, %c0_44] : memref<1x32xf32, #tpu.memory_space<vmem>>, vector<1x32xf32>
    %c0_45 = arith.constant 0 : index
    %c0_46 = arith.constant 0 : index
    %76 = vector.load %arg15[%c0_45, %c0_46] : memref<32x128xbf16, #tpu.memory_space<vmem>>, vector<32x128xbf16>
    %c0_47 = arith.constant 0 : index
    %c0_48 = arith.constant 0 : index
    %77 = vector.load %arg16[%c0_47, %c0_48] : memref<1x128xf32, #tpu.memory_space<vmem>>, vector<1x128xf32>
    %c0_i32 = arith.constant 0 : i32
    %c16_i32 = arith.constant 16 : i32
    %78 = arith.muli %c0_i32, %c16_i32 : i32
    %79 = tpu.assume_multiple %78, 16 : i32
    %80 = arith.index_cast %79 : i32 to index
    %c0_49 = arith.constant 0 : index
    %81 = vector.load %arg25[%80, %c0_49] : memref<32x128xbf16, #tpu.memory_space<vmem>>, vector<16x128xbf16>
    %cst_50 = arith.constant dense<0.000000e+00> : vector<16x32xf32>
    %82 = tpu.matmul %81, %72, %cst_50 {dimension_numbers = #tpu.dot_dimension_numbers<[1], [0], [0], [1], [0, 0, 1, 1], [], []>} : vector<16x128xbf16>, vector<128x32xbf16>, vector<16x32xf32> -> vector<16x32xf32>
    %cst_51 = arith.constant dense<0.000000e+00> : vector<16xf32>
    %83 = vector.multi_reduction <add>, %82, %cst_51 [1] : vector<16x32xf32> to vector<16xf32>
    %84 = vector.shape_cast %83 : vector<16xf32> to vector<16x1xf32>
    %85 = arith.mulf %82, %82 : vector<16x32xf32>
    %cst_52 = arith.constant dense<0.000000e+00> : vector<16xf32>
    %86 = vector.multi_reduction <add>, %85, %cst_52 [1] : vector<16x32xf32> to vector<16xf32>
    %87 = vector.shape_cast %86 : vector<16xf32> to vector<16x1xf32>
    %cst_53 = arith.constant 3.125000e-02 : f32
    %88 = vector.broadcast %cst_53 : f32 to vector<16x1xf32>
    %89 = arith.mulf %84, %88 : vector<16x1xf32>
    %cst_54 = arith.constant 3.125000e-02 : f32
    %90 = vector.broadcast %cst_54 : f32 to vector<16x1xf32>
    %91 = arith.mulf %87, %90 : vector<16x1xf32>
    %92 = arith.mulf %89, %89 : vector<16x1xf32>
    %93 = arith.subf %91, %92 : vector<16x1xf32>
    %cst_55 = arith.constant 0.000000e+00 : f32
    %94 = vector.broadcast %cst_55 : f32 to vector<16x1xf32>
    %95 = arith.maximumf %93, %94 : vector<16x1xf32>
    %96 = vector.broadcast %89 : vector<16x1xf32> to vector<16x32xf32>
    %97 = arith.subf %82, %96 : vector<16x32xf32>
    %cst_56 = arith.constant 9.99999974E-6 : f32
    %98 = vector.broadcast %cst_56 : f32 to vector<16x1xf32>
    %99 = arith.addf %95, %98 : vector<16x1xf32>
    %100 = math.rsqrt %99 : vector<16x1xf32>
    %101 = vector.broadcast %100 : vector<16x1xf32> to vector<16x32xf32>
    %102 = arith.mulf %97, %101 : vector<16x32xf32>
    %103 = vector.broadcast %74 : vector<1x32xf32> to vector<16x32xf32>
    %104 = arith.mulf %102, %103 : vector<16x32xf32>
    %105 = vector.broadcast %75 : vector<1x32xf32> to vector<16x32xf32>
    %106 = arith.addf %104, %105 : vector<16x32xf32>
    %107 = arith.truncf %106 : vector<16x32xf32> to vector<16x32xbf16>
    %cst_57 = arith.constant dense<0.000000e+00> : vector<16x128xf32>
    %108 = tpu.matmul %107, %76, %cst_57 {dimension_numbers = #tpu.dot_dimension_numbers<[1], [0], [0], [1], [0, 0, 1, 1], [], []>} : vector<16x32xbf16>, vector<32x128xbf16>, vector<16x128xf32> -> vector<16x128xf32>
    %109 = vector.broadcast %77 : vector<1x128xf32> to vector<16x128xf32>
    %110 = arith.addf %108, %109 : vector<16x128xf32>
    %cst_58 = arith.constant 0.000000e+00 : f32
    %111 = vector.broadcast %cst_58 : f32 to vector<16x128xf32>
    %112 = arith.maximumf %110, %111 : vector<16x128xf32>
    %c16_i32_59 = arith.constant 16 : i32
    %113 = arith.addi %c16_i32_59, %79 : i32
    %114 = arith.index_cast %113 : i32 to index
    %c0_60 = arith.constant 0 : index
    %115 = vector.load %arg24[%114, %c0_60] : memref<57x128xf32, #tpu.memory_space<vmem>>, vector<16x128xf32>
    tpu.vector_store %arg24[%114, %c0_60], %112 {strides = array<i32>} : memref<57x128xf32, #tpu.memory_space<vmem>>, vector<16x128xf32>,
    %c1_i32 = arith.constant 1 : i32
    %c16_i32_61 = arith.constant 16 : i32
    %116 = arith.muli %c1_i32, %c16_i32_61 : i32
    %117 = tpu.assume_multiple %116, 16 : i32
    %118 = arith.index_cast %117 : i32 to index
    %c0_62 = arith.constant 0 : index
    %119 = vector.load %arg25[%118, %c0_62] : memref<32x128xbf16, #tpu.memory_space<vmem>>, vector<16x128xbf16>
    %cst_63 = arith.constant dense<0.000000e+00> : vector<16x32xf32>
    %120 = tpu.matmul %119, %72, %cst_63 {dimension_numbers = #tpu.dot_dimension_numbers<[1], [0], [0], [1], [0, 0, 1, 1], [], []>} : vector<16x128xbf16>, vector<128x32xbf16>, vector<16x32xf32> -> vector<16x32xf32>
    %cst_64 = arith.constant dense<0.000000e+00> : vector<16xf32>
    %121 = vector.multi_reduction <add>, %120, %cst_64 [1] : vector<16x32xf32> to vector<16xf32>
    %122 = vector.shape_cast %121 : vector<16xf32> to vector<16x1xf32>
    %123 = arith.mulf %120, %120 : vector<16x32xf32>
    %cst_65 = arith.constant dense<0.000000e+00> : vector<16xf32>
    %124 = vector.multi_reduction <add>, %123, %cst_65 [1] : vector<16x32xf32> to vector<16xf32>
    %125 = vector.shape_cast %124 : vector<16xf32> to vector<16x1xf32>
    %cst_66 = arith.constant 3.125000e-02 : f32
    %126 = vector.broadcast %cst_66 : f32 to vector<16x1xf32>
    %127 = arith.mulf %122, %126 : vector<16x1xf32>
    %cst_67 = arith.constant 3.125000e-02 : f32
    %128 = vector.broadcast %cst_67 : f32 to vector<16x1xf32>
    %129 = arith.mulf %125, %128 : vector<16x1xf32>
    %130 = arith.mulf %127, %127 : vector<16x1xf32>
    %131 = arith.subf %129, %130 : vector<16x1xf32>
    %cst_68 = arith.constant 0.000000e+00 : f32
    %132 = vector.broadcast %cst_68 : f32 to vector<16x1xf32>
    %133 = arith.maximumf %131, %132 : vector<16x1xf32>
    %134 = vector.broadcast %127 : vector<16x1xf32> to vector<16x32xf32>
    %135 = arith.subf %120, %134 : vector<16x32xf32>
    %cst_69 = arith.constant 9.99999974E-6 : f32
    %136 = vector.broadcast %cst_69 : f32 to vector<16x1xf32>
    %137 = arith.addf %133, %136 : vector<16x1xf32>
    %138 = math.rsqrt %137 : vector<16x1xf32>
    %139 = vector.broadcast %138 : vector<16x1xf32> to vector<16x32xf32>
    %140 = arith.mulf %135, %139 : vector<16x32xf32>
    %141 = vector.broadcast %74 : vector<1x32xf32> to vector<16x32xf32>
    %142 = arith.mulf %140, %141 : vector<16x32xf32>
    %143 = vector.broadcast %75 : vector<1x32xf32> to vector<16x32xf32>
    %144 = arith.addf %142, %143 : vector<16x32xf32>
    %145 = arith.truncf %144 : vector<16x32xf32> to vector<16x32xbf16>
    %cst_70 = arith.constant dense<0.000000e+00> : vector<16x128xf32>
    %146 = tpu.matmul %145, %76, %cst_70 {dimension_numbers = #tpu.dot_dimension_numbers<[1], [0], [0], [1], [0, 0, 1, 1], [], []>} : vector<16x32xbf16>, vector<32x128xbf16>, vector<16x128xf32> -> vector<16x128xf32>
    %147 = vector.broadcast %77 : vector<1x128xf32> to vector<16x128xf32>
    %148 = arith.addf %146, %147 : vector<16x128xf32>
    %cst_71 = arith.constant 0.000000e+00 : f32
    %149 = vector.broadcast %cst_71 : f32 to vector<16x128xf32>
    %150 = arith.maximumf %148, %149 : vector<16x128xf32>
    %c16_i32_72 = arith.constant 16 : i32
    %151 = arith.addi %c16_i32_72, %117 : i32
    %152 = arith.index_cast %151 : i32 to index
    %c0_73 = arith.constant 0 : index
    %153 = vector.load %arg24[%152, %c0_73] : memref<57x128xf32, #tpu.memory_space<vmem>>, vector<16x128xf32>
    tpu.vector_store %arg24[%152, %c0_73], %150 {strides = array<i32>} : memref<57x128xf32, #tpu.memory_space<vmem>>, vector<16x128xf32>,
    %c2_i32 = arith.constant 2 : i32
    %154 = tpu.iota {dimensions = array<i32: 0>} : vector<32x1xi32>
    %c8_i32 = arith.constant 8 : i32
    %c0_i32_74 = arith.constant 0 : i32
    %155 = arith.cmpi eq, %c8_i32, %c0_i32_74 : i32
    %c1_i32_75 = arith.constant 1 : i32
    %156 = arith.select %155, %c1_i32_75, %c8_i32 : i32
    %157 = vector.broadcast %156 : i32 to vector<32x1xi32>
    %158 = arith.remsi %154, %157 : vector<32x1xi32>
    %c0_i32_76 = arith.constant 0 : i32
    %159 = vector.broadcast %c0_i32_76 : i32 to vector<32x1xi32>
    %160 = arith.cmpi ne, %158, %159 : vector<32x1xi32>
    %c0_i32_77 = arith.constant 0 : i32
    %161 = vector.broadcast %c0_i32_77 : i32 to vector<32x1xi32>
    %162 = arith.cmpi slt, %158, %161 : vector<32x1xi32>
    %c0_i32_78 = arith.constant 0 : i32
    %163 = arith.cmpi slt, %156, %c0_i32_78 : i32
    %164 = vector.broadcast %163 : i1 to vector<32x1xi1>
    %165 = vector.broadcast %164 : vector<32x1xi1> to vector<32x1xi1>
    %166 = arith.xori %162, %165 : vector<32x1xi1>
    %167 = arith.andi %166, %160 : vector<32x1xi1>
    %168 = vector.broadcast %156 : i32 to vector<32x1xi32>
    %169 = arith.addi %158, %168 : vector<32x1xi32>
    %170 = arith.select %167, %169, %158 : vector<32x1xi1>, vector<32x1xi32>
    %c0_i32_79 = arith.constant 0 : i32
    %171 = vector.broadcast %c0_i32_79 : i32 to vector<32x1xi32>
    %172 = arith.cmpi sgt, %170, %171 : vector<32x1xi32>
    %173 = arith.extui %172 : vector<32x1xi1> to vector<32x1xi32>
    %174 = arith.sitofp %173 : vector<32x1xi32> to vector<32x1xf32>
    %c7_i32 = arith.constant 7 : i32
    %175 = vector.broadcast %c7_i32 : i32 to vector<32x1xi32>
    %176 = arith.cmpi slt, %170, %175 : vector<32x1xi32>
    %177 = arith.extui %176 : vector<32x1xi1> to vector<32x1xi32>
    %178 = arith.sitofp %177 : vector<32x1xi32> to vector<32x1xf32>
    %cst_80 = arith.constant 0.000000e+00 : f32
    %179 = vector.broadcast %cst_80 : f32 to vector<32x128xf32>
    %c7 = arith.constant 7 : index
    %c0_81 = arith.constant 0 : index
    %180 = vector.load %arg24[%c7, %c0_81] : memref<57x128xf32, #tpu.memory_space<vmem>>, vector<32x128xf32>
    %181 = vector.broadcast %174 : vector<32x1xf32> to vector<32x128xf32>
    %182 = arith.mulf %180, %181 : vector<32x128xf32>
    %183 = arith.truncf %182 : vector<32x128xf32> to vector<32x128xbf16>
    %c0_82 = arith.constant 0 : index
    %c0_83 = arith.constant 0 : index
    %184 = vector.load %arg17[%c0_82, %c0_83] : memref<1152x128xbf16, #tpu.memory_space<vmem>>, vector<128x128xbf16>
    %cst_84 = arith.constant dense<0.000000e+00> : vector<32x128xf32>
    %185 = tpu.matmul %183, %184, %cst_84 {dimension_numbers = #tpu.dot_dimension_numbers<[1], [0], [0], [1], [0, 0, 1, 1], [], []>} : vector<32x128xbf16>, vector<128x128xbf16>, vector<32x128xf32> -> vector<32x128xf32>
    %186 = arith.addf %179, %185 : vector<32x128xf32>
    %c8 = arith.constant 8 : index
    %c0_85 = arith.constant 0 : index
    %187 = vector.load %arg24[%c8, %c0_85] : memref<57x128xf32, #tpu.memory_space<vmem>>, vector<32x128xf32>
    %188 = arith.truncf %187 : vector<32x128xf32> to vector<32x128xbf16>
    %c128 = arith.constant 128 : index
    %c0_86 = arith.constant 0 : index
    %189 = vector.load %arg17[%c128, %c0_86] : memref<1152x128xbf16, #tpu.memory_space<vmem>>, vector<128x128xbf16>
    %cst_87 = arith.constant dense<0.000000e+00> : vector<32x128xf32>
    %190 = tpu.matmul %188, %189, %cst_87 {dimension_numbers = #tpu.dot_dimension_numbers<[1], [0], [0], [1], [0, 0, 1, 1], [], []>} : vector<32x128xbf16>, vector<128x128xbf16>, vector<32x128xf32> -> vector<32x128xf32>
    %191 = arith.addf %186, %190 : vector<32x128xf32>
    %c9 = arith.constant 9 : index
    %c0_88 = arith.constant 0 : index
    %192 = vector.load %arg24[%c9, %c0_88] : memref<57x128xf32, #tpu.memory_space<vmem>>, vector<32x128xf32>
    %193 = vector.broadcast %178 : vector<32x1xf32> to vector<32x128xf32>
    %194 = arith.mulf %192, %193 : vector<32x128xf32>
    %195 = arith.truncf %194 : vector<32x128xf32> to vector<32x128xbf16>
    %c256 = arith.constant 256 : index
    %c0_89 = arith.constant 0 : index
    %196 = vector.load %arg17[%c256, %c0_89] : memref<1152x128xbf16, #tpu.memory_space<vmem>>, vector<128x128xbf16>
    %cst_90 = arith.constant dense<0.000000e+00> : vector<32x128xf32>
    %197 = tpu.matmul %195, %196, %cst_90 {dimension_numbers = #tpu.dot_dimension_numbers<[1], [0], [0], [1], [0, 0, 1, 1], [], []>} : vector<32x128xbf16>, vector<128x128xbf16>, vector<32x128xf32> -> vector<32x128xf32>
    %198 = arith.addf %191, %197 : vector<32x128xf32>
    %c15 = arith.constant 15 : index
    %c0_91 = arith.constant 0 : index
    %199 = vector.load %arg24[%c15, %c0_91] : memref<57x128xf32, #tpu.memory_space<vmem>>, vector<32x128xf32>
    %200 = vector.broadcast %174 : vector<32x1xf32> to vector<32x128xf32>
    %201 = arith.mulf %199, %200 : vector<32x128xf32>
    %202 = arith.truncf %201 : vector<32x128xf32> to vector<32x128xbf16>
    %c384 = arith.constant 384 : index
    %c0_92 = arith.constant 0 : index
    %203 = vector.load %arg17[%c384, %c0_92] : memref<1152x128xbf16, #tpu.memory_space<vmem>>, vector<128x128xbf16>
    %cst_93 = arith.constant dense<0.000000e+00> : vector<32x128xf32>
    %204 = tpu.matmul %202, %203, %cst_93 {dimension_numbers = #tpu.dot_dimension_numbers<[1], [0], [0], [1], [0, 0, 1, 1], [], []>} : vector<32x128xbf16>, vector<128x128xbf16>, vector<32x128xf32> -> vector<32x128xf32>
    %205 = arith.addf %198, %204 : vector<32x128xf32>
    %c16 = arith.constant 16 : index
    %c0_94 = arith.constant 0 : index
    %206 = vector.load %arg24[%c16, %c0_94] : memref<57x128xf32, #tpu.memory_space<vmem>>, vector<32x128xf32>
    %207 = arith.truncf %206 : vector<32x128xf32> to vector<32x128xbf16>
    %c512 = arith.constant 512 : index
    %c0_95 = arith.constant 0 : index
    %208 = vector.load %arg17[%c512, %c0_95] : memref<1152x128xbf16, #tpu.memory_space<vmem>>, vector<128x128xbf16>
    %cst_96 = arith.constant dense<0.000000e+00> : vector<32x128xf32>
    %209 = tpu.matmul %207, %208, %cst_96 {dimension_numbers = #tpu.dot_dimension_numbers<[1], [0], [0], [1], [0, 0, 1, 1], [], []>} : vector<32x128xbf16>, vector<128x128xbf16>, vector<32x128xf32> -> vector<32x128xf32>
    %210 = arith.addf %205, %209 : vector<32x128xf32>
    %c17 = arith.constant 17 : index
    %c0_97 = arith.constant 0 : index
    %211 = vector.load %arg24[%c17, %c0_97] : memref<57x128xf32, #tpu.memory_space<vmem>>, vector<32x128xf32>
    %212 = vector.broadcast %178 : vector<32x1xf32> to vector<32x128xf32>
    %213 = arith.mulf %211, %212 : vector<32x128xf32>
    %214 = arith.truncf %213 : vector<32x128xf32> to vector<32x128xbf16>
    %c640 = arith.constant 640 : index
    %c0_98 = arith.constant 0 : index
    %215 = vector.load %arg17[%c640, %c0_98] : memref<1152x128xbf16, #tpu.memory_space<vmem>>, vector<128x128xbf16>
    %cst_99 = arith.constant dense<0.000000e+00> : vector<32x128xf32>
    %216 = tpu.matmul %214, %215, %cst_99 {dimension_numbers = #tpu.dot_dimension_numbers<[1], [0], [0], [1], [0, 0, 1, 1], [], []>} : vector<32x128xbf16>, vector<128x128xbf16>, vector<32x128xf32> -> vector<32x128xf32>
    %217 = arith.addf %210, %216 : vector<32x128xf32>
    %c23 = arith.constant 23 : index
    %c0_100 = arith.constant 0 : index
    %218 = vector.load %arg24[%c23, %c0_100] : memref<57x128xf32, #tpu.memory_space<vmem>>, vector<32x128xf32>
    %219 = vector.broadcast %174 : vector<32x1xf32> to vector<32x128xf32>
    %220 = arith.mulf %218, %219 : vector<32x128xf32>
    %221 = arith.truncf %220 : vector<32x128xf32> to vector<32x128xbf16>
    %c768 = arith.constant 768 : index
    %c0_101 = arith.constant 0 : index
    %222 = vector.load %arg17[%c768, %c0_101] : memref<1152x128xbf16, #tpu.memory_space<vmem>>, vector<128x128xbf16>
    %cst_102 = arith.constant dense<0.000000e+00> : vector<32x128xf32>
    %223 = tpu.matmul %221, %222, %cst_102 {dimension_numbers = #tpu.dot_dimension_numbers<[1], [0], [0], [1], [0, 0, 1, 1], [], []>} : vector<32x128xbf16>, vector<128x128xbf16>, vector<32x128xf32> -> vector<32x128xf32>
    %224 = arith.addf %217, %223 : vector<32x128xf32>
    %c24 = arith.constant 24 : index
    %c0_103 = arith.constant 0 : index
    %225 = vector.load %arg24[%c24, %c0_103] : memref<57x128xf32, #tpu.memory_space<vmem>>, vector<32x128xf32>
    %226 = arith.truncf %225 : vector<32x128xf32> to vector<32x128xbf16>
    %c896 = arith.constant 896 : index
    %c0_104 = arith.constant 0 : index
    %227 = vector.load %arg17[%c896, %c0_104] : memref<1152x128xbf16, #tpu.memory_space<vmem>>, vector<128x128xbf16>
    %cst_105 = arith.constant dense<0.000000e+00> : vector<32x128xf32>
    %228 = tpu.matmul %226, %227, %cst_105 {dimension_numbers = #tpu.dot_dimension_numbers<[1], [0], [0], [1], [0, 0, 1, 1], [], []>} : vector<32x128xbf16>, vector<128x128xbf16>, vector<32x128xf32> -> vector<32x128xf32>
    %229 = arith.addf %224, %228 : vector<32x128xf32>
    %c25 = arith.constant 25 : index
    %c0_106 = arith.constant 0 : index
    %230 = vector.load %arg24[%c25, %c0_106] : memref<57x128xf32, #tpu.memory_space<vmem>>, vector<32x128xf32>
    %231 = vector.broadcast %178 : vector<32x1xf32> to vector<32x128xf32>
    %232 = arith.mulf %230, %231 : vector<32x128xf32>
    %233 = arith.truncf %232 : vector<32x128xf32> to vector<32x128xbf16>
    %c1024 = arith.constant 1024 : index
    %c0_107 = arith.constant 0 : index
    %234 = vector.load %arg17[%c1024, %c0_107] : memref<1152x128xbf16, #tpu.memory_space<vmem>>, vector<128x128xbf16>
    %cst_108 = arith.constant dense<0.000000e+00> : vector<32x128xf32>
    %235 = tpu.matmul %233, %234, %cst_108 {dimension_numbers = #tpu.dot_dimension_numbers<[1], [0], [0], [1], [0, 0, 1, 1], [], []>} : vector<32x128xbf16>, vector<128x128xbf16>, vector<32x128xf32> -> vector<32x128xf32>
    %236 = arith.addf %229, %235 : vector<32x128xf32>
    %c0_109 = arith.constant 0 : index
    %c0_110 = arith.constant 0 : index
    %237 = vector.load %arg18[%c0_109, %c0_110] : memref<1x128xf32, #tpu.memory_space<vmem>>, vector<1x128xf32>
    %238 = vector.broadcast %237 : vector<1x128xf32> to vector<32x128xf32>
    %239 = arith.mulf %236, %238 : vector<32x128xf32>
    %c0_111 = arith.constant 0 : index
    %c0_112 = arith.constant 0 : index
    %240 = vector.load %arg19[%c0_111, %c0_112] : memref<1x128xf32, #tpu.memory_space<vmem>>, vector<1x128xf32>
    %241 = vector.broadcast %240 : vector<1x128xf32> to vector<32x128xf32>
    %242 = arith.addf %239, %241 : vector<32x128xf32>
    %cst_113 = arith.constant 0.000000e+00 : f32
    %243 = vector.broadcast %cst_113 : f32 to vector<32x128xf32>
    %244 = arith.maximumf %242, %243 : vector<32x128xf32>
    %c16_114 = arith.constant 16 : index
    %c0_115 = arith.constant 0 : index
    %245 = vector.load %arg24[%c16_114, %c0_115] : memref<57x128xf32, #tpu.memory_space<vmem>>, vector<32x128xf32>
    tpu.vector_store %arg24[%c16_114, %c0_115], %244 {strides = array<i32>} : memref<57x128xf32, #tpu.memory_space<vmem>>, vector<32x128xf32>,
    %cst_116 = arith.constant 0.000000e+00 : f32
    %246 = vector.broadcast %cst_116 : f32 to vector<32x128xf32>
    %c7_117 = arith.constant 7 : index
    %c0_118 = arith.constant 0 : index
    %247 = vector.load %arg24[%c7_117, %c0_118] : memref<57x128xf32, #tpu.memory_space<vmem>>, vector<32x128xf32>
    %248 = vector.broadcast %174 : vector<32x1xf32> to vector<32x128xf32>
    %249 = arith.mulf %247, %248 : vector<32x128xf32>
    %250 = arith.truncf %249 : vector<32x128xf32> to vector<32x128xbf16>
    %c0_119 = arith.constant 0 : index
    %c0_120 = arith.constant 0 : index
    %251 = vector.load %arg20[%c0_119, %c0_120] : memref<1152x128xbf16, #tpu.memory_space<vmem>>, vector<128x128xbf16>
    %cst_121 = arith.constant dense<0.000000e+00> : vector<32x128xf32>
    %252 = tpu.matmul %250, %251, %cst_121 {dimension_numbers = #tpu.dot_dimension_numbers<[1], [0], [0], [1], [0, 0, 1, 1], [], []>} : vector<32x128xbf16>, vector<128x128xbf16>, vector<32x128xf32> -> vector<32x128xf32>
    %253 = arith.addf %246, %252 : vector<32x128xf32>
    %c8_122 = arith.constant 8 : index
    %c0_123 = arith.constant 0 : index
    %254 = vector.load %arg24[%c8_122, %c0_123] : memref<57x128xf32, #tpu.memory_space<vmem>>, vector<32x128xf32>
    %255 = arith.truncf %254 : vector<32x128xf32> to vector<32x128xbf16>
    %c128_124 = arith.constant 128 : index
    %c0_125 = arith.constant 0 : index
    %256 = vector.load %arg20[%c128_124, %c0_125] : memref<1152x128xbf16, #tpu.memory_space<vmem>>, vector<128x128xbf16>
    %cst_126 = arith.constant dense<0.000000e+00> : vector<32x128xf32>
    %257 = tpu.matmul %255, %256, %cst_126 {dimension_numbers = #tpu.dot_dimension_numbers<[1], [0], [0], [1], [0, 0, 1, 1], [], []>} : vector<32x128xbf16>, vector<128x128xbf16>, vector<32x128xf32> -> vector<32x128xf32>
    %258 = arith.addf %253, %257 : vector<32x128xf32>
    %c9_127 = arith.constant 9 : index
    %c0_128 = arith.constant 0 : index
    %259 = vector.load %arg24[%c9_127, %c0_128] : memref<57x128xf32, #tpu.memory_space<vmem>>, vector<32x128xf32>
    %260 = vector.broadcast %178 : vector<32x1xf32> to vector<32x128xf32>
    %261 = arith.mulf %259, %260 : vector<32x128xf32>
    %262 = arith.truncf %261 : vector<32x128xf32> to vector<32x128xbf16>
    %c256_129 = arith.constant 256 : index
    %c0_130 = arith.constant 0 : index
    %263 = vector.load %arg20[%c256_129, %c0_130] : memref<1152x128xbf16, #tpu.memory_space<vmem>>, vector<128x128xbf16>
    %cst_131 = arith.constant dense<0.000000e+00> : vector<32x128xf32>
    %264 = tpu.matmul %262, %263, %cst_131 {dimension_numbers = #tpu.dot_dimension_numbers<[1], [0], [0], [1], [0, 0, 1, 1], [], []>} : vector<32x128xbf16>, vector<128x128xbf16>, vector<32x128xf32> -> vector<32x128xf32>
    %265 = arith.addf %258, %264 : vector<32x128xf32>
    %c15_132 = arith.constant 15 : index
    %c0_133 = arith.constant 0 : index
    %266 = vector.load %arg24[%c15_132, %c0_133] : memref<57x128xf32, #tpu.memory_space<vmem>>, vector<32x128xf32>
    %267 = vector.broadcast %174 : vector<32x1xf32> to vector<32x128xf32>
    %268 = arith.mulf %266, %267 : vector<32x128xf32>
    %269 = arith.truncf %268 : vector<32x128xf32> to vector<32x128xbf16>
    %c384_134 = arith.constant 384 : index
    %c0_135 = arith.constant 0 : index
    %270 = vector.load %arg20[%c384_134, %c0_135] : memref<1152x128xbf16, #tpu.memory_space<vmem>>, vector<128x128xbf16>
    %cst_136 = arith.constant dense<0.000000e+00> : vector<32x128xf32>
    %271 = tpu.matmul %269, %270, %cst_136 {dimension_numbers = #tpu.dot_dimension_numbers<[1], [0], [0], [1], [0, 0, 1, 1], [], []>} : vector<32x128xbf16>, vector<128x128xbf16>, vector<32x128xf32> -> vector<32x128xf32>
    %272 = arith.addf %265, %271 : vector<32x128xf32>
    %c16_137 = arith.constant 16 : index
    %c0_138 = arith.constant 0 : index
    %273 = vector.load %arg24[%c16_137, %c0_138] : memref<57x128xf32, #tpu.memory_space<vmem>>, vector<32x128xf32>
    %274 = arith.truncf %273 : vector<32x128xf32> to vector<32x128xbf16>
    %c512_139 = arith.constant 512 : index
    %c0_140 = arith.constant 0 : index
    %275 = vector.load %arg20[%c512_139, %c0_140] : memref<1152x128xbf16, #tpu.memory_space<vmem>>, vector<128x128xbf16>
    %cst_141 = arith.constant dense<0.000000e+00> : vector<32x128xf32>
    %276 = tpu.matmul %274, %275, %cst_141 {dimension_numbers = #tpu.dot_dimension_numbers<[1], [0], [0], [1], [0, 0, 1, 1], [], []>} : vector<32x128xbf16>, vector<128x128xbf16>, vector<32x128xf32> -> vector<32x128xf32>
    %277 = arith.addf %272, %276 : vector<32x128xf32>
    %c17_142 = arith.constant 17 : index
    %c0_143 = arith.constant 0 : index
    %278 = vector.load %arg24[%c17_142, %c0_143] : memref<57x128xf32, #tpu.memory_space<vmem>>, vector<32x128xf32>
    %279 = vector.broadcast %178 : vector<32x1xf32> to vector<32x128xf32>
    %280 = arith.mulf %278, %279 : vector<32x128xf32>
    %281 = arith.truncf %280 : vector<32x128xf32> to vector<32x128xbf16>
    %c640_144 = arith.constant 640 : index
    %c0_145 = arith.constant 0 : index
    %282 = vector.load %arg20[%c640_144, %c0_145] : memref<1152x128xbf16, #tpu.memory_space<vmem>>, vector<128x128xbf16>
    %cst_146 = arith.constant dense<0.000000e+00> : vector<32x128xf32>
    %283 = tpu.matmul %281, %282, %cst_146 {dimension_numbers = #tpu.dot_dimension_numbers<[1], [0], [0], [1], [0, 0, 1, 1], [], []>} : vector<32x128xbf16>, vector<128x128xbf16>, vector<32x128xf32> -> vector<32x128xf32>
    %284 = arith.addf %277, %283 : vector<32x128xf32>
    %c23_147 = arith.constant 23 : index
    %c0_148 = arith.constant 0 : index
    %285 = vector.load %arg24[%c23_147, %c0_148] : memref<57x128xf32, #tpu.memory_space<vmem>>, vector<32x128xf32>
    %286 = vector.broadcast %174 : vector<32x1xf32> to vector<32x128xf32>
    %287 = arith.mulf %285, %286 : vector<32x128xf32>
    %288 = arith.truncf %287 : vector<32x128xf32> to vector<32x128xbf16>
    %c768_149 = arith.constant 768 : index
    %c0_150 = arith.constant 0 : index
    %289 = vector.load %arg20[%c768_149, %c0_150] : memref<1152x128xbf16, #tpu.memory_space<vmem>>, vector<128x128xbf16>
    %cst_151 = arith.constant dense<0.000000e+00> : vector<32x128xf32>
    %290 = tpu.matmul %288, %289, %cst_151 {dimension_numbers = #tpu.dot_dimension_numbers<[1], [0], [0], [1], [0, 0, 1, 1], [], []>} : vector<32x128xbf16>, vector<128x128xbf16>, vector<32x128xf32> -> vector<32x128xf32>
    %291 = arith.addf %284, %290 : vector<32x128xf32>
    %c24_152 = arith.constant 24 : index
    %c0_153 = arith.constant 0 : index
    %292 = vector.load %arg24[%c24_152, %c0_153] : memref<57x128xf32, #tpu.memory_space<vmem>>, vector<32x128xf32>
    %293 = arith.truncf %292 : vector<32x128xf32> to vector<32x128xbf16>
    %c896_154 = arith.constant 896 : index
    %c0_155 = arith.constant 0 : index
    %294 = vector.load %arg20[%c896_154, %c0_155] : memref<1152x128xbf16, #tpu.memory_space<vmem>>, vector<128x128xbf16>
    %cst_156 = arith.constant dense<0.000000e+00> : vector<32x128xf32>
    %295 = tpu.matmul %293, %294, %cst_156 {dimension_numbers = #tpu.dot_dimension_numbers<[1], [0], [0], [1], [0, 0, 1, 1], [], []>} : vector<32x128xbf16>, vector<128x128xbf16>, vector<32x128xf32> -> vector<32x128xf32>
    %296 = arith.addf %291, %295 : vector<32x128xf32>
    %c25_157 = arith.constant 25 : index
    %c0_158 = arith.constant 0 : index
    %297 = vector.load %arg24[%c25_157, %c0_158] : memref<57x128xf32, #tpu.memory_space<vmem>>, vector<32x128xf32>
    %298 = vector.broadcast %178 : vector<32x1xf32> to vector<32x128xf32>
    %299 = arith.mulf %297, %298 : vector<32x128xf32>
    %300 = arith.truncf %299 : vector<32x128xf32> to vector<32x128xbf16>
    %c1024_159 = arith.constant 1024 : index
    %c0_160 = arith.constant 0 : index
    %301 = vector.load %arg20[%c1024_159, %c0_160] : memref<1152x128xbf16, #tpu.memory_space<vmem>>, vector<128x128xbf16>
    %cst_161 = arith.constant dense<0.000000e+00> : vector<32x128xf32>
    %302 = tpu.matmul %300, %301, %cst_161 {dimension_numbers = #tpu.dot_dimension_numbers<[1], [0], [0], [1], [0, 0, 1, 1], [], []>} : vector<32x128xbf16>, vector<128x128xbf16>, vector<32x128xf32> -> vector<32x128xf32>
    %303 = arith.addf %296, %302 : vector<32x128xf32>
    %c0_162 = arith.constant 0 : index
    %c0_163 = arith.constant 0 : index
    %304 = vector.load %arg21[%c0_162, %c0_163] : memref<1x128xf32, #tpu.memory_space<vmem>>, vector<1x128xf32>
    %305 = vector.broadcast %304 : vector<1x128xf32> to vector<32x128xf32>
    %306 = arith.mulf %303, %305 : vector<32x128xf32>
    %c0_164 = arith.constant 0 : index
    %c0_165 = arith.constant 0 : index
    %307 = vector.load %arg22[%c0_164, %c0_165] : memref<1x128xf32, #tpu.memory_space<vmem>>, vector<1x128xf32>
    %308 = vector.broadcast %307 : vector<1x128xf32> to vector<32x128xf32>
    %309 = arith.addf %306, %308 : vector<32x128xf32>
    %c0_166 = arith.constant 0 : index
    %c0_167 = arith.constant 0 : index
    %c0_168 = arith.constant 0 : index
    %310 = vector.load %arg1[%c0_166, %c0_167, %c0_168] : memref<1x32x8xbf16, #tpu.memory_space<vmem>>, vector<1x32x8xbf16>
    %311 = vector.shape_cast %310 : vector<1x32x8xbf16> to vector<32x8xbf16>
    %c0_169 = arith.constant 0 : index
    %c0_170 = arith.constant 0 : index
    %312 = vector.load %arg3[%c0_169, %c0_170] : memref<8x128xbf16, #tpu.memory_space<vmem>>, vector<8x128xbf16>
    %cst_171 = arith.constant dense<0.000000e+00> : vector<32x128xf32>
    %313 = tpu.matmul %311, %312, %cst_171 {dimension_numbers = #tpu.dot_dimension_numbers<[1], [0], [0], [1], [0, 0, 1, 1], [], []>} : vector<32x8xbf16>, vector<8x128xbf16>, vector<32x128xf32> -> vector<32x128xf32>
    %c0_172 = arith.constant 0 : index
    %c0_173 = arith.constant 0 : index
    %314 = vector.load %arg4[%c0_172, %c0_173] : memref<1x128xf32, #tpu.memory_space<vmem>>, vector<1x128xf32>
    %315 = vector.broadcast %314 : vector<1x128xf32> to vector<32x128xf32>
    %316 = arith.addf %313, %315 : vector<32x128xf32>
    %317 = arith.addf %309, %316 : vector<32x128xf32>
    %cst_174 = arith.constant 0.000000e+00 : f32
    %318 = vector.broadcast %cst_174 : f32 to vector<32x128xf32>
    %319 = arith.maximumf %317, %318 : vector<32x128xf32>
    %c0_175 = arith.constant 0 : index
    %c0_176 = arith.constant 0 : index
    %c0_177 = arith.constant 0 : index
    %320 = vector.load %arg23[%c0_175, %c0_176, %c0_177] : memref<1x32x128xf32, #tpu.memory_space<vmem>>, vector<1x32x128xf32>
    %321 = vector.shape_cast %320 : vector<1x32x128xf32> to vector<32x128xf32>
    %322 = vector.shape_cast %319 : vector<32x128xf32> to vector<1x32x128xf32>
    tpu.vector_store %arg23[%c0_175, %c0_176, %c0_177], %322 {strides = array<i32>} : memref<1x32x128xf32, #tpu.memory_space<vmem>>, vector<1x32x128xf32>,
    return
  }
  func.func @transform_0(%arg0: i32) -> (i32, i32, i32) {
    %c0_i32 = arith.constant 0 : i32
    %c0_i32_0 = arith.constant 0 : i32
    %c0_i32_1 = arith.constant 0 : i32
    return %arg0, %c0_i32, %c0_i32_0 : i32, i32, i32
  }
  func.func @transform_1(%arg0: i32) -> (i32, i32, i32) {
    %c0_i32 = arith.constant 0 : i32
    %c0_i32_0 = arith.constant 0 : i32
    %c0_i32_1 = arith.constant 0 : i32
    return %arg0, %c0_i32, %c0_i32_0 : i32, i32, i32
  }
  func.func @transform_2(%arg0: i32) -> (i32, i32) {
    %c0_i32 = arith.constant 0 : i32
    %c0_i32_0 = arith.constant 0 : i32
    %c0_i32_1 = arith.constant 0 : i32
    return %c0_i32, %c0_i32_0 : i32, i32
  }
  func.func @transform_3(%arg0: i32) -> (i32, i32) {
    %c0_i32 = arith.constant 0 : i32
    %c0_i32_0 = arith.constant 0 : i32
    %c0_i32_1 = arith.constant 0 : i32
    return %c0_i32, %c0_i32_0 : i32, i32
  }
  func.func @transform_4(%arg0: i32) -> (i32, i32) {
    %c0_i32 = arith.constant 0 : i32
    %c0_i32_0 = arith.constant 0 : i32
    %c0_i32_1 = arith.constant 0 : i32
    return %c0_i32, %c0_i32_0 : i32, i32
  }
  func.func @transform_5(%arg0: i32) -> (i32, i32) {
    %c0_i32 = arith.constant 0 : i32
    %c0_i32_0 = arith.constant 0 : i32
    %c0_i32_1 = arith.constant 0 : i32
    return %c0_i32, %c0_i32_0 : i32, i32
  }
  func.func @transform_6(%arg0: i32) -> (i32, i32) {
    %c0_i32 = arith.constant 0 : i32
    %c0_i32_0 = arith.constant 0 : i32
    %c0_i32_1 = arith.constant 0 : i32
    return %c0_i32, %c0_i32_0 : i32, i32
  }
  func.func @transform_7(%arg0: i32) -> (i32, i32) {
    %c0_i32 = arith.constant 0 : i32
    %c0_i32_0 = arith.constant 0 : i32
    %c0_i32_1 = arith.constant 0 : i32
    return %c0_i32, %c0_i32_0 : i32, i32
  }
  func.func @transform_8(%arg0: i32) -> (i32, i32) {
    %c0_i32 = arith.constant 0 : i32
    %c0_i32_0 = arith.constant 0 : i32
    %c0_i32_1 = arith.constant 0 : i32
    return %c0_i32, %c0_i32_0 : i32, i32
  }
  func.func @transform_9(%arg0: i32) -> (i32, i32) {
    %c0_i32 = arith.constant 0 : i32
    %c0_i32_0 = arith.constant 0 : i32
    %c0_i32_1 = arith.constant 0 : i32
    return %c0_i32, %c0_i32_0 : i32, i32
  }
  func.func @transform_10(%arg0: i32) -> (i32, i32) {
    %c0_i32 = arith.constant 0 : i32
    %c0_i32_0 = arith.constant 0 : i32
    %c0_i32_1 = arith.constant 0 : i32
    return %c0_i32, %c0_i32_0 : i32, i32
  }
  func.func @transform_11(%arg0: i32) -> (i32, i32) {
    %c0_i32 = arith.constant 0 : i32
    %c0_i32_0 = arith.constant 0 : i32
    %c0_i32_1 = arith.constant 0 : i32
    return %c0_i32, %c0_i32_0 : i32, i32
  }
  func.func @transform_12(%arg0: i32) -> (i32, i32) {
    %c0_i32 = arith.constant 0 : i32
    %c0_i32_0 = arith.constant 0 : i32
    %c0_i32_1 = arith.constant 0 : i32
    return %c0_i32, %c0_i32_0 : i32, i32
  }
  func.func @transform_13(%arg0: i32) -> (i32, i32) {
    %c0_i32 = arith.constant 0 : i32
    %c0_i32_0 = arith.constant 0 : i32
    %c0_i32_1 = arith.constant 0 : i32
    return %c0_i32, %c0_i32_0 : i32, i32
  }
  func.func @transform_14(%arg0: i32) -> (i32, i32) {
    %c0_i32 = arith.constant 0 : i32
    %c0_i32_0 = arith.constant 0 : i32
    %c0_i32_1 = arith.constant 0 : i32
    return %c0_i32, %c0_i32_0 : i32, i32
  }
  func.func @transform_15(%arg0: i32) -> (i32, i32) {
    %c0_i32 = arith.constant 0 : i32
    %c0_i32_0 = arith.constant 0 : i32
    %c0_i32_1 = arith.constant 0 : i32
    return %c0_i32, %c0_i32_0 : i32, i32
  }
  func.func @transform_16(%arg0: i32) -> (i32, i32) {
    %c0_i32 = arith.constant 0 : i32
    %c0_i32_0 = arith.constant 0 : i32
    %c0_i32_1 = arith.constant 0 : i32
    return %c0_i32, %c0_i32_0 : i32, i32
  }
  func.func @transform_17(%arg0: i32) -> (i32, i32) {
    %c0_i32 = arith.constant 0 : i32
    %c0_i32_0 = arith.constant 0 : i32
    %c0_i32_1 = arith.constant 0 : i32
    return %c0_i32, %c0_i32_0 : i32, i32
  }
  func.func @transform_18(%arg0: i32) -> (i32, i32) {
    %c0_i32 = arith.constant 0 : i32
    %c0_i32_0 = arith.constant 0 : i32
    %c0_i32_1 = arith.constant 0 : i32
    return %c0_i32, %c0_i32_0 : i32, i32
  }
  func.func @transform_19(%arg0: i32) -> (i32, i32) {
    %c0_i32 = arith.constant 0 : i32
    %c0_i32_0 = arith.constant 0 : i32
    %c0_i32_1 = arith.constant 0 : i32
    return %c0_i32, %c0_i32_0 : i32, i32
  }
  func.func @transform_20(%arg0: i32) -> (i32, i32) {
    %c0_i32 = arith.constant 0 : i32
    %c0_i32_0 = arith.constant 0 : i32
    %c0_i32_1 = arith.constant 0 : i32
    return %c0_i32, %c0_i32_0 : i32, i32
  }
  func.func @transform_21(%arg0: i32) -> (i32, i32) {
    %c0_i32 = arith.constant 0 : i32
    %c0_i32_0 = arith.constant 0 : i32
    %c0_i32_1 = arith.constant 0 : i32
    return %c0_i32, %c0_i32_0 : i32, i32
  }
  func.func @transform_22(%arg0: i32) -> (i32, i32, i32) {
    %c0_i32 = arith.constant 0 : i32
    %c0_i32_0 = arith.constant 0 : i32
    %c0_i32_1 = arith.constant 0 : i32
    return %arg0, %c0_i32, %c0_i32_0 : i32, i32, i32
  }
}

module attributes {stable_mosaic.version = 11 : i64} {
  func.func @kernel(%arg0: i32, %arg1: memref<1x32x8xbf16, #tpu.memory_space<vmem>>, %arg2: memref<1x32x16xbf16, #tpu.memory_space<vmem>>, %arg3: memref<8x128xbf16, #tpu.memory_space<vmem>>, %arg4: memref<1x128xf32, #tpu.memory_space<vmem>>, %arg5: memref<8x128xbf16, #tpu.memory_space<vmem>>, %arg6: memref<1x128xf32, #tpu.memory_space<vmem>>, %arg7: memref<16x128xbf16, #tpu.memory_space<vmem>>, %arg8: memref<1x128xf32, #tpu.memory_space<vmem>>, %arg9: memref<1x128xf32, #tpu.memory_space<vmem>>, %arg10: memref<1x128xf32, #tpu.memory_space<vmem>>, %arg11: memref<1x128xf32, #tpu.memory_space<vmem>>, %arg12: memref<1x128xf32, #tpu.memory_space<vmem>>, %arg13: memref<1x32xf32, #tpu.memory_space<vmem>>, %arg14: memref<1x32xf32, #tpu.memory_space<vmem>>, %arg15: memref<32x128xbf16, #tpu.memory_space<vmem>>, %arg16: memref<1x128xf32, #tpu.memory_space<vmem>>, %arg17: memref<1152x128xbf16, #tpu.memory_space<vmem>>, %arg18: memref<1x128xf32, #tpu.memory_space<vmem>>, %arg19: memref<1x128xf32, #tpu.memory_space<vmem>>, %arg20: memref<1152x128xbf16, #tpu.memory_space<vmem>>, %arg21: memref<1x128xf32, #tpu.memory_space<vmem>>, %arg22: memref<1x128xf32, #tpu.memory_space<vmem>>, %arg23: memref<1x32x128xf32, #tpu.memory_space<vmem>>, %arg24: memref<57x128xf32, #tpu.memory_space<vmem>>, %arg25: memref<32x128xbf16, #tpu.memory_space<vmem>>) attributes {dimension_semantics = [#tpu.dimension_semantics<parallel>], iteration_bounds = array<i64: 2>, scalar_prefetch = 0 : i64, scratch_operands = 2 : i64, tpu.core_type = #tpu.core_type<tc>, window_params = [{transform_indices = @transform_0, window_bounds = array<i64: 1, 32, 8>}, {transform_indices = @transform_1, window_bounds = array<i64: 1, 32, 16>}, {pipeline_mode = #tpu.pipeline_mode<synchronous>, transform_indices = @transform_2, window_bounds = array<i64: 8, 128>}, {pipeline_mode = #tpu.pipeline_mode<synchronous>, transform_indices = @transform_3, window_bounds = array<i64: 1, 128>}, {pipeline_mode = #tpu.pipeline_mode<synchronous>, transform_indices = @transform_4, window_bounds = array<i64: 8, 128>}, {pipeline_mode = #tpu.pipeline_mode<synchronous>, transform_indices = @transform_5, window_bounds = array<i64: 1, 128>}, {pipeline_mode = #tpu.pipeline_mode<synchronous>, transform_indices = @transform_6, window_bounds = array<i64: 16, 128>}, {pipeline_mode = #tpu.pipeline_mode<synchronous>, transform_indices = @transform_7, window_bounds = array<i64: 1, 128>}, {pipeline_mode = #tpu.pipeline_mode<synchronous>, transform_indices = @transform_8, window_bounds = array<i64: 1, 128>}, {pipeline_mode = #tpu.pipeline_mode<synchronous>, transform_indices = @transform_9, window_bounds = array<i64: 1, 128>}, {pipeline_mode = #tpu.pipeline_mode<synchronous>, transform_indices = @transform_10, window_bounds = array<i64: 1, 128>}, {pipeline_mode = #tpu.pipeline_mode<synchronous>, transform_indices = @transform_11, window_bounds = array<i64: 1, 128>}, {pipeline_mode = #tpu.pipeline_mode<synchronous>, transform_indices = @transform_12, window_bounds = array<i64: 1, 32>}, {pipeline_mode = #tpu.pipeline_mode<synchronous>, transform_indices = @transform_13, window_bounds = array<i64: 1, 32>}, {pipeline_mode = #tpu.pipeline_mode<synchronous>, transform_indices = @transform_14, window_bounds = array<i64: 32, 128>}, {pipeline_mode = #tpu.pipeline_mode<synchronous>, transform_indices = @transform_15, window_bounds = array<i64: 1, 128>}, {pipeline_mode = #tpu.pipeline_mode<synchronous>, transform_indices = @transform_16, window_bounds = array<i64: 1152, 128>}, {pipeline_mode = #tpu.pipeline_mode<synchronous>, transform_indices = @transform_17, window_bounds = array<i64: 1, 128>}, {pipeline_mode = #tpu.pipeline_mode<synchronous>, transform_indices = @transform_18, window_bounds = array<i64: 1, 128>}, {pipeline_mode = #tpu.pipeline_mode<synchronous>, transform_indices = @transform_19, window_bounds = array<i64: 1152, 128>}, {pipeline_mode = #tpu.pipeline_mode<synchronous>, transform_indices = @transform_20, window_bounds = array<i64: 1, 128>}, {pipeline_mode = #tpu.pipeline_mode<synchronous>, transform_indices = @transform_21, window_bounds = array<i64: 1, 128>}, {transform_indices = @transform_22, window_bounds = array<i64: 1, 32, 128>}]} {
    %cst = arith.constant 0.000000e+00 : f32
    %0 = vector.broadcast %cst : f32 to vector<16x128xf32>
    %c0 = arith.constant 0 : index
    %c0_0 = arith.constant 0 : index
    %1 = vector.load %arg24[%c0, %c0_0] : memref<57x128xf32, #tpu.memory_space<vmem>>, vector<16x128xf32>
    tpu.vector_store %arg24[%c0, %c0_0], %0 {strides = array<i32>} : memref<57x128xf32, #tpu.memory_space<vmem>>, vector<16x128xf32>,
    %cst_1 = arith.constant 0.000000e+00 : f32
    %2 = vector.broadcast %cst_1 : f32 to vector<9x128xf32>
    %c48 = arith.constant 48 : index
    %c0_2 = arith.constant 0 : index
    %3 = vector.load %arg24[%c48, %c0_2] : memref<57x128xf32, #tpu.memory_space<vmem>>, vector<9x128xf32>
    tpu.vector_store %arg24[%c48, %c0_2], %2 {strides = array<i32>} : memref<57x128xf32, #tpu.memory_space<vmem>>, vector<9x128xf32>,
    %c0_3 = arith.constant 0 : index
    %c0_4 = arith.constant 0 : index
    %c0_5 = arith.constant 0 : index
    %4 = vector.load %arg1[%c0_3, %c0_4, %c0_5] : memref<1x32x8xbf16, #tpu.memory_space<vmem>>, vector<1x32x8xbf16>
    %5 = vector.shape_cast %4 : vector<1x32x8xbf16> to vector<32x8xbf16>
    %c0_6 = arith.constant 0 : index
    %c0_7 = arith.constant 0 : index
    %6 = vector.load %arg5[%c0_6, %c0_7] : memref<8x128xbf16, #tpu.memory_space<vmem>>, vector<8x128xbf16>
    %cst_8 = arith.constant dense<0.000000e+00> : vector<32x128xf32>
    %7 = tpu.matmul %5, %6, %cst_8 {dimension_numbers = #tpu.dot_dimension_numbers<[1], [0], [0], [1], [0, 0, 1, 1], [], []>} : vector<32x8xbf16>, vector<8x128xbf16>, vector<32x128xf32> -> vector<32x128xf32>
    %c0_9 = arith.constant 0 : index
    %c0_10 = arith.constant 0 : index
    %8 = vector.load %arg6[%c0_9, %c0_10] : memref<1x128xf32, #tpu.memory_space<vmem>>, vector<1x128xf32>
    %9 = vector.broadcast %8 : vector<1x128xf32> to vector<32x128xf32>
    %10 = arith.addf %7, %9 : vector<32x128xf32>
    %c0_11 = arith.constant 0 : index
    %c0_12 = arith.constant 0 : index
    %c0_13 = arith.constant 0 : index
    %11 = vector.load %arg2[%c0_11, %c0_12, %c0_13] : memref<1x32x16xbf16, #tpu.memory_space<vmem>>, vector<1x32x16xbf16>
    %12 = vector.shape_cast %11 : vector<1x32x16xbf16> to vector<32x16xbf16>
    %c0_14 = arith.constant 0 : index
    %c0_15 = arith.constant 0 : index
    %13 = vector.load %arg7[%c0_14, %c0_15] : memref<16x128xbf16, #tpu.memory_space<vmem>>, vector<16x128xbf16>
    %cst_16 = arith.constant dense<0.000000e+00> : vector<32x128xf32>
    %14 = tpu.matmul %12, %13, %cst_16 {dimension_numbers = #tpu.dot_dimension_numbers<[1], [0], [0], [1], [0, 0, 1, 1], [], []>} : vector<32x16xbf16>, vector<16x128xbf16>, vector<32x128xf32> -> vector<32x128xf32>
    %c0_17 = arith.constant 0 : index
    %c0_18 = arith.constant 0 : index
    %15 = vector.load %arg8[%c0_17, %c0_18] : memref<1x128xf32, #tpu.memory_space<vmem>>, vector<1x128xf32>
    %16 = vector.broadcast %15 : vector<1x128xf32> to vector<32x128xf32>
    %17 = arith.addf %14, %16 : vector<32x128xf32>
    %c0_19 = arith.constant 0 : index
    %c0_20 = arith.constant 0 : index
    %18 = vector.load %arg9[%c0_19, %c0_20] : memref<1x128xf32, #tpu.memory_space<vmem>>, vector<1x128xf32>
    %c0_21 = arith.constant 0 : index
    %c0_22 = arith.constant 0 : index
    %19 = vector.load %arg10[%c0_21, %c0_22] : memref<1x128xf32, #tpu.memory_space<vmem>>, vector<1x128xf32>
    %cst_23 = arith.constant dense<0.000000e+00> : vector<32xf32>
    %20 = vector.multi_reduction <add>, %10, %cst_23 [1] : vector<32x128xf32> to vector<32xf32>
    %21 = vector.shape_cast %20 : vector<32xf32> to vector<32x1xf32>
    %22 = arith.mulf %10, %10 : vector<32x128xf32>
    %cst_24 = arith.constant dense<0.000000e+00> : vector<32xf32>
    %23 = vector.multi_reduction <add>, %22, %cst_24 [1] : vector<32x128xf32> to vector<32xf32>
    %24 = vector.shape_cast %23 : vector<32xf32> to vector<32x1xf32>
    %cst_25 = arith.constant 1.250000e-01 : f32
    %25 = vector.broadcast %cst_25 : f32 to vector<32x1xf32>
    %26 = arith.mulf %21, %25 : vector<32x1xf32>
    %cst_26 = arith.constant 1.250000e-01 : f32
    %27 = vector.broadcast %cst_26 : f32 to vector<32x1xf32>
    %28 = arith.mulf %24, %27 : vector<32x1xf32>
    %29 = arith.mulf %26, %26 : vector<32x1xf32>
    %30 = arith.subf %28, %29 : vector<32x1xf32>
    %cst_27 = arith.constant 0.000000e+00 : f32
    %31 = vector.broadcast %cst_27 : f32 to vector<32x1xf32>
    %32 = arith.maximumf %30, %31 : vector<32x1xf32>
    %33 = vector.broadcast %26 : vector<32x1xf32> to vector<32x128xf32>
    %34 = arith.subf %10, %33 : vector<32x128xf32>
    %cst_28 = arith.constant 9.99999974E-6 : f32
    %35 = vector.broadcast %cst_28 : f32 to vector<32x1xf32>
    %36 = arith.addf %32, %35 : vector<32x1xf32>
    %37 = math.rsqrt %36 : vector<32x1xf32>
    %38 = vector.broadcast %37 : vector<32x1xf32> to vector<32x128xf32>
    %39 = arith.mulf %34, %38 : vector<32x128xf32>
    %40 = vector.broadcast %18 : vector<1x128xf32> to vector<32x128xf32>
    %41 = arith.mulf %39, %40 : vector<32x128xf32>
    %42 = vector.broadcast %19 : vector<1x128xf32> to vector<32x128xf32>
    %43 = arith.addf %41, %42 : vector<32x128xf32>
    %44 = arith.truncf %43 : vector<32x128xf32> to vector<32x128xbf16>
    %c0_29 = arith.constant 0 : index
    %c0_30 = arith.constant 0 : index
    %45 = vector.load %arg11[%c0_29, %c0_30] : memref<1x128xf32, #tpu.memory_space<vmem>>, vector<1x128xf32>
    %c0_31 = arith.constant 0 : index
    %c0_32 = arith.constant 0 : index
    %46 = vector.load %arg12[%c0_31, %c0_32] : memref<1x128xf32, #tpu.memory_space<vmem>>, vector<1x128xf32>
    %cst_33 = arith.constant dense<0.000000e+00> : vector<32xf32>
    %47 = vector.multi_reduction <add>, %17, %cst_33 [1] : vector<32x128xf32> to vector<32xf32>
    %48 = vector.shape_cast %47 : vector<32xf32> to vector<32x1xf32>
    %49 = arith.mulf %17, %17 : vector<32x128xf32>
    %cst_34 = arith.constant dense<0.000000e+00> : vector<32xf32>
    %50 = vector.multi_reduction <add>, %49, %cst_34 [1] : vector<32x128xf32> to vector<32xf32>
    %51 = vector.shape_cast %50 : vector<32xf32> to vector<32x1xf32>
    %cst_35 = arith.constant 1.250000e-01 : f32
    %52 = vector.broadcast %cst_35 : f32 to vector<32x1xf32>
    %53 = arith.mulf %48, %52 : vector<32x1xf32>
    %cst_36 = arith.constant 1.250000e-01 : f32
    %54 = vector.broadcast %cst_36 : f32 to vector<32x1xf32>
    %55 = arith.mulf %51, %54 : vector<32x1xf32>
    %56 = arith.mulf %53, %53 : vector<32x1xf32>
    %57 = arith.subf %55, %56 : vector<32x1xf32>
    %cst_37 = arith.constant 0.000000e+00 : f32
    %58 = vector.broadcast %cst_37 : f32 to vector<32x1xf32>
    %59 = arith.maximumf %57, %58 : vector<32x1xf32>
    %60 = vector.broadcast %53 : vector<32x1xf32> to vector<32x128xf32>
    %61 = arith.subf %17, %60 : vector<32x128xf32>
    %cst_38 = arith.constant 9.99999974E-6 : f32
    %62 = vector.broadcast %cst_38 : f32 to vector<32x1xf32>
    %63 = arith.addf %59, %62 : vector<32x1xf32>
    %64 = math.rsqrt %63 : vector<32x1xf32>
    %65 = vector.broadcast %64 : vector<32x1xf32> to vector<32x128xf32>
    %66 = arith.mulf %61, %65 : vector<32x128xf32>
    %67 = vector.broadcast %45 : vector<1x128xf32> to vector<32x128xf32>
    %68 = arith.mulf %66, %67 : vector<32x128xf32>
    %69 = vector.broadcast %46 : vector<1x128xf32> to vector<32x128xf32>
    %70 = arith.addf %68, %69 : vector<32x128xf32>
    %71 = arith.truncf %70 : vector<32x128xf32> to vector<32x128xbf16>
    %72 = tpu.transpose %71, [1, 0] : vector<32x128xbf16> -> vector<128x32xbf16>
    %c0_39 = arith.constant 0 : index
    %c0_40 = arith.constant 0 : index
    %73 = vector.load %arg25[%c0_39, %c0_40] : memref<32x128xbf16, #tpu.memory_space<vmem>>, vector<32x128xbf16>
    tpu.vector_store %arg25[%c0_39, %c0_40], %44 {strides = array<i32>} : memref<32x128xbf16, #tpu.memory_space<vmem>>, vector<32x128xbf16>,
    %c0_41 = arith.constant 0 : index
    %c0_42 = arith.constant 0 : index
    %74 = vector.load %arg13[%c0_41, %c0_42] : memref<1x32xf32, #tpu.memory_space<vmem>>, vector<1x32xf32>
    %c0_43 = arith.constant 0 : index
    %c0_44 = arith.constant 0 : index
    %75 = vector.load %arg14[%c0_43, %c0_44] : memref<1x32xf32, #tpu.memory_space<vmem>>, vector<1x32xf32>
    %c0_45 = arith.constant 0 : index
    %c0_46 = arith.constant 0 : index
    %76 = vector.load %arg15[%c0_45, %c0_46] : memref<32x128xbf16, #tpu.memory_space<vmem>>, vector<32x128xbf16>
    %c0_47 = arith.constant 0 : index
    %c0_48 = arith.constant 0 : index
    %77 = vector.load %arg16[%c0_47, %c0_48] : memref<1x128xf32, #tpu.memory_space<vmem>>, vector<1x128xf32>
    %c0_i32 = arith.constant 0 : i32
    %c16_i32 = arith.constant 16 : i32
    %78 = arith.muli %c0_i32, %c16_i32 : i32
    %79 = tpu.assume_multiple %78, 16 : i32
    %80 = arith.index_cast %79 : i32 to index
    %c0_49 = arith.constant 0 : index
    %81 = vector.load %arg25[%80, %c0_49] : memref<32x128xbf16, #tpu.memory_space<vmem>>, vector<16x128xbf16>
    %cst_50 = arith.constant dense<0.000000e+00> : vector<16x32xf32>
    %82 = tpu.matmul %81, %72, %cst_50 {dimension_numbers = #tpu.dot_dimension_numbers<[1], [0], [0], [1], [0, 0, 1, 1], [], []>} : vector<16x128xbf16>, vector<128x32xbf16>, vector<16x32xf32> -> vector<16x32xf32>
    %cst_51 = arith.constant dense<0.000000e+00> : vector<16xf32>
    %83 = vector.multi_reduction <add>, %82, %cst_51 [1] : vector<16x32xf32> to vector<16xf32>
    %84 = vector.shape_cast %83 : vector<16xf32> to vector<16x1xf32>
    %85 = arith.mulf %82, %82 : vector<16x32xf32>
    %cst_52 = arith.constant dense<0.000000e+00> : vector<16xf32>
    %86 = vector.multi_reduction <add>, %85, %cst_52 [1] : vector<16x32xf32> to vector<16xf32>
    %87 = vector.shape_cast %86 : vector<16xf32> to vector<16x1xf32>
    %cst_53 = arith.constant 3.125000e-02 : f32
    %88 = vector.broadcast %cst_53 : f32 to vector<16x1xf32>
    %89 = arith.mulf %84, %88 : vector<16x1xf32>
    %cst_54 = arith.constant 3.125000e-02 : f32
    %90 = vector.broadcast %cst_54 : f32 to vector<16x1xf32>
    %91 = arith.mulf %87, %90 : vector<16x1xf32>
    %92 = arith.mulf %89, %89 : vector<16x1xf32>
    %93 = arith.subf %91, %92 : vector<16x1xf32>
    %cst_55 = arith.constant 0.000000e+00 : f32
    %94 = vector.broadcast %cst_55 : f32 to vector<16x1xf32>
    %95 = arith.maximumf %93, %94 : vector<16x1xf32>
    %96 = vector.broadcast %89 : vector<16x1xf32> to vector<16x32xf32>
    %97 = arith.subf %82, %96 : vector<16x32xf32>
    %cst_56 = arith.constant 9.99999974E-6 : f32
    %98 = vector.broadcast %cst_56 : f32 to vector<16x1xf32>
    %99 = arith.addf %95, %98 : vector<16x1xf32>
    %100 = math.rsqrt %99 : vector<16x1xf32>
    %101 = vector.broadcast %100 : vector<16x1xf32> to vector<16x32xf32>
    %102 = arith.mulf %97, %101 : vector<16x32xf32>
    %103 = vector.broadcast %74 : vector<1x32xf32> to vector<16x32xf32>
    %104 = arith.mulf %102, %103 : vector<16x32xf32>
    %105 = vector.broadcast %75 : vector<1x32xf32> to vector<16x32xf32>
    %106 = arith.addf %104, %105 : vector<16x32xf32>
    %107 = arith.truncf %106 : vector<16x32xf32> to vector<16x32xbf16>
    %cst_57 = arith.constant dense<0.000000e+00> : vector<16x128xf32>
    %108 = tpu.matmul %107, %76, %cst_57 {dimension_numbers = #tpu.dot_dimension_numbers<[1], [0], [0], [1], [0, 0, 1, 1], [], []>} : vector<16x32xbf16>, vector<32x128xbf16>, vector<16x128xf32> -> vector<16x128xf32>
    %109 = vector.broadcast %77 : vector<1x128xf32> to vector<16x128xf32>
    %110 = arith.addf %108, %109 : vector<16x128xf32>
    %cst_58 = arith.constant 0.000000e+00 : f32
    %111 = vector.broadcast %cst_58 : f32 to vector<16x128xf32>
    %112 = arith.maximumf %110, %111 : vector<16x128xf32>
    %c16_i32_59 = arith.constant 16 : i32
    %113 = arith.addi %c16_i32_59, %79 : i32
    %114 = arith.index_cast %113 : i32 to index
    %c0_60 = arith.constant 0 : index
    %115 = vector.load %arg24[%114, %c0_60] : memref<57x128xf32, #tpu.memory_space<vmem>>, vector<16x128xf32>
    tpu.vector_store %arg24[%114, %c0_60], %112 {strides = array<i32>} : memref<57x128xf32, #tpu.memory_space<vmem>>, vector<16x128xf32>,
    %c1_i32 = arith.constant 1 : i32
    %c16_i32_61 = arith.constant 16 : i32
    %116 = arith.muli %c1_i32, %c16_i32_61 : i32
    %117 = tpu.assume_multiple %116, 16 : i32
    %118 = arith.index_cast %117 : i32 to index
    %c0_62 = arith.constant 0 : index
    %119 = vector.load %arg25[%118, %c0_62] : memref<32x128xbf16, #tpu.memory_space<vmem>>, vector<16x128xbf16>
    %cst_63 = arith.constant dense<0.000000e+00> : vector<16x32xf32>
    %120 = tpu.matmul %119, %72, %cst_63 {dimension_numbers = #tpu.dot_dimension_numbers<[1], [0], [0], [1], [0, 0, 1, 1], [], []>} : vector<16x128xbf16>, vector<128x32xbf16>, vector<16x32xf32> -> vector<16x32xf32>
    %cst_64 = arith.constant dense<0.000000e+00> : vector<16xf32>
    %121 = vector.multi_reduction <add>, %120, %cst_64 [1] : vector<16x32xf32> to vector<16xf32>
    %122 = vector.shape_cast %121 : vector<16xf32> to vector<16x1xf32>
    %123 = arith.mulf %120, %120 : vector<16x32xf32>
    %cst_65 = arith.constant dense<0.000000e+00> : vector<16xf32>
    %124 = vector.multi_reduction <add>, %123, %cst_65 [1] : vector<16x32xf32> to vector<16xf32>
    %125 = vector.shape_cast %124 : vector<16xf32> to vector<16x1xf32>
    %cst_66 = arith.constant 3.125000e-02 : f32
    %126 = vector.broadcast %cst_66 : f32 to vector<16x1xf32>
    %127 = arith.mulf %122, %126 : vector<16x1xf32>
    %cst_67 = arith.constant 3.125000e-02 : f32
    %128 = vector.broadcast %cst_67 : f32 to vector<16x1xf32>
    %129 = arith.mulf %125, %128 : vector<16x1xf32>
    %130 = arith.mulf %127, %127 : vector<16x1xf32>
    %131 = arith.subf %129, %130 : vector<16x1xf32>
    %cst_68 = arith.constant 0.000000e+00 : f32
    %132 = vector.broadcast %cst_68 : f32 to vector<16x1xf32>
    %133 = arith.maximumf %131, %132 : vector<16x1xf32>
    %134 = vector.broadcast %127 : vector<16x1xf32> to vector<16x32xf32>
    %135 = arith.subf %120, %134 : vector<16x32xf32>
    %cst_69 = arith.constant 9.99999974E-6 : f32
    %136 = vector.broadcast %cst_69 : f32 to vector<16x1xf32>
    %137 = arith.addf %133, %136 : vector<16x1xf32>
    %138 = math.rsqrt %137 : vector<16x1xf32>
    %139 = vector.broadcast %138 : vector<16x1xf32> to vector<16x32xf32>
    %140 = arith.mulf %135, %139 : vector<16x32xf32>
    %141 = vector.broadcast %74 : vector<1x32xf32> to vector<16x32xf32>
    %142 = arith.mulf %140, %141 : vector<16x32xf32>
    %143 = vector.broadcast %75 : vector<1x32xf32> to vector<16x32xf32>
    %144 = arith.addf %142, %143 : vector<16x32xf32>
    %145 = arith.truncf %144 : vector<16x32xf32> to vector<16x32xbf16>
    %cst_70 = arith.constant dense<0.000000e+00> : vector<16x128xf32>
    %146 = tpu.matmul %145, %76, %cst_70 {dimension_numbers = #tpu.dot_dimension_numbers<[1], [0], [0], [1], [0, 0, 1, 1], [], []>} : vector<16x32xbf16>, vector<32x128xbf16>, vector<16x128xf32> -> vector<16x128xf32>
    %147 = vector.broadcast %77 : vector<1x128xf32> to vector<16x128xf32>
    %148 = arith.addf %146, %147 : vector<16x128xf32>
    %cst_71 = arith.constant 0.000000e+00 : f32
    %149 = vector.broadcast %cst_71 : f32 to vector<16x128xf32>
    %150 = arith.maximumf %148, %149 : vector<16x128xf32>
    %c16_i32_72 = arith.constant 16 : i32
    %151 = arith.addi %c16_i32_72, %117 : i32
    %152 = arith.index_cast %151 : i32 to index
    %c0_73 = arith.constant 0 : index
    %153 = vector.load %arg24[%152, %c0_73] : memref<57x128xf32, #tpu.memory_space<vmem>>, vector<16x128xf32>
    tpu.vector_store %arg24[%152, %c0_73], %150 {strides = array<i32>} : memref<57x128xf32, #tpu.memory_space<vmem>>, vector<16x128xf32>,
    %c2_i32 = arith.constant 2 : i32
    %154 = tpu.iota {dimensions = array<i32: 0>} : vector<32x1xi32>
    %c8_i32 = arith.constant 8 : i32
    %c0_i32_74 = arith.constant 0 : i32
    %155 = arith.cmpi eq, %c8_i32, %c0_i32_74 : i32
    %c1_i32_75 = arith.constant 1 : i32
    %156 = arith.select %155, %c1_i32_75, %c8_i32 : i32
    %157 = vector.broadcast %156 : i32 to vector<32x1xi32>
    %158 = arith.remsi %154, %157 : vector<32x1xi32>
    %c0_i32_76 = arith.constant 0 : i32
    %159 = vector.broadcast %c0_i32_76 : i32 to vector<32x1xi32>
    %160 = arith.cmpi ne, %158, %159 : vector<32x1xi32>
    %c0_i32_77 = arith.constant 0 : i32
    %161 = vector.broadcast %c0_i32_77 : i32 to vector<32x1xi32>
    %162 = arith.cmpi slt, %158, %161 : vector<32x1xi32>
    %c0_i32_78 = arith.constant 0 : i32
    %163 = arith.cmpi slt, %156, %c0_i32_78 : i32
    %164 = vector.broadcast %163 : i1 to vector<32x1xi1>
    %165 = vector.broadcast %164 : vector<32x1xi1> to vector<32x1xi1>
    %166 = arith.xori %162, %165 : vector<32x1xi1>
    %167 = arith.andi %166, %160 : vector<32x1xi1>
    %168 = vector.broadcast %156 : i32 to vector<32x1xi32>
    %169 = arith.addi %158, %168 : vector<32x1xi32>
    %170 = arith.select %167, %169, %158 : vector<32x1xi1>, vector<32x1xi32>
    %c0_i32_79 = arith.constant 0 : i32
    %171 = vector.broadcast %c0_i32_79 : i32 to vector<32x1xi32>
    %172 = arith.cmpi sgt, %170, %171 : vector<32x1xi32>
    %173 = arith.extui %172 : vector<32x1xi1> to vector<32x1xi32>
    %174 = arith.sitofp %173 : vector<32x1xi32> to vector<32x1xf32>
    %c7_i32 = arith.constant 7 : i32
    %175 = vector.broadcast %c7_i32 : i32 to vector<32x1xi32>
    %176 = arith.cmpi slt, %170, %175 : vector<32x1xi32>
    %177 = arith.extui %176 : vector<32x1xi1> to vector<32x1xi32>
    %178 = arith.sitofp %177 : vector<32x1xi32> to vector<32x1xf32>
    %cst_80 = arith.constant 0.000000e+00 : f32
    %179 = vector.broadcast %cst_80 : f32 to vector<32x128xf32>
    %c7 = arith.constant 7 : index
    %c0_81 = arith.constant 0 : index
    %180 = vector.load %arg24[%c7, %c0_81] : memref<57x128xf32, #tpu.memory_space<vmem>>, vector<32x128xf32>
    %181 = vector.broadcast %174 : vector<32x1xf32> to vector<32x128xf32>
    %182 = arith.mulf %180, %181 : vector<32x128xf32>
    %183 = arith.truncf %182 : vector<32x128xf32> to vector<32x128xbf16>
    %c0_82 = arith.constant 0 : index
    %c0_83 = arith.constant 0 : index
    %184 = vector.load %arg17[%c0_82, %c0_83] : memref<1152x128xbf16, #tpu.memory_space<vmem>>, vector<128x128xbf16>
    %cst_84 = arith.constant dense<0.000000e+00> : vector<32x128xf32>
    %185 = tpu.matmul %183, %184, %cst_84 {dimension_numbers = #tpu.dot_dimension_numbers<[1], [0], [0], [1], [0, 0, 1, 1], [], []>} : vector<32x128xbf16>, vector<128x128xbf16>, vector<32x128xf32> -> vector<32x128xf32>
    %186 = arith.addf %179, %185 : vector<32x128xf32>
    %c8 = arith.constant 8 : index
    %c0_85 = arith.constant 0 : index
    %187 = vector.load %arg24[%c8, %c0_85] : memref<57x128xf32, #tpu.memory_space<vmem>>, vector<32x128xf32>
    %188 = arith.truncf %187 : vector<32x128xf32> to vector<32x128xbf16>
    %c128 = arith.constant 128 : index
    %c0_86 = arith.constant 0 : index
    %189 = vector.load %arg17[%c128, %c0_86] : memref<1152x128xbf16, #tpu.memory_space<vmem>>, vector<128x128xbf16>
    %cst_87 = arith.constant dense<0.000000e+00> : vector<32x128xf32>
    %190 = tpu.matmul %188, %189, %cst_87 {dimension_numbers = #tpu.dot_dimension_numbers<[1], [0], [0], [1], [0, 0, 1, 1], [], []>} : vector<32x128xbf16>, vector<128x128xbf16>, vector<32x128xf32> -> vector<32x128xf32>
    %191 = arith.addf %186, %190 : vector<32x128xf32>
    %c9 = arith.constant 9 : index
    %c0_88 = arith.constant 0 : index
    %192 = vector.load %arg24[%c9, %c0_88] : memref<57x128xf32, #tpu.memory_space<vmem>>, vector<32x128xf32>
    %193 = vector.broadcast %178 : vector<32x1xf32> to vector<32x128xf32>
    %194 = arith.mulf %192, %193 : vector<32x128xf32>
    %195 = arith.truncf %194 : vector<32x128xf32> to vector<32x128xbf16>
    %c256 = arith.constant 256 : index
    %c0_89 = arith.constant 0 : index
    %196 = vector.load %arg17[%c256, %c0_89] : memref<1152x128xbf16, #tpu.memory_space<vmem>>, vector<128x128xbf16>
    %cst_90 = arith.constant dense<0.000000e+00> : vector<32x128xf32>
    %197 = tpu.matmul %195, %196, %cst_90 {dimension_numbers = #tpu.dot_dimension_numbers<[1], [0], [0], [1], [0, 0, 1, 1], [], []>} : vector<32x128xbf16>, vector<128x128xbf16>, vector<32x128xf32> -> vector<32x128xf32>
    %198 = arith.addf %191, %197 : vector<32x128xf32>
    %c15 = arith.constant 15 : index
    %c0_91 = arith.constant 0 : index
    %199 = vector.load %arg24[%c15, %c0_91] : memref<57x128xf32, #tpu.memory_space<vmem>>, vector<32x128xf32>
    %200 = vector.broadcast %174 : vector<32x1xf32> to vector<32x128xf32>
    %201 = arith.mulf %199, %200 : vector<32x128xf32>
    %202 = arith.truncf %201 : vector<32x128xf32> to vector<32x128xbf16>
    %c384 = arith.constant 384 : index
    %c0_92 = arith.constant 0 : index
    %203 = vector.load %arg17[%c384, %c0_92] : memref<1152x128xbf16, #tpu.memory_space<vmem>>, vector<128x128xbf16>
    %cst_93 = arith.constant dense<0.000000e+00> : vector<32x128xf32>
    %204 = tpu.matmul %202, %203, %cst_93 {dimension_numbers = #tpu.dot_dimension_numbers<[1], [0], [0], [1], [0, 0, 1, 1], [], []>} : vector<32x128xbf16>, vector<128x128xbf16>, vector<32x128xf32> -> vector<32x128xf32>
    %205 = arith.addf %198, %204 : vector<32x128xf32>
    %c16 = arith.constant 16 : index
    %c0_94 = arith.constant 0 : index
    %206 = vector.load %arg24[%c16, %c0_94] : memref<57x128xf32, #tpu.memory_space<vmem>>, vector<32x128xf32>
    %207 = arith.truncf %206 : vector<32x128xf32> to vector<32x128xbf16>
    %c512 = arith.constant 512 : index
    %c0_95 = arith.constant 0 : index
    %208 = vector.load %arg17[%c512, %c0_95] : memref<1152x128xbf16, #tpu.memory_space<vmem>>, vector<128x128xbf16>
    %cst_96 = arith.constant dense<0.000000e+00> : vector<32x128xf32>
    %209 = tpu.matmul %207, %208, %cst_96 {dimension_numbers = #tpu.dot_dimension_numbers<[1], [0], [0], [1], [0, 0, 1, 1], [], []>} : vector<32x128xbf16>, vector<128x128xbf16>, vector<32x128xf32> -> vector<32x128xf32>
    %210 = arith.addf %205, %209 : vector<32x128xf32>
    %c17 = arith.constant 17 : index
    %c0_97 = arith.constant 0 : index
    %211 = vector.load %arg24[%c17, %c0_97] : memref<57x128xf32, #tpu.memory_space<vmem>>, vector<32x128xf32>
    %212 = vector.broadcast %178 : vector<32x1xf32> to vector<32x128xf32>
    %213 = arith.mulf %211, %212 : vector<32x128xf32>
    %214 = arith.truncf %213 : vector<32x128xf32> to vector<32x128xbf16>
    %c640 = arith.constant 640 : index
    %c0_98 = arith.constant 0 : index
    %215 = vector.load %arg17[%c640, %c0_98] : memref<1152x128xbf16, #tpu.memory_space<vmem>>, vector<128x128xbf16>
    %cst_99 = arith.constant dense<0.000000e+00> : vector<32x128xf32>
    %216 = tpu.matmul %214, %215, %cst_99 {dimension_numbers = #tpu.dot_dimension_numbers<[1], [0], [0], [1], [0, 0, 1, 1], [], []>} : vector<32x128xbf16>, vector<128x128xbf16>, vector<32x128xf32> -> vector<32x128xf32>
    %217 = arith.addf %210, %216 : vector<32x128xf32>
    %c23 = arith.constant 23 : index
    %c0_100 = arith.constant 0 : index
    %218 = vector.load %arg24[%c23, %c0_100] : memref<57x128xf32, #tpu.memory_space<vmem>>, vector<32x128xf32>
    %219 = vector.broadcast %174 : vector<32x1xf32> to vector<32x128xf32>
    %220 = arith.mulf %218, %219 : vector<32x128xf32>
    %221 = arith.truncf %220 : vector<32x128xf32> to vector<32x128xbf16>
    %c768 = arith.constant 768 : index
    %c0_101 = arith.constant 0 : index
    %222 = vector.load %arg17[%c768, %c0_101] : memref<1152x128xbf16, #tpu.memory_space<vmem>>, vector<128x128xbf16>
    %cst_102 = arith.constant dense<0.000000e+00> : vector<32x128xf32>
    %223 = tpu.matmul %221, %222, %cst_102 {dimension_numbers = #tpu.dot_dimension_numbers<[1], [0], [0], [1], [0, 0, 1, 1], [], []>} : vector<32x128xbf16>, vector<128x128xbf16>, vector<32x128xf32> -> vector<32x128xf32>
    %224 = arith.addf %217, %223 : vector<32x128xf32>
    %c24 = arith.constant 24 : index
    %c0_103 = arith.constant 0 : index
    %225 = vector.load %arg24[%c24, %c0_103] : memref<57x128xf32, #tpu.memory_space<vmem>>, vector<32x128xf32>
    %226 = arith.truncf %225 : vector<32x128xf32> to vector<32x128xbf16>
    %c896 = arith.constant 896 : index
    %c0_104 = arith.constant 0 : index
    %227 = vector.load %arg17[%c896, %c0_104] : memref<1152x128xbf16, #tpu.memory_space<vmem>>, vector<128x128xbf16>
    %cst_105 = arith.constant dense<0.000000e+00> : vector<32x128xf32>
    %228 = tpu.matmul %226, %227, %cst_105 {dimension_numbers = #tpu.dot_dimension_numbers<[1], [0], [0], [1], [0, 0, 1, 1], [], []>} : vector<32x128xbf16>, vector<128x128xbf16>, vector<32x128xf32> -> vector<32x128xf32>
    %229 = arith.addf %224, %228 : vector<32x128xf32>
    %c25 = arith.constant 25 : index
    %c0_106 = arith.constant 0 : index
    %230 = vector.load %arg24[%c25, %c0_106] : memref<57x128xf32, #tpu.memory_space<vmem>>, vector<32x128xf32>
    %231 = vector.broadcast %178 : vector<32x1xf32> to vector<32x128xf32>
    %232 = arith.mulf %230, %231 : vector<32x128xf32>
    %233 = arith.truncf %232 : vector<32x128xf32> to vector<32x128xbf16>
    %c1024 = arith.constant 1024 : index
    %c0_107 = arith.constant 0 : index
    %234 = vector.load %arg17[%c1024, %c0_107] : memref<1152x128xbf16, #tpu.memory_space<vmem>>, vector<128x128xbf16>
    %cst_108 = arith.constant dense<0.000000e+00> : vector<32x128xf32>
    %235 = tpu.matmul %233, %234, %cst_108 {dimension_numbers = #tpu.dot_dimension_numbers<[1], [0], [0], [1], [0, 0, 1, 1], [], []>} : vector<32x128xbf16>, vector<128x128xbf16>, vector<32x128xf32> -> vector<32x128xf32>
    %236 = arith.addf %229, %235 : vector<32x128xf32>
    %c0_109 = arith.constant 0 : index
    %c0_110 = arith.constant 0 : index
    %237 = vector.load %arg18[%c0_109, %c0_110] : memref<1x128xf32, #tpu.memory_space<vmem>>, vector<1x128xf32>
    %238 = vector.broadcast %237 : vector<1x128xf32> to vector<32x128xf32>
    %239 = arith.mulf %236, %238 : vector<32x128xf32>
    %c0_111 = arith.constant 0 : index
    %c0_112 = arith.constant 0 : index
    %240 = vector.load %arg19[%c0_111, %c0_112] : memref<1x128xf32, #tpu.memory_space<vmem>>, vector<1x128xf32>
    %241 = vector.broadcast %240 : vector<1x128xf32> to vector<32x128xf32>
    %242 = arith.addf %239, %241 : vector<32x128xf32>
    %cst_113 = arith.constant 0.000000e+00 : f32
    %243 = vector.broadcast %cst_113 : f32 to vector<32x128xf32>
    %244 = arith.maximumf %242, %243 : vector<32x128xf32>
    %c16_114 = arith.constant 16 : index
    %c0_115 = arith.constant 0 : index
    %245 = vector.load %arg24[%c16_114, %c0_115] : memref<57x128xf32, #tpu.memory_space<vmem>>, vector<32x128xf32>
    tpu.vector_store %arg24[%c16_114, %c0_115], %244 {strides = array<i32>} : memref<57x128xf32, #tpu.memory_space<vmem>>, vector<32x128xf32>,
    %cst_116 = arith.constant 0.000000e+00 : f32
    %246 = vector.broadcast %cst_116 : f32 to vector<32x128xf32>
    %c7_117 = arith.constant 7 : index
    %c0_118 = arith.constant 0 : index
    %247 = vector.load %arg24[%c7_117, %c0_118] : memref<57x128xf32, #tpu.memory_space<vmem>>, vector<32x128xf32>
    %248 = vector.broadcast %174 : vector<32x1xf32> to vector<32x128xf32>
    %249 = arith.mulf %247, %248 : vector<32x128xf32>
    %250 = arith.truncf %249 : vector<32x128xf32> to vector<32x128xbf16>
    %c0_119 = arith.constant 0 : index
    %c0_120 = arith.constant 0 : index
    %251 = vector.load %arg20[%c0_119, %c0_120] : memref<1152x128xbf16, #tpu.memory_space<vmem>>, vector<128x128xbf16>
    %cst_121 = arith.constant dense<0.000000e+00> : vector<32x128xf32>
    %252 = tpu.matmul %250, %251, %cst_121 {dimension_numbers = #tpu.dot_dimension_numbers<[1], [0], [0], [1], [0, 0, 1, 1], [], []>} : vector<32x128xbf16>, vector<128x128xbf16>, vector<32x128xf32> -> vector<32x128xf32>
    %253 = arith.addf %246, %252 : vector<32x128xf32>
    %c8_122 = arith.constant 8 : index
    %c0_123 = arith.constant 0 : index
    %254 = vector.load %arg24[%c8_122, %c0_123] : memref<57x128xf32, #tpu.memory_space<vmem>>, vector<32x128xf32>
    %255 = arith.truncf %254 : vector<32x128xf32> to vector<32x128xbf16>
    %c128_124 = arith.constant 128 : index
    %c0_125 = arith.constant 0 : index
    %256 = vector.load %arg20[%c128_124, %c0_125] : memref<1152x128xbf16, #tpu.memory_space<vmem>>, vector<128x128xbf16>
    %cst_126 = arith.constant dense<0.000000e+00> : vector<32x128xf32>
    %257 = tpu.matmul %255, %256, %cst_126 {dimension_numbers = #tpu.dot_dimension_numbers<[1], [0], [0], [1], [0, 0, 1, 1], [], []>} : vector<32x128xbf16>, vector<128x128xbf16>, vector<32x128xf32> -> vector<32x128xf32>
    %258 = arith.addf %253, %257 : vector<32x128xf32>
    %c9_127 = arith.constant 9 : index
    %c0_128 = arith.constant 0 : index
    %259 = vector.load %arg24[%c9_127, %c0_128] : memref<57x128xf32, #tpu.memory_space<vmem>>, vector<32x128xf32>
    %260 = vector.broadcast %178 : vector<32x1xf32> to vector<32x128xf32>
    %261 = arith.mulf %259, %260 : vector<32x128xf32>
    %262 = arith.truncf %261 : vector<32x128xf32> to vector<32x128xbf16>
    %c256_129 = arith.constant 256 : index
    %c0_130 = arith.constant 0 : index
    %263 = vector.load %arg20[%c256_129, %c0_130] : memref<1152x128xbf16, #tpu.memory_space<vmem>>, vector<128x128xbf16>
    %cst_131 = arith.constant dense<0.000000e+00> : vector<32x128xf32>
    %264 = tpu.matmul %262, %263, %cst_131 {dimension_numbers = #tpu.dot_dimension_numbers<[1], [0], [0], [1], [0, 0, 1, 1], [], []>} : vector<32x128xbf16>, vector<128x128xbf16>, vector<32x128xf32> -> vector<32x128xf32>
    %265 = arith.addf %258, %264 : vector<32x128xf32>
    %c15_132 = arith.constant 15 : index
    %c0_133 = arith.constant 0 : index
    %266 = vector.load %arg24[%c15_132, %c0_133] : memref<57x128xf32, #tpu.memory_space<vmem>>, vector<32x128xf32>
    %267 = vector.broadcast %174 : vector<32x1xf32> to vector<32x128xf32>
    %268 = arith.mulf %266, %267 : vector<32x128xf32>
    %269 = arith.truncf %268 : vector<32x128xf32> to vector<32x128xbf16>
    %c384_134 = arith.constant 384 : index
    %c0_135 = arith.constant 0 : index
    %270 = vector.load %arg20[%c384_134, %c0_135] : memref<1152x128xbf16, #tpu.memory_space<vmem>>, vector<128x128xbf16>
    %cst_136 = arith.constant dense<0.000000e+00> : vector<32x128xf32>
    %271 = tpu.matmul %269, %270, %cst_136 {dimension_numbers = #tpu.dot_dimension_numbers<[1], [0], [0], [1], [0, 0, 1, 1], [], []>} : vector<32x128xbf16>, vector<128x128xbf16>, vector<32x128xf32> -> vector<32x128xf32>
    %272 = arith.addf %265, %271 : vector<32x128xf32>
    %c16_137 = arith.constant 16 : index
    %c0_138 = arith.constant 0 : index
    %273 = vector.load %arg24[%c16_137, %c0_138] : memref<57x128xf32, #tpu.memory_space<vmem>>, vector<32x128xf32>
    %274 = arith.truncf %273 : vector<32x128xf32> to vector<32x128xbf16>
    %c512_139 = arith.constant 512 : index
    %c0_140 = arith.constant 0 : index
    %275 = vector.load %arg20[%c512_139, %c0_140] : memref<1152x128xbf16, #tpu.memory_space<vmem>>, vector<128x128xbf16>
    %cst_141 = arith.constant dense<0.000000e+00> : vector<32x128xf32>
    %276 = tpu.matmul %274, %275, %cst_141 {dimension_numbers = #tpu.dot_dimension_numbers<[1], [0], [0], [1], [0, 0, 1, 1], [], []>} : vector<32x128xbf16>, vector<128x128xbf16>, vector<32x128xf32> -> vector<32x128xf32>
    %277 = arith.addf %272, %276 : vector<32x128xf32>
    %c17_142 = arith.constant 17 : index
    %c0_143 = arith.constant 0 : index
    %278 = vector.load %arg24[%c17_142, %c0_143] : memref<57x128xf32, #tpu.memory_space<vmem>>, vector<32x128xf32>
    %279 = vector.broadcast %178 : vector<32x1xf32> to vector<32x128xf32>
    %280 = arith.mulf %278, %279 : vector<32x128xf32>
    %281 = arith.truncf %280 : vector<32x128xf32> to vector<32x128xbf16>
    %c640_144 = arith.constant 640 : index
    %c0_145 = arith.constant 0 : index
    %282 = vector.load %arg20[%c640_144, %c0_145] : memref<1152x128xbf16, #tpu.memory_space<vmem>>, vector<128x128xbf16>
    %cst_146 = arith.constant dense<0.000000e+00> : vector<32x128xf32>
    %283 = tpu.matmul %281, %282, %cst_146 {dimension_numbers = #tpu.dot_dimension_numbers<[1], [0], [0], [1], [0, 0, 1, 1], [], []>} : vector<32x128xbf16>, vector<128x128xbf16>, vector<32x128xf32> -> vector<32x128xf32>
    %284 = arith.addf %277, %283 : vector<32x128xf32>
    %c23_147 = arith.constant 23 : index
    %c0_148 = arith.constant 0 : index
    %285 = vector.load %arg24[%c23_147, %c0_148] : memref<57x128xf32, #tpu.memory_space<vmem>>, vector<32x128xf32>
    %286 = vector.broadcast %174 : vector<32x1xf32> to vector<32x128xf32>
    %287 = arith.mulf %285, %286 : vector<32x128xf32>
    %288 = arith.truncf %287 : vector<32x128xf32> to vector<32x128xbf16>
    %c768_149 = arith.constant 768 : index
    %c0_150 = arith.constant 0 : index
    %289 = vector.load %arg20[%c768_149, %c0_150] : memref<1152x128xbf16, #tpu.memory_space<vmem>>, vector<128x128xbf16>
    %cst_151 = arith.constant dense<0.000000e+00> : vector<32x128xf32>
    %290 = tpu.matmul %288, %289, %cst_151 {dimension_numbers = #tpu.dot_dimension_numbers<[1], [0], [0], [1], [0, 0, 1, 1], [], []>} : vector<32x128xbf16>, vector<128x128xbf16>, vector<32x128xf32> -> vector<32x128xf32>
    %291 = arith.addf %284, %290 : vector<32x128xf32>
    %c24_152 = arith.constant 24 : index
    %c0_153 = arith.constant 0 : index
    %292 = vector.load %arg24[%c24_152, %c0_153] : memref<57x128xf32, #tpu.memory_space<vmem>>, vector<32x128xf32>
    %293 = arith.truncf %292 : vector<32x128xf32> to vector<32x128xbf16>
    %c896_154 = arith.constant 896 : index
    %c0_155 = arith.constant 0 : index
    %294 = vector.load %arg20[%c896_154, %c0_155] : memref<1152x128xbf16, #tpu.memory_space<vmem>>, vector<128x128xbf16>
    %cst_156 = arith.constant dense<0.000000e+00> : vector<32x128xf32>
    %295 = tpu.matmul %293, %294, %cst_156 {dimension_numbers = #tpu.dot_dimension_numbers<[1], [0], [0], [1], [0, 0, 1, 1], [], []>} : vector<32x128xbf16>, vector<128x128xbf16>, vector<32x128xf32> -> vector<32x128xf32>
    %296 = arith.addf %291, %295 : vector<32x128xf32>
    %c25_157 = arith.constant 25 : index
    %c0_158 = arith.constant 0 : index
    %297 = vector.load %arg24[%c25_157, %c0_158] : memref<57x128xf32, #tpu.memory_space<vmem>>, vector<32x128xf32>
    %298 = vector.broadcast %178 : vector<32x1xf32> to vector<32x128xf32>
    %299 = arith.mulf %297, %298 : vector<32x128xf32>
    %300 = arith.truncf %299 : vector<32x128xf32> to vector<32x128xbf16>
    %c1024_159 = arith.constant 1024 : index
    %c0_160 = arith.constant 0 : index
    %301 = vector.load %arg20[%c1024_159, %c0_160] : memref<1152x128xbf16, #tpu.memory_space<vmem>>, vector<128x128xbf16>
    %cst_161 = arith.constant dense<0.000000e+00> : vector<32x128xf32>
    %302 = tpu.matmul %300, %301, %cst_161 {dimension_numbers = #tpu.dot_dimension_numbers<[1], [0], [0], [1], [0, 0, 1, 1], [], []>} : vector<32x128xbf16>, vector<128x128xbf16>, vector<32x128xf32> -> vector<32x128xf32>
    %303 = arith.addf %296, %302 : vector<32x128xf32>
    %c0_162 = arith.constant 0 : index
    %c0_163 = arith.constant 0 : index
    %304 = vector.load %arg21[%c0_162, %c0_163] : memref<1x128xf32, #tpu.memory_space<vmem>>, vector<1x128xf32>
    %305 = vector.broadcast %304 : vector<1x128xf32> to vector<32x128xf32>
    %306 = arith.mulf %303, %305 : vector<32x128xf32>
    %c0_164 = arith.constant 0 : index
    %c0_165 = arith.constant 0 : index
    %307 = vector.load %arg22[%c0_164, %c0_165] : memref<1x128xf32, #tpu.memory_space<vmem>>, vector<1x128xf32>
    %308 = vector.broadcast %307 : vector<1x128xf32> to vector<32x128xf32>
    %309 = arith.addf %306, %308 : vector<32x128xf32>
    %c0_166 = arith.constant 0 : index
    %c0_167 = arith.constant 0 : index
    %c0_168 = arith.constant 0 : index
    %310 = vector.load %arg1[%c0_166, %c0_167, %c0_168] : memref<1x32x8xbf16, #tpu.memory_space<vmem>>, vector<1x32x8xbf16>
    %311 = vector.shape_cast %310 : vector<1x32x8xbf16> to vector<32x8xbf16>
    %c0_169 = arith.constant 0 : index
    %c0_170 = arith.constant 0 : index
    %312 = vector.load %arg3[%c0_169, %c0_170] : memref<8x128xbf16, #tpu.memory_space<vmem>>, vector<8x128xbf16>
    %cst_171 = arith.constant dense<0.000000e+00> : vector<32x128xf32>
    %313 = tpu.matmul %311, %312, %cst_171 {dimension_numbers = #tpu.dot_dimension_numbers<[1], [0], [0], [1], [0, 0, 1, 1], [], []>} : vector<32x8xbf16>, vector<8x128xbf16>, vector<32x128xf32> -> vector<32x128xf32>
    %c0_172 = arith.constant 0 : index
    %c0_173 = arith.constant 0 : index
    %314 = vector.load %arg4[%c0_172, %c0_173] : memref<1x128xf32, #tpu.memory_space<vmem>>, vector<1x128xf32>
    %315 = vector.broadcast %314 : vector<1x128xf32> to vector<32x128xf32>
    %316 = arith.addf %313, %315 : vector<32x128xf32>
    %317 = arith.addf %309, %316 : vector<32x128xf32>
    %cst_174 = arith.constant 0.000000e+00 : f32
    %318 = vector.broadcast %cst_174 : f32 to vector<32x128xf32>
    %319 = arith.maximumf %317, %318 : vector<32x128xf32>
    %c0_175 = arith.constant 0 : index
    %c0_176 = arith.constant 0 : index
    %c0_177 = arith.constant 0 : index
    %320 = vector.load %arg23[%c0_175, %c0_176, %c0_177] : memref<1x32x128xf32, #tpu.memory_space<vmem>>, vector<1x32x128xf32>
    %321 = vector.shape_cast %320 : vector<1x32x128xf32> to vector<32x128xf32>
    %322 = vector.shape_cast %319 : vector<32x128xf32> to vector<1x32x128xf32>
    tpu.vector_store %arg23[%c0_175, %c0_176, %c0_177], %322 {strides = array<i32>} : memref<1x32x128xf32, #tpu.memory_space<vmem>>, vector<1x32x128xf32>,
    return
  }
  func.func @transform_0(%arg0: i32) -> (i32, i32, i32) {
    %c0_i32 = arith.constant 0 : i32
    %c0_i32_0 = arith.constant 0 : i32
    %c0_i32_1 = arith.constant 0 : i32
    return %arg0, %c0_i32, %c0_i32_0 : i32, i32, i32
  }
  func.func @transform_1(%arg0: i32) -> (i32, i32, i32) {
    %c0_i32 = arith.constant 0 : i32
    %c0_i32_0 = arith.constant 0 : i32
    %c0_i32_1 = arith.constant 0 : i32
    return %arg0, %c0_i32, %c0_i32_0 : i32, i32, i32
  }
  func.func @transform_2(%arg0: i32) -> (i32, i32) {
    %c0_i32 = arith.constant 0 : i32
    %c0_i32_0 = arith.constant 0 : i32
    %c0_i32_1 = arith.constant 0 : i32
    return %c0_i32, %c0_i32_0 : i32, i32
  }
  func.func @transform_3(%arg0: i32) -> (i32, i32) {
    %c0_i32 = arith.constant 0 : i32
    %c0_i32_0 = arith.constant 0 : i32
    %c0_i32_1 = arith.constant 0 : i32
    return %c0_i32, %c0_i32_0 : i32, i32
  }
  func.func @transform_4(%arg0: i32) -> (i32, i32) {
    %c0_i32 = arith.constant 0 : i32
    %c0_i32_0 = arith.constant 0 : i32
    %c0_i32_1 = arith.constant 0 : i32
    return %c0_i32, %c0_i32_0 : i32, i32
  }
  func.func @transform_5(%arg0: i32) -> (i32, i32) {
    %c0_i32 = arith.constant 0 : i32
    %c0_i32_0 = arith.constant 0 : i32
    %c0_i32_1 = arith.constant 0 : i32
    return %c0_i32, %c0_i32_0 : i32, i32
  }
  func.func @transform_6(%arg0: i32) -> (i32, i32) {
    %c0_i32 = arith.constant 0 : i32
    %c0_i32_0 = arith.constant 0 : i32
    %c0_i32_1 = arith.constant 0 : i32
    return %c0_i32, %c0_i32_0 : i32, i32
  }
  func.func @transform_7(%arg0: i32) -> (i32, i32) {
    %c0_i32 = arith.constant 0 : i32
    %c0_i32_0 = arith.constant 0 : i32
    %c0_i32_1 = arith.constant 0 : i32
    return %c0_i32, %c0_i32_0 : i32, i32
  }
  func.func @transform_8(%arg0: i32) -> (i32, i32) {
    %c0_i32 = arith.constant 0 : i32
    %c0_i32_0 = arith.constant 0 : i32
    %c0_i32_1 = arith.constant 0 : i32
    return %c0_i32, %c0_i32_0 : i32, i32
  }
  func.func @transform_9(%arg0: i32) -> (i32, i32) {
    %c0_i32 = arith.constant 0 : i32
    %c0_i32_0 = arith.constant 0 : i32
    %c0_i32_1 = arith.constant 0 : i32
    return %c0_i32, %c0_i32_0 : i32, i32
  }
  func.func @transform_10(%arg0: i32) -> (i32, i32) {
    %c0_i32 = arith.constant 0 : i32
    %c0_i32_0 = arith.constant 0 : i32
    %c0_i32_1 = arith.constant 0 : i32
    return %c0_i32, %c0_i32_0 : i32, i32
  }
  func.func @transform_11(%arg0: i32) -> (i32, i32) {
    %c0_i32 = arith.constant 0 : i32
    %c0_i32_0 = arith.constant 0 : i32
    %c0_i32_1 = arith.constant 0 : i32
    return %c0_i32, %c0_i32_0 : i32, i32
  }
  func.func @transform_12(%arg0: i32) -> (i32, i32) {
    %c0_i32 = arith.constant 0 : i32
    %c0_i32_0 = arith.constant 0 : i32
    %c0_i32_1 = arith.constant 0 : i32
    return %c0_i32, %c0_i32_0 : i32, i32
  }
  func.func @transform_13(%arg0: i32) -> (i32, i32) {
    %c0_i32 = arith.constant 0 : i32
    %c0_i32_0 = arith.constant 0 : i32
    %c0_i32_1 = arith.constant 0 : i32
    return %c0_i32, %c0_i32_0 : i32, i32
  }
  func.func @transform_14(%arg0: i32) -> (i32, i32) {
    %c0_i32 = arith.constant 0 : i32
    %c0_i32_0 = arith.constant 0 : i32
    %c0_i32_1 = arith.constant 0 : i32
    return %c0_i32, %c0_i32_0 : i32, i32
  }
  func.func @transform_15(%arg0: i32) -> (i32, i32) {
    %c0_i32 = arith.constant 0 : i32
    %c0_i32_0 = arith.constant 0 : i32
    %c0_i32_1 = arith.constant 0 : i32
    return %c0_i32, %c0_i32_0 : i32, i32
  }
  func.func @transform_16(%arg0: i32) -> (i32, i32) {
    %c0_i32 = arith.constant 0 : i32
    %c0_i32_0 = arith.constant 0 : i32
    %c0_i32_1 = arith.constant 0 : i32
    return %c0_i32, %c0_i32_0 : i32, i32
  }
  func.func @transform_17(%arg0: i32) -> (i32, i32) {
    %c0_i32 = arith.constant 0 : i32
    %c0_i32_0 = arith.constant 0 : i32
    %c0_i32_1 = arith.constant 0 : i32
    return %c0_i32, %c0_i32_0 : i32, i32
  }
  func.func @transform_18(%arg0: i32) -> (i32, i32) {
    %c0_i32 = arith.constant 0 : i32
    %c0_i32_0 = arith.constant 0 : i32
    %c0_i32_1 = arith.constant 0 : i32
    return %c0_i32, %c0_i32_0 : i32, i32
  }
  func.func @transform_19(%arg0: i32) -> (i32, i32) {
    %c0_i32 = arith.constant 0 : i32
    %c0_i32_0 = arith.constant 0 : i32
    %c0_i32_1 = arith.constant 0 : i32
    return %c0_i32, %c0_i32_0 : i32, i32
  }
  func.func @transform_20(%arg0: i32) -> (i32, i32) {
    %c0_i32 = arith.constant 0 : i32
    %c0_i32_0 = arith.constant 0 : i32
    %c0_i32_1 = arith.constant 0 : i32
    return %c0_i32, %c0_i32_0 : i32, i32
  }
  func.func @transform_21(%arg0: i32) -> (i32, i32) {
    %c0_i32 = arith.constant 0 : i32
    %c0_i32_0 = arith.constant 0 : i32
    %c0_i32_1 = arith.constant 0 : i32
    return %c0_i32, %c0_i32_0 : i32, i32
  }
  func.func @transform_22(%arg0: i32) -> (i32, i32, i32) {
    %c0_i32 = arith.constant 0 : i32
    %c0_i32_0 = arith.constant 0 : i32
    %c0_i32_1 = arith.constant 0 : i32
    return %arg0, %c0_i32, %c0_i32_0 : i32, i32, i32
  }
}

</mosaic_0001>

<bundles_post_ra>
// kernel: tpu_custom_call.1
= control target key start
LH: loop header
LB: loop body
LE: loop exit
PB: predicated region body
PF: predicated region fallthrough
CT: control target
= control target key end

     0   :  { %s5931_s0 = inlined_call_operand.vmem [shape: bf16[2,32,8], index: 0, kind: input, shape index: {}]   ;;  %s5932_s1 = inlined_call_operand.vmem [shape: bf16[2,32,16], index: 1, kind: input, shape index: {}]   ;;  %s5933_s2 = inlined_call_operand.vmem [shape: bf16[8,128], index: 2, kind: input, shape index: {}]   ;;  %s5934_s3 = inlined_call_operand.vmem [shape: f32[1,128], index: 3, kind: input, shape index: {}]   ;;  %s5935_s4 = inlined_call_operand.vmem [shape: bf16[8,128], index: 4, kind: input, shape index: {}]   ;;  %s5936_s5 = inlined_call_operand.vmem [shape: f32[1,128], index: 5, kind: input, shape index: {}]   ;;  %s5937_s6 = inlined_call_operand.vmem [shape: bf16[16,128], index: 6, kind: input, shape index: {}]   ;;  %s5938_s7 = inlined_call_operand.vmem [shape: f32[1,128], index: 7, kind: input, shape index: {}]   ;;  %s5939_s8 = inlined_call_operand.vmem [shape: f32[1,128], index: 8, kind: input, shape index: {}]   ;;  %s5940_s9 = inlined_call_operand.vmem [shape: f32[1,128], index: 9, kind: input, shape index: {}]   ;;  %s5941_s10 = inlined_call_operand.vmem [shape: f32[1,128], index: 10, kind: input, shape index: {}]   ;;  %s5942_s11 = inlined_call_operand.vmem [shape: f32[1,128], index: 11, kind: input, shape index: {}]   ;;  %s5943_s12 = inlined_call_operand.vmem [shape: f32[1,32], index: 12, kind: input, shape index: {}]   ;;  %s5944_s13 = inlined_call_operand.vmem [shape: f32[1,32], index: 13, kind: input, shape index: {}]   ;;  %s5945_s14 = inlined_call_operand.vmem [shape: bf16[32,128], index: 14, kind: input, shape index: {}]   ;;  %s5946_s15 = inlined_call_operand.vmem [shape: f32[1,128], index: 15, kind: input, shape index: {}]   ;;  %s5947_s16 = inlined_call_operand.hbm [shape: bf16[1152,128], index: 16, kind: input, shape index: {}]   ;;  %s5948_s17 = inlined_call_operand.vmem [shape: f32[1,128], index: 17, kind: input, shape index: {}]   ;;  %s5949_s18 = inlined_call_operand.vmem [shape: f32[1,128], index: 18, kind: input, shape index: {}]   ;;  %s5950_s19 = inlined_call_operand.hbm [shape: bf16[1152,128], index: 19, kind: input, shape index: {}]   ;;  %s5951_s20 = inlined_call_operand.vmem [shape: f32[1,128], index: 20, kind: input, shape index: {}]   ;;  %s5952_s21 = inlined_call_operand.vmem [shape: f32[1,128], index: 21, kind: input, shape index: {}]   ;;  %s5953_s22 = inlined_call_operand.hbm [shape: f32[2,32,128], index: 22, kind: output, shape index: {}]  }
   0x1   :  { %5966 = sst [smem:[#allocation20_spill]] %s5931_s0 }
   0x2   :  { %5967 = sst [smem:[#allocation21_spill]] %s5932_s1 }
   0x3   :  { %5968 = sst [smem:[#allocation22_spill]] %s5933_s2 }
   0x4   :  { %5969 = sst [smem:[#allocation23_spill]] %s5934_s3 }
   0x5   :  { %5970 = sst [smem:[#allocation24_spill]] %s5935_s4 }
   0x6   :  { %5971 = sst [smem:[#allocation25_spill]] %s5936_s5 }
   0x7   :  { %5972 = sst [smem:[#allocation26_spill]] %s5937_s6 }
   0x8   :  { %5973 = sst [smem:[#allocation27_spill]] %s5952_s21 }
   0x9   :  { %5974 = sst [smem:[#allocation28_spill]] %s5953_s22 }
   0xa   :  { %27 = vsyncpa [#allocation5], 0 }
   0xb   :  { %28 = vsyncpa [#allocation8], 0 }
   0xc   :  { %29 = vsyncpa [#allocation6], 0 }
   0xd   :  { %31 = vsyncpa [#allocation6 + $0x1], 0  ;;  %s5319_s3 = smov 0   ;;  %s5321_s28 = smov 0  }
   0xe   :  { %s5323_s29 = smov 0   ;;  %s5325_s30 = smov 0  }
   0xf LB: > { %5975 = sst [smem:[#allocation13_spill]] %s5181_s3  ;;  %s5340_s4 = sadd.s32 4294967295, %s5193_s30   ;;  %s5193_s30 = sphi %s5325_s30, %s6006_s30   ;;  %s5189_s29 = sphi %s5323_s29, %s6008_s29   ;;  %s5185_s28 = sphi %s5321_s28, %s6010_s28   ;;  %s5181_s3 = sphi %s5319_s3, %s6009_s3  }
  0x10   : > { %5976 = sst [smem:[#allocation14_spill]] %s5189_s29  ;;  %s3942_s0 = sadd.s32 4294967294, %s5193_s30  }
  0x11   : > { %5977 = sst [smem:[#allocation15_spill]] %s5193_s30  ;;  %s5344_s23 = sadd.s32 1, %s5193_s30  }
  0x12   : > { %5978 = sst [smem:[#allocation16_spill]] %s5344_s23  ;;  %s516_s1 = sadd.s32 1, %s5189_s29 }
  0x13   : > { %s513_s5 = ssub.s32 %s5193_s30, %s5344_s23  ;;  %p526_p0 = scmp.ne.s32.totalorder %s5189_s29, %s5185_s28 }
  0x14   : > { %p514_p1 = scmp.eq.s32.totalorder %s513_s5, 0  ;;  %p527_p2 = scmp.eq.s32.totalorder %s5340_s4, 1 }
  0x15   : > { %p532_p3 = scmp.ne.s32.totalorder %s5185_s28, %s5181_s3  ;;  %p533_p4 = scmp.eq.s32.totalorder %s3942_s0, 1 }
  0x16   : > { %s5355_s24 = scalar_select %p514_p1, %s5189_s29, %s516_s1  }
  0x17   : > { %p5357_p5 = por %p527_p2, %p526_p0  ;;  %p5361_p6 = por %p533_p4, %p532_p3 }
  0x18   : > { %5979 = sst [smem:[#allocation17_spill]] %s5355_s24  ;;  %p3943_p7 = scmp.ge.s32.totalorder %s5193_s30, 1 }
  0x19   : > { %s5980_s6 = scalar_select %p5357_p5, 1, 0 }
  0x1a   : > { %s5982_s25 = scalar_select %p5361_p6, 1, 0 }
  0x1b   : > { %5981 = sst [smem:[#allocation18_spill]] %s5980_s6  ;;  %p540_p8 = scmp.lt.s32.totalorder %s5193_s30, 3 }
  0x1c   : > { %5983 = sst [smem:[#allocation19_spill]] %s5982_s25  ;;  %p5960_p9 = scmp.eq.s32.totalorder %s5340_s4, 0 }
  0x1d   : > { %p5368_p10 = pnand %p3943_p7, %p540_p8  ;;  %s5195_s2 = smov [#allocation4]  }
  0x1e   : > { %s594_s27 = sshll.u32 %s5195_s2, 4  ;;  %s5196_s1 = smov [#allocation7]   ;;  %s595_s27 = int_to_ptr.vmem [resolvable:$true] %s594_s27 }
  0x1f   : > { %s5984_s26 = scalar_select %p5368_p10, 1, 0 }
  0x20   : > { %p4833_p11 = pneg %p5368_p10  ;;  %s613_s5 = sshll.u32 %s5196_s1, 4  ;;  %s5380_s5 = int_to_ptr.vmem [resolvable:$true] %s613_s5 }
  0x21   : > { %s5067_s23 = scalar_lea.hbm %s5947_s16, 9216 }
  0x22   : > { %p5376_p12 = pnand %p5960_p9, %p4833_p11  ;;  %p5068_p13 = scmp.ne.s32.totalorder %s5947_s16, %s5067_s23 }
  0x23   : > { %p5074_p3 = scmp.lt.u32.totalorder %s5067_s23, %s5947_s16 }
  0x24   : > { %p5069_p0 = pneg %p5376_p12 }
  0x26   : > { %p5070_p1 = pnand %p5069_p0, %p5068_p13 }
  0x28   : > { %p5071_p2 = pneg %p5070_p1 }
  0x2a   : > { %p5076_p4 = pnand %p5074_p3, %p5071_p2 }
  0x2c   : > { %5079 = shalt.err (!%p5076_p4)
}
  0x2d   : > { %s5080_s1 = scalar_lea.vmem %s595_s27, 9216  ;;  %p5088_p9 = scmp.lt.s32.totalorder %s595_s27, %s595_s27 }
  0x2e   : > { %p5081_p7 = scmp.ne.s32.totalorder %s595_s27, %s5080_s1  ;;  %p5089_p6 = scmp.lt.s32.totalorder %s5080_s1, %s5080_s1 }
  0x30   : > { %p5083_p8 = pnand %p5081_p7, %p5069_p0  ;;  %p5090_p5 = por %p5089_p6, %p5088_p9 }
  0x32   : > { %p5084_p11 = pneg %p5083_p8 }
  0x34   : > { %p5091_p10 = pnand %p5090_p5, %p5084_p11 }
  0x36   : > { %5094 = shalt.err (!%p5091_p10)
}
  0x37   : > { %s5197_s29 = smov 64   ;;  %s5198_s24 = smov 4  }
  0x38   : > { %4836 = dma.hbm_to_vmem [thread:$0]  (!%p5376_p12), %s5947_s16, 9216, %s595_s27, [#allocation5], %s5197_s29, %s5197_s29, %s5198_s24  }
  0x39   : > { %s5095_s2 = scalar_lea.hbm %s5950_s19, 9216 }
  0x3a   : > { %p5096_p13 = scmp.ne.s32.totalorder %s5950_s19, %s5095_s2  ;;  %p5102_p9 = scmp.lt.u32.totalorder %s5095_s2, %s5950_s19 }
  0x3c   : > { %p5098_p5 = pnand %p5096_p13, %p5069_p0 }
  0x3e   : > { %p5099_p6 = pneg %p5098_p5 }
  0x40   : > { %p5104_p10 = pnand %p5102_p9, %p5099_p6 }
  0x42   : > { %5107 = shalt.err (!%p5104_p10)
}
  0x43   : > { %s5108_s27 = scalar_lea.vmem %s5380_s5, 9216  ;;  %p5116_p4 = scmp.lt.s32.totalorder %s5380_s5, %s5380_s5 }
  0x44   : > { %p5109_p1 = scmp.ne.s32.totalorder %s5380_s5, %s5108_s27  ;;  %p5117_p7 = scmp.lt.s32.totalorder %s5108_s27, %s5108_s27 }
  0x46   : > { %p5111_p2 = pnand %p5109_p1, %p5069_p0  ;;  %p5118_p8 = por %p5117_p7, %p5116_p4 }
  0x48   : > { %p5112_p3 = pneg %p5111_p2 }
  0x4a   : > { %p5119_p11 = pnand %p5118_p8, %p5112_p3 }
  0x4c   : > { %5122 = shalt.err (!%p5119_p11)
}
  0x4d   : > { %4839 = dma.hbm_to_vmem [thread:$0]  (!%p5376_p12), %s5950_s19, 9216, %s5380_s5, [#allocation8], %s5197_s29, %s5197_s29, %s5198_s24  }
  0x4e   : > { %p5986_p13 = scmp.ne.s32.totalorder %s5984_s26, 0 }
  0x4f   : > { %p5987_p5 = scmp.eq.s32.totalorder (!%p5986_p13), %s5340_s4, 0 }
  0x50   : > { %651 = sbr.rel (%p5986_p13) target bundleno = 2493 (0x9bd), region = 108 }
  0x57   : > { %5168 = dma.done.wait (%p5987_p5), [#allocation5], 9216   ;;  %p5988_p0 = pmov %p5987_p5 }
  0x59   : > { %5170 = vsyncadd (%p5988_p0), [#allocation5], 4294958080  ;;  %p5989_p6 = pmov %p5988_p0 }
  0x5a   : > { %p5990_p9 = pmov %p5988_p0 }
  0x5b   : > { %5172 = dma.done.wait (%p5989_p6), [#allocation8], 9216  }
  0x5c   : > { %5174 = vsyncadd (%p5990_p9), [#allocation8], 4294958080  ;;  %p722_p10 = scmp.lt.s32.totalorder %s5340_s4, 1  ;;  %s5991_s29 = sld [smem:[#allocation21_spill]]  ;;  %vm848_vm0 = vcmask 130048   ;;  %vm766_vm1 = vcmask 1043456  }
  0x5d   : > { %s5992_s23 = sld [smem:[#allocation26_spill]]  ;;  %s5993_s1 = sld [smem:[#allocation20_spill]]  ;;  %vm759_vm2 = vcmask 64512   ;;  %v3960_v7 = vld [vmem:[%s5938_s7] ss:$0 sm:$0xff]  ;;  %v5199_v31 = vmov 0.0  }
  0x5e   : > { %s723_s6 = scalar_select %p722_p10, %s5340_s4, 1  ;;  %733 = vst [vmem:[#allocation2] sm:$0xff] %v5199_v31  ;;  %734 = vst [vmem:[#allocation2 + $0x8] sm:$0xff] %v5199_v31  ;;  %vm5200_vm3 = vmmov 0   ;;  %vm1115_vm4 = vcmask 261120  }
  0x5f   : > { %735 = vst [vmem:[#allocation2 + $0x30] sm:$0xff] %v5199_v31  ;;  %736 = vst [vmem:[#allocation2 + $0x38] sm:$0x1] %v5199_v31  ;;  %s5996_s5 = sld [smem:[#allocation22_spill]]  ;;  %s719_s30 = sand.u32 1, %s5185_s28  }
  0x60   : > { %s4143_s0 = sshll.u32 %s723_s6, 4  ;;  %s5994_s6 = sld [smem:[#allocation24_spill]] }
  0x61   : > { %s5998_s2 = sld [smem:[#allocation27_spill]]  ;;  %s6000_s26 = sld [smem:[#allocation28_spill]] }
  0x62   : > { %s731_s24 = scalar_lea.vmem %s5991_s29, %s4143_s0  ;;  %s5997_s29 = sld [smem:[#allocation23_spill]] }
  0x63   : > { %v4889_v0 = vld [vmem:[%s5992_s23] sm:$0xff]   ;;  %s5450_s27 = scalar_lea.vmem %s5993_s1, %s4143_s0  ;;  %v4891_v2 = vld [vmem:[%s731_s24 + $0x8] sm:$0xff]   ;;  %s3950_s1 = sshll.u32 %s719_s30, 5 }
  0x64   : > { %v4890_v1 = vld [vmem:[%s731_s24] sm:$0xff]   ;;  %4353 = vmatprep.subr.bf16.mxu1 %v4889_v0  ;;  %v4893_v6 = vld [vmem:[%s5450_s27 + $0x8] sm:$0xff]   ;;  %s5995_s24 = sld [smem:[#allocation25_spill]]  ;;  %s721_s21 = scalar_lea.vmem [#allocation9], %s3950_s1 }
  0x65   : > { %4354 = vmatpush3.bf16.msra.mxu1 %v4889_v0  ;;  %4355 = vmatprep.mubr.msk.bf16.mxu1 %vm848_vm0, %v4890_v1  ;;  %v4892_v5 = vld [vmem:[%s5450_s27] sm:$0xff]   ;;  %s3844_s22 = sshll.u32 %s721_s21, 4  ;;  %s4145_s0 = sshll.u32 %s5340_s4, 9  ;;  %s5881_s22 = int_to_ptr.vmem [resolvable:$true] %s3844_s22 }
  0x66   : > { %v741_v3 = vld [vmem:[%s5994_s6] sm:$0xf]  ;;  %4349 = vmatprep.mubr.msk.bf16.mxu0 %vm759_vm2, %v4892_v5  ;;  %4367 = vmatprep.subr.bf16.mxu1 %v5199_v31  ;;  %s5999_s6 = sld [smem:[#allocation18_spill]]  ;;  %s5890_s4 = scalar_lea.sflag [#allocation6], %s719_s30 }
  0x67   : > { %4821 = vmatprep.subr.msk.bf16.mxu0 %vm766_vm1, %v741_v3  ;;  %v768_v4 = vsel %vm766_vm1, %v741_v3, 0  ;;  %s5201_s3 = smov [#allocation9]  }
  0x68   : > { %4348 = vmatpush3.bf16.msra.mxu0 %v768_v4  ;;  %4356 = vmatmul.mubr.msk.bf16.vlgmr.msra.gmra.mrb[0].mxu1 %vm848_vm0, %v4891_v2  ;;  %s5127_s23 = sshll.u32 %s5201_s3, 4  ;;  %s5128_s23 = int_to_ptr.vmem [resolvable:$false] %s5127_s23 }
  0x69   : > { %4359 = vmatprep.subr.bf16.mxu0 %v5199_v31  ;;  %4371 = vmatprep.mubr.msk.bf16.mxu1 %vm5200_vm3, %v5199_v31  ;;  %s5129_s25 = scalar_lea.vmem %s5128_s23, 1024  ;;  %p5130_p4 = scmp.lt.s32.totalorder %s5881_s22, %s5128_s23 }
  0x6a   : > { %v3955_v9 = vld [vmem:[%s5995_s24] ss:$0 sm:$0xff]  ;;  %s5123_s24 = scalar_lea.vmem %s5881_s22, 512 }
  0x6b   : > { %4350 = vmatmul.mubr.msk.bf16.vlgmr.msra.gmra.mrb[0].mxu0 %vm759_vm2, %v4893_v6  ;;  %p5124_p12 = scmp.ne.s32.totalorder %s5881_s22, %s5123_s24  ;;  %p5131_p7 = scmp.lt.s32.totalorder %s5129_s25, %s5123_s24 }
  0x6c   : > { %4363 = vmatprep.mubr.msk.bf16.mxu0 %vm5200_vm3, %v5199_v31  ;;  %p6001_p1 = scmp.ne.s32.totalorder %s5999_s6, 0 }
  0x6d   : > { %p5132_p8 = por %p5131_p7, %p5130_p4 }
  0x6e   : > { %p5125_p2 = pnand %p5124_p12, %p6001_p1 }
  0x70   : > { %p5126_p3 = pneg %p5125_p2 }
  0x72   : > { %p5133_p11 = pnand %p5132_p8, %p5126_p3 }
 0x13b   : > { %v4357_v8 = vpop.f32.mrb[0].mxu1 }
 0x13c   : > { %v889_v10 = vpop.f32.mrb[1].mxu1  ;;  %v5481_v23 = vadd.f32 %v4357_v8, %v3960_v7 }
 0x13d   : > { %v5467_v11 = vadd.f32 %v3960_v7, %v889_v10  ;;  %v4358_v12 = vpop.f32.mrb[2].mxu1 }
 0x13e   : > { %v4351_v13 = vpop.f32.mrb[0].mxu0  ;;  %v892_v14 = vpop.f32.mrb[3].mxu1  ;;  %v5483_v24 = vadd.f32 %v4358_v12, %v3960_v7  ;;  %v996_v25 = vmul.f32 %v5481_v23, %v5481_v23 }
 0x13f   : > { %v5469_v15 = vadd.f32 %v4351_v13, %v3955_v9  ;;  %v804_v16 = vpop.f32.mrb[1].mxu0  ;;  %v5471_v17 = vadd.f32 %v3960_v7, %v892_v14  ;;  %986 = vadd.xlane.f32.xlu0 %v5467_v11  ;;  %v994_v18 = vmul.f32 %v5467_v11, %v5467_v11 }
 0x140   : > { %v4352_v19 = vpop.f32.mrb[2].mxu0  ;;  %v5489_v26 = vadd.f32 %v3955_v9, %v804_v16  ;;  %v997_v27 = vmul.f32 %v5483_v24, %v5483_v24  ;;  %v3968_v16 = vld [vmem:[%s5941_s10] ss:$0 sm:$0xff] }
 0x141   : > { %v5476_v20 = vadd.f32 %v4352_v19, %v3955_v9  ;;  %v807_v21 = vpop.f32.mrb[3].mxu0  ;;  %998 = vadd.xlane.f32.xlu1 %v994_v18  ;;  %v995_v22 = vmul.f32 %v5471_v17, %v5471_v17 }
 0x142   : > { %v5493_v28 = vadd.f32 %v3955_v9, %v807_v21  ;;  %v914_v29 = vmul.f32 %v5489_v26, %v5489_v26 }
 0x143   : > { %988 = vadd.xlane.f32.xlu0 %v5471_v17 }
 0x144   : > { %v915_v30 = vmul.f32 %v5493_v28, %v5493_v28 }
 0x145   : > { %1000 = vadd.xlane.f32.xlu1 %v995_v22 }
 0x147   : > { %990 = vadd.xlane.f32.xlu0 %v5481_v23 }
 0x149   : > { %992 = vadd.xlane.f32.xlu1 %v5483_v24 }
 0x14b   : > { %1002 = vadd.xlane.f32.xlu0 %v996_v25 }
 0x14d   : > { %1004 = vadd.xlane.f32.xlu1 %v997_v27 }
 0x14f   : > { %906 = vadd.xlane.f32.xlu0 %v5489_v26 }
 0x151   : > { %908 = vadd.xlane.f32.xlu1 %v5493_v28 }
 0x153   : > { %918 = vadd.xlane.f32.xlu0 %v914_v29 }
 0x155   : > { %920 = vadd.xlane.f32.xlu1 %v915_v30  ;;  %v3969_v30 = vld [vmem:[%s5942_s11] ss:$0 sm:$0xff] }
 0x1cc   : > { %v987_v32 = vpop.xlane.xlu0 %986 }
 0x1cd   : > { %v1006_v33 = vmul.f32 0.125, %v987_v32 }
 0x1ce   : > { %v999_v34 = vpop.xlane.xlu1 %998 }
 0x1cf   : > { %v1014_v35 = vmul.f32 %v1006_v33, %v1006_v33  ;;  %v1010_v36 = vmul.f32 0.125, %v999_v34  ;;  %v1026_v2 = vsub.f32 %v5467_v11, %v1006_v33 }
 0x1d0   : > { %v989_v37 = vpop.xlane.xlu0 %988 }
 0x1d1   : > { %v1018_v38 = vsub.f32 %v1010_v36, %v1014_v35  ;;  %v1007_v39 = vmul.f32 0.125, %v989_v37 }
 0x1d2   : > { %v1001_v40 = vpop.xlane.xlu1 %1000 }
 0x1d3   : > { %v1022_v41 = vmax.f32 %v1018_v38, 0.0  ;;  %v1015_v42 = vmul.f32 %v1007_v39, %v1007_v39  ;;  %v1011_v43 = vmul.f32 0.125, %v1001_v40  ;;  %v1027_v18 = vsub.f32 %v5471_v17, %v1007_v39 }
 0x1d4   : > { %v991_v44 = vpop.xlane.xlu0 %990 }
 0x1d5   : > { %v1030_v45 = vadd.f32 1e-05, %v1022_v41  ;;  %v1019_v46 = vsub.f32 %v1011_v43, %v1015_v42  ;;  %v1008_v47 = vmul.f32 0.125, %v991_v44 }
 0x1d6   : > { %v993_v48 = vpop.xlane.xlu1 %992 }
 0x1d7   : > { %5042 = vrsqrt.f32 %v1030_v45  ;;  %v1023_v49 = vmax.f32 %v1019_v46, 0.0  ;;  %v1009_v50 = vmul.f32 0.125, %v993_v48  ;;  %v1016_v53 = vmul.f32 %v1008_v47, %v1008_v47 }
 0x1d8   : > { %v1003_v51 = vpop.xlane.xlu0 %1002  ;;  %v1028_v34 = vsub.f32 %v5481_v23, %v1008_v47 }
 0x1d9   : > { %v1031_v52 = vadd.f32 1e-05, %v1023_v49  ;;  %v1012_v54 = vmul.f32 0.125, %v1003_v51  ;;  %v1017_v56 = vmul.f32 %v1009_v50, %v1009_v50  ;;  %v1029_v17 = vsub.f32 %v5483_v24, %v1009_v50  ;;  %v5529_v24 = vld [vmem:[%s5939_s8] ss:$0 sm:$0xff] }
 0x1da   : > { %v1005_v55 = vpop.xlane.xlu1 %1004 }
 0x1db   : > { %5044 = vrsqrt.f32 %v1031_v52  ;;  %v1020_v57 = vsub.f32 %v1012_v54, %v1016_v53  ;;  %v1013_v58 = vmul.f32 0.125, %v1005_v55 }
 0x1dc   : > { %v907_v59 = vpop.xlane.xlu0 %906 }
 0x1dd   : > { %v1024_v60 = vmax.f32 %v1020_v57, 0.0  ;;  %v1021_v61 = vsub.f32 %v1013_v58, %v1017_v56  ;;  %v926_v62 = vmul.f32 0.125, %v907_v59 }
 0x1de   : > { %v909_v63 = vpop.xlane.xlu1 %908 }
 0x1df   : > { %v1032_v0 = vadd.f32 1e-05, %v1024_v60  ;;  %v1025_v1 = vmax.f32 %v1021_v61, 0.0  ;;  %v927_v3 = vmul.f32 0.125, %v909_v63  ;;  %v934_v7 = vmul.f32 %v926_v62, %v926_v62 }
 0x1e0   : > { %v919_v4 = vpop.xlane.xlu0 %918  ;;  %v946_v44 = vsub.f32 %v5489_v26, %v926_v62  ;;  %v5539_v26 = vld [vmem:[%s5940_s9] ss:$0 sm:$0xff] }
 0x1e1   : > { %v5043_v5 = vpop.eup %5042  ;;  %5046 = vrsqrt.f32 %v1032_v0  ;;  %v1033_v6 = vadd.f32 1e-05, %v1025_v1  ;;  %v930_v8 = vmul.f32 0.125, %v919_v4  ;;  %v935_v12 = vmul.f32 %v927_v3, %v927_v3  ;;  %v4894_v4 = vld [vmem:[%s5945_s14] sm:$0xff]  }
 0x1e2   : > { %v921_v9 = vpop.xlane.xlu1 %920  ;;  %v1038_v10 = vmul.f32 %v5043_v5, %v1026_v2  ;;  %v947_v47 = vsub.f32 %v5493_v28, %v927_v3  ;;  %v916_v2 = vmul.f32 %v5469_v15, %v5469_v15  ;;  %v917_v3 = vmul.f32 %v5476_v20, %v5476_v20  ;;  %4368 = vmatpush3.bf16.msra.mxu1 %v4894_v4  ;;  %v4895_v5 = vld [vmem:[%s5945_s14 + $0x8] sm:$0xff]  }
 0x1e3   : > { %5048 = vrsqrt.f32 %v1033_v6  ;;  %v938_v13 = vsub.f32 %v930_v8, %v934_v7  ;;  %v931_v14 = vmul.f32 0.125, %v921_v9  ;;  %4369 = vmatprep.subr.bf16.mxu1 %v5199_v31 }
 0x1e4   : > { %v1048_v25 = vmul.f32 %v3968_v16, %v1038_v10 }
 0x1e5   : > { %v5045_v11 = vpop.eup %5044  ;;  %v942_v19 = vmax.f32 %v938_v13, 0.0  ;;  %v939_v21 = vsub.f32 %v931_v14, %v935_v12 }
 0x1e6   : > { %v1039_v22 = vmul.f32 %v5045_v11, %v1027_v18  ;;  %v1058_v35 = vadd.f32 %v3969_v30, %v1048_v25  ;;  %4370 = vmatpush3.bf16.msra.mxu1 %v4895_v5 }
 0x1e7   : > { %v950_v27 = vadd.f32 1e-05, %v942_v19  ;;  %v943_v29 = vmax.f32 %v939_v21, 0.0  ;;  %4375 = vmatprep.subr.bf16.mxu1 %v5199_v31 }
 0x1e8   : > { %v1049_v32 = vmul.f32 %v3968_v16, %v1039_v22 }
 0x1e9   : > { %5050 = vrsqrt.f32 %v950_v27  ;;  %v951_v33 = vadd.f32 1e-05, %v943_v29 }
 0x1ea   : > { %v1059_v36 = vadd.f32 %v3969_v30, %v1049_v32 }
 0x1eb   : > { %v5047_v37 = vpop.eup %5046  ;;  %5052 = vrsqrt.f32 %v951_v33 }
 0x1ec   : > { %v5521_v38 = vpack.c.bf16 %v1059_v36, %v1058_v35  ;;  %v1040_v39 = vmul.f32 %v5047_v37, %v1028_v34 }
 0x1ed   : > { %v5049_v40 = vpop.eup %5048 }
 0x1ee   : > { %4360 = vmatpush3.bf16.xpose.msra.mxu0 %v5521_v38  ;;  %v1041_v41 = vmul.f32 %v5049_v40, %v1029_v17  ;;  %v1050_v42 = vmul.f32 %v3968_v16, %v1040_v39 }
 0x1ef   : > { %4361 = vmatprep.subr.bf16.mxu0 %v5199_v31 }
 0x1f0   : > { %v1051_v43 = vmul.f32 %v3968_v16, %v1041_v41  ;;  %v1060_v23 = vadd.f32 %v3969_v30, %v1050_v42 }
 0x1f2   : > { %v1061_v45 = vadd.f32 %v3969_v30, %v1051_v43 }
 0x1f3   : > { %v5051_v46 = vpop.eup %5050 }
 0x1f4   : > { %v5532_v48 = vpack.c.bf16 %v1061_v45, %v1060_v23  ;;  %v958_v49 = vmul.f32 %v5051_v46, %v946_v44 }
 0x1f5   : > { %v5053_v50 = vpop.eup %5052 }
 0x1f6   : > { %4362 = vmatpush3.bf16.xpose.msra.mxu0 %v5532_v48  ;;  %v959_v51 = vmul.f32 %v5053_v50, %v947_v47  ;;  %v968_v52 = vmul.f32 %v5529_v24, %v958_v49  ;;  %v5580_v47 = vld [vmem:[%s5943_s12] ss:$0 sm:$0xff] }
 0x1f7   : > { %4383 = vmatprep.subr.bf16.mxu0 %v5199_v31 }
 0x1f8   : > { %v969_v53 = vmul.f32 %v5529_v24, %v959_v51  ;;  %v978_v28 = vadd.f32 %v5539_v26, %v968_v52 }
 0x1fa   : > { %v979_v54 = vadd.f32 %v5539_v26, %v969_v53 }
 0x1fc   : > { %v982_v55 = vpack.c.bf16 %v979_v54, %v978_v28  ;;  %v5587_v28 = vld [vmem:[%s5944_s13] ss:$0 sm:$0xff] }
 0x1fe   : > { %4364 = vmatmul.mubr.bf16.vlgmr.msra.gmra.mrb[4].mxu0 %v982_v55 }
 0x1ff   : > { %4387 = vmatprep.mubr.msk.bf16.mxu0 %vm5200_vm3, %v5199_v31  ;;  %4384 = vmatpush3.bf16.msra.mxu0 %v4894_v4 }
 0x200   : > { %4385 = vmatprep.subr.bf16.mxu0 %v5199_v31 }
 0x203   : > { %4386 = vmatpush3.bf16.msra.mxu0 %v4895_v5 }
 0x2d1   : > { %v5547_v56 = vpop.f32.mrb[4].mxu0 }
 0x2d2   : > { %v4365_v57 = vpop.f32.mrb[5].mxu0  ;;  %v1116_v58 = vsel %vm1115_vm4, %v5547_v56, 0.0  ;;  %v1122_v59 = vmul.f32 %v5547_v56, %v5547_v56 }
 0x2d3   : > { %1117 = vadd.xlane.f32.xlu0 %v1116_v58  ;;  %v5553_v60 = vpop.f32.mrb[6].mxu0 }
 0x2d4   : > { %v4366_v61 = vpop.f32.mrb[7].mxu0  ;;  %v1119_v62 = vsel %vm1115_vm4, %v5553_v60, 0.0  ;;  %v1123_v63 = vmul.f32 %v5553_v60, %v5553_v60  ;;  %v1124_v0 = vsel %vm1115_vm4, %v1122_v59, 0.0 }
 0x2d5   : > { %1120 = vadd.xlane.f32.xlu1 %v1119_v62 }
 0x2d6   : > { %v1127_v1 = vsel %vm1115_vm4, %v1123_v63, 0.0 }
 0x2d7   : > { %1125 = vadd.xlane.f32.xlu0 %v1124_v0 }
 0x2d9   : > { %1128 = vadd.xlane.f32.xlu1 %v1127_v1 }
 0x2db   : > { %910 = vadd.xlane.f32.xlu0 %v5469_v15 }
 0x2dd   : > { %912 = vadd.xlane.f32.xlu1 %v5476_v20 }
 0x2df   : > { %922 = vadd.xlane.f32.xlu0 %v916_v2 }
 0x2e1   : > { %924 = vadd.xlane.f32.xlu1 %v917_v3 }
 0x360   : > { %v1118_v6 = vpop.xlane.xlu0 %1117 }
 0x361   : > { %v1130_v7 = vmul.f32 0.03125, %v1118_v6 }
 0x362   : > { %v1121_v8 = vpop.xlane.xlu1 %1120 }
 0x363   : > { %v1131_v9 = vmul.f32 0.03125, %v1121_v8  ;;  %v1134_v12 = vmul.f32 %v1130_v7, %v1130_v7  ;;  %v1140_v45 = vsub.f32 %v5547_v56, %v1130_v7 }
 0x364   : > { %v1126_v10 = vpop.xlane.xlu0 %1125 }
 0x365   : > { %v1132_v13 = vmul.f32 0.03125, %v1126_v10  ;;  %v1135_v16 = vmul.f32 %v1131_v9, %v1131_v9  ;;  %v1141_v49 = vsub.f32 %v5553_v60, %v1131_v9 }
 0x366   : > { %v1129_v14 = vpop.xlane.xlu1 %1128 }
 0x367   : > { %v1136_v18 = vsub.f32 %v1132_v13, %v1134_v12  ;;  %v1133_v11 = vmul.f32 0.03125, %v1129_v14 }
 0x368   : > { %v911_v19 = vpop.xlane.xlu0 %910 }
 0x369   : > { %v1138_v21 = vmax.f32 %v1136_v18, 0.0  ;;  %v1137_v22 = vsub.f32 %v1133_v11, %v1135_v16  ;;  %v928_v25 = vmul.f32 0.125, %v911_v19 }
 0x36a   : > { %v913_v27 = vpop.xlane.xlu1 %912 }
 0x36b   : > { %v1142_v29 = vadd.f32 1e-05, %v1138_v21  ;;  %v1139_v30 = vmax.f32 %v1137_v22, 0.0  ;;  %v929_v32 = vmul.f32 0.125, %v913_v27  ;;  %v936_v35 = vmul.f32 %v928_v25, %v928_v25  ;;  %v4896_v21 = vld [vmem:[#allocation4 + $0x40] sm:$0xff]  }
 0x36c   : > { %v923_v33 = vpop.xlane.xlu0 %922  ;;  %v948_v61 = vsub.f32 %v5469_v15, %v928_v25  ;;  %v5607_v15 = vld [vmem:[%s5946_s15] ss:$0 sm:$0xff]  ;;  %4391 = vmatprep.subr.bf16.mxu0 %v4896_v21 }
 0x36d   : > { %5054 = vrsqrt.f32 %v1142_v29  ;;  %v1143_v34 = vadd.f32 1e-05, %v1139_v30  ;;  %v932_v36 = vmul.f32 0.125, %v923_v33  ;;  %v937_v17 = vmul.f32 %v929_v32, %v929_v32 }
 0x36e   : > { %v925_v37 = vpop.xlane.xlu1 %924  ;;  %v949_v59 = vsub.f32 %v5476_v20, %v929_v32 }
 0x36f   : > { %5056 = vrsqrt.f32 %v1143_v34  ;;  %v940_v39 = vsub.f32 %v932_v36, %v936_v35  ;;  %v933_v40 = vmul.f32 0.125, %v925_v37 }
 0x371   : > { %v944_v41 = vmax.f32 %v940_v39, 0.0  ;;  %v941_v42 = vsub.f32 %v933_v40, %v937_v17 }
 0x373   : > { %v945_v43 = vmax.f32 %v941_v42, 0.0  ;;  %v952_v44 = vadd.f32 1e-05, %v944_v41 }
 0x375   : > { %v953_v23 = vadd.f32 1e-05, %v945_v43 }
 0x377   : > { %v5055_v46 = vpop.eup %5054  ;;  %5058 = vrsqrt.f32 %v953_v23 }
 0x378   : > { %v1146_v50 = vmul.f32 %v5055_v46, %v1140_v45  ;;  %5060 = vrsqrt.f32 %v952_v44 }
 0x379   : > { %v5057_v51 = vpop.eup %5056 }
 0x37a   : > { %v1147_v52 = vmul.f32 %v5057_v51, %v1141_v49  ;;  %v1154_v53 = vmul.f32 %v5580_v47, %v1146_v50 }
 0x37c   : > { %v1155_v54 = vmul.f32 %v5580_v47, %v1147_v52  ;;  %v1162_v55 = vadd.f32 %v5587_v28, %v1154_v53 }
 0x37e   : > { %v1163_v56 = vadd.f32 %v5587_v28, %v1155_v54 }
 0x380   : > { %v1164_v57 = vpack.c.bf16 %v1163_v56, %v1162_v55  ;;  %v4897_v55 = vld [vmem:[#allocation4 + $0x48] sm:$0xff]  }
 0x381   : > { %v5059_v58 = vpop.eup %5058 }
 0x382   : > { %4372 = vmatmul.mubr.msk.bf16.vlgmr.msra.gmra.mrb[4].mxu1 %vm1115_vm4, %v1164_v57  ;;  %v5061_v60 = vpop.eup %5060  ;;  %v961_v62 = vmul.f32 %v5059_v58, %v949_v59  ;;  %v4898_v57 = vld [vmem:[#allocation4 + $0x50] sm:$0xff]   ;;  %v4899_v58 = vld [vmem:[#allocation4 + $0x58] sm:$0xff]  }
 0x383   : > { %4376 = vmatpush3.bf16.xpose.msra.mxu1 %v5521_v38  ;;  %4379 = vmatprep.mubr.msk.bf16.mxu1 %vm5200_vm3, %v5199_v31  ;;  %v960_v63 = vmul.f32 %v5061_v60, %v948_v61  ;;  %v4902_v59 = vld [vmem:[#allocation4 + $0x70] sm:$0xff]   ;;  %v4903_v60 = vld [vmem:[#allocation4 + $0x78] sm:$0xff]   ;;  %v4904_v61 = vld [vmem:[#allocation4] sm:$0xff]  }
 0x384   : > { %4377 = vmatprep.subr.bf16.mxu1 %v5199_v31  ;;  %v971_v0 = vmul.f32 %v5529_v24, %v961_v62  ;;  %v1363_v62 = vlaneseq }
 0x385   : > { %v970_v1 = vmul.f32 %v5529_v24, %v960_v63 }
 0x386   : > { %v981_v20 = vadd.f32 %v5539_v26, %v971_v0  ;;  %v1364_v63 = vshrl.u32 %v1363_v62, 7 }
 0x387   : > { %v980_v2 = vadd.f32 %v5539_v26, %v970_v1 }
 0x388   : > { %v1365_v0 = vadd.s32 8, %v1364_v63  ;;  %v1372_v1 = vand.u32 7, %v1364_v63 }
 0x389   : > { %v983_v38 = vpack.c.bf16 %v981_v20, %v980_v2 }
 0x38a   : > { %v1379_v20 = vand.u32 7, %v1365_v0  ;;  %vm1416_vm5 = vcmp.gt.s32.totalorder %v1372_v1, 0  ;;  %vm1428_vm10 = vcmp.lt.s32.totalorder %v1372_v1, 7 }
 0x38b   : > { %4378 = vmatpush3.bf16.xpose.msra.mxu1 %v5532_v48  ;;  %v5629_v2 = vsel %vm1416_vm5, 1.0, %v5199_v31 }
 0x38c   : > { %vm1417_vm6 = vcmp.gt.s32.totalorder %v1379_v20, 0  ;;  %vm1429_vm8 = vcmp.lt.s32.totalorder %v1379_v20, 7 }
 0x392   : > { %4380 = vmatmul.mubr.bf16.vlgmr.msra.gmra.mrb[8].mxu1 %v983_v38  ;;  %v5632_v38 = vsel %vm1417_vm6, 1.0, %v5199_v31 }
 0x455   : > { %v1220_v3 = vpop.f32.mrb[4].mxu1 }
 0x456   : > { %v1221_v4 = vadd.f32 %v5607_v15, %v1220_v3  ;;  %v4373_v5 = vpop.f32.mrb[5].mxu1  ;;  %v1440_v3 = vld [vmem:[#allocation2 + $0x7] sm:$0xff] }
 0x457   : > { %v1223_v6 = vpop.f32.mrb[6].mxu1 }
 0x458   : > { %v5610_v7 = vmax.f32 %v1221_v4, 0.0  ;;  %v1224_v24 = vadd.f32 %v5607_v15, %v1223_v6  ;;  %v4374_v48 = vpop.f32.mrb[7].mxu1 }
 0x45a   : > { %1231 = vst [vmem:[#allocation2 + $0x10] sm:$0xff] %v5610_v7  ;;  %v5614_v26 = vmax.f32 %v1224_v24, 0.0  ;;  %v1470_v56 = vpack.c.bf16 %v5610_v7, %v5199_v31 }
 0x45c   : > { %1232 = vst [vmem:[#allocation2 + $0x18] sm:$0xff] %v5614_v26 }
 0x461   : > { %v5634_v4 = vld [vmem:[#allocation2 + $0xf] sm:$0xff] }
 0x462   : > { %v1813_v0 = vmul.f32 %v5629_v2, %v5634_v4 }
 0x465   : > { %v1269_v8 = vpop.f32.mrb[8].mxu1 }
 0x466   : > { %v4381_v9 = vpop.f32.mrb[9].mxu1  ;;  %v1276_v10 = vsel %vm1115_vm4, %v1269_v8, 0.0  ;;  %v1282_v12 = vmul.f32 %v1269_v8, %v1269_v8 }
 0x467   : > { %1277 = vadd.xlane.f32.xlu0 %v1276_v10  ;;  %v1272_v13 = vpop.f32.mrb[10].mxu1  ;;  %v1445_v9 = vmul.f32 %v5632_v38, %v5634_v4  ;;  %v4926_v4 = vld [vmem:[#allocation4 + $0xf0] sm:$0xff]  }
 0x468   : > { %v4382_v14 = vpop.f32.mrb[11].mxu1  ;;  %v1279_v16 = vsel %vm1115_vm4, %v1272_v13, 0.0  ;;  %v1283_v18 = vmul.f32 %v1272_v13, %v1272_v13  ;;  %v1284_v11 = vsel %vm1115_vm4, %v1282_v12, 0.0 }
 0x469   : > { %1280 = vadd.xlane.f32.xlu1 %v1279_v16 }
 0x46a   : > { %v1287_v19 = vsel %vm1115_vm4, %v1283_v18, 0.0  ;;  %v4905_v18 = vld [vmem:[#allocation4 + $0x8] sm:$0xff]  }
 0x46b   : > { %1285 = vadd.xlane.f32.xlu0 %v1284_v11 }
 0x46d   : > { %1288 = vadd.xlane.f32.xlu1 %v1287_v19 }
 0x4f4   : > { %v1278_v22 = vpop.xlane.xlu0 %1277 }
 0x4f5   : > { %v1290_v25 = vmul.f32 0.03125, %v1278_v22  ;;  %v4908_v22 = vld [vmem:[#allocation4 + $0x20] sm:$0xff]  }
 0x4f6   : > { %v1281_v27 = vpop.xlane.xlu1 %1280 }
 0x4f7   : > { %v1291_v29 = vmul.f32 0.03125, %v1281_v27  ;;  %v1294_v32 = vmul.f32 %v1290_v25, %v1290_v25  ;;  %v1300_v43 = vsub.f32 %v1269_v8, %v1290_v25  ;;  %v5638_v8 = vmul.f32 %v5629_v2, %v1440_v3  ;;  %v4909_v27 = vld [vmem:[#allocation4 + $0x28] sm:$0xff]   ;;  %v4922_v3 = vld [vmem:[#allocation4 + $0xd0] sm:$0xff]  }
 0x4f8   : > { %v1286_v30 = vpop.xlane.xlu0 %1285  ;;  %v1367_v25 = vadd.s32 24, %v1364_v63 }
 0x4f9   : > { %v1292_v33 = vmul.f32 0.03125, %v1286_v30  ;;  %v1295_v35 = vmul.f32 %v1291_v29, %v1291_v29  ;;  %v1301_v23 = vsub.f32 %v1272_v13, %v1291_v29  ;;  %v1448_v11 = vpack.c.bf16 %v1445_v9, %v5638_v8 }
 0x4fa   : > { %v1289_v34 = vpop.xlane.xlu1 %1288  ;;  %v1366_v29 = vadd.s32 16, %v1364_v63  ;;  %v1393_v30 = vand.u32 7, %v1367_v25  ;;  %v4931_v25 = vld [vmem:[#allocation4 + $0x118] sm:$0xff]  }
 0x4fb   : > { %v1296_v36 = vsub.f32 %v1292_v33, %v1294_v32  ;;  %v1293_v37 = vmul.f32 0.03125, %v1289_v34  ;;  %v4910_v32 = vld [vmem:[#allocation4 + $0x30] sm:$0xff]   ;;  %v4911_v34 = vld [vmem:[#allocation4 + $0x38] sm:$0xff]  }
 0x4fc   : > { %v1386_v33 = vand.u32 7, %v1366_v29  ;;  %vm1419_vm7 = vcmp.gt.s32.totalorder %v1393_v30, 0  ;;  %vm1431_vm11 = vcmp.lt.s32.totalorder %v1393_v30, 7  ;;  %v4933_v29 = vld [vmem:[#allocation4 + $0x128] sm:$0xff]   ;;  %v4934_v30 = vld [vmem:[#allocation4 + $0x130] sm:$0xff]  }
 0x4fd   : > { %v1298_v17 = vmax.f32 %v1296_v36, 0.0  ;;  %v1297_v39 = vsub.f32 %v1293_v37, %v1295_v35  ;;  %v5658_v35 = vsel %vm1419_vm7, 1.0, %v5199_v31  ;;  %v5663_v37 = vsel %vm1429_vm8, 1.0, %v5199_v31 }
 0x4fe   : > { %vm1418_vm9 = vcmp.gt.s32.totalorder %v1386_v33, 0  ;;  %vm1430_vm12 = vcmp.lt.s32.totalorder %v1386_v33, 7 }
 0x4ff   : > { %v1302_v40 = vadd.f32 1e-05, %v1298_v17  ;;  %v1299_v41 = vmax.f32 %v1297_v39, 0.0  ;;  %v5665_v17 = vld [vmem:[#allocation2 + $0x11] sm:$0xff]  ;;  %v5668_v39 = vsel %vm1418_vm9, 1.0, %v5199_v31 }
 0x501   : > { %5062 = vrsqrt.f32 %v1302_v40  ;;  %v1303_v42 = vadd.f32 1e-05, %v1299_v41  ;;  %v5670_v40 = vld [vmem:[#allocation2 + $0x17] sm:$0xff] }
 0x502   : > { %v1814_v62 = vmul.f32 %v5632_v38, %v5670_v40 }
 0x503   : > { %5064 = vrsqrt.f32 %v1303_v42  ;;  %v4912_v42 = vld [vmem:[#allocation4 + $0x80] sm:$0xff]  }
 0x504   : > { %v1817_v20 = vpack.c.bf16 %v1814_v62, %v1813_v0  ;;  %v4946_v62 = vld [vmem:[#allocation4 + $0x190] sm:$0xff]   ;;  %v4948_v0 = vld [vmem:[#allocation4 + $0x1a0] sm:$0xff]  }
 0x50b   : > { %v5063_v44 = vpop.eup %5062 }
 0x50c   : > { %v1306_v45 = vmul.f32 %v5063_v44, %v1300_v43  ;;  %v5675_v43 = vsel %vm1428_vm10, 1.0, %v5199_v31  ;;  %v1682_v44 = vld [vmem:[#allocation2 + $0x9] sm:$0xff] }
 0x50d   : > { %v5065_v46 = vpop.eup %5064  ;;  %v2063_v33 = vmul.f32 %v5675_v43, %v5665_v17 }
 0x50e   : > { %v1307_v49 = vmul.f32 %v5065_v46, %v1301_v23  ;;  %v1308_v50 = vmul.f32 %v5580_v47, %v1306_v45  ;;  %v1687_v23 = vmul.f32 %v5663_v37, %v5665_v17  ;;  %v1446_v45 = vmul.f32 %v5668_v39, %v5670_v40  ;;  %v4939_v17 = vld [vmem:[#allocation4 + $0x158] sm:$0xff]  }
 0x50f   : > { %v1686_v46 = vmul.f32 %v5675_v43, %v1682_v44  ;;  %v4969_v44 = vld [vmem:[#allocation7 + $0x48] sm:$0xff]  }
 0x510   : > { %v1309_v51 = vmul.f32 %v5580_v47, %v1307_v49  ;;  %v1310_v52 = vadd.f32 %v5587_v28, %v1308_v50  ;;  %v4900_v47 = vld [vmem:[#allocation4 + $0x60] sm:$0xff]   ;;  %v4913_v50 = vld [vmem:[#allocation4 + $0x88] sm:$0xff]  }
 0x512   : > { %v1311_v53 = vadd.f32 %v5587_v28, %v1309_v51  ;;  %v4901_v28 = vld [vmem:[#allocation4 + $0x68] sm:$0xff]   ;;  %v1690_v51 = vpack.c.bf16 %v1687_v23, %v1686_v46  ;;  %v4938_v23 = vld [vmem:[#allocation4 + $0x150] sm:$0xff]   ;;  %v4971_v46 = vld [vmem:[#allocation7 + $0x58] sm:$0xff]  }
 0x514   : > { %v1312_v54 = vpack.c.bf16 %v1311_v53, %v1310_v52  ;;  %v4914_v52 = vld [vmem:[#allocation4 + $0x90] sm:$0xff]   ;;  %v4915_v53 = vld [vmem:[#allocation4 + $0x98] sm:$0xff]  }
 0x516   : > { %4388 = vmatmul.mubr.msk.bf16.vlgmr.msra.gmra.mrb[8].mxu0 %vm1115_vm4, %v1312_v54  ;;  %v4916_v54 = vld [vmem:[#allocation4 + $0xa0] sm:$0xff]  }
 0x517   : > { %4407 = vmatprep.mubr.bf16.mxu0 %v1470_v56  ;;  %4392 = vmatpush3.bf16.msra.mxu0 %v4896_v21  ;;  %v4907_v21 = vld [vmem:[#allocation4 + $0x18] sm:$0xff]   ;;  %v4918_v56 = vld [vmem:[#allocation4 + $0xb0] sm:$0xff]  }
 0x518   : > { %4393 = vmatprep.subr.bf16.mxu0 %v4897_v55 }
 0x51b   : > { %4394 = vmatpush3.bf16.msra.mxu0 %v4897_v55  ;;  %v4917_v55 = vld [vmem:[#allocation4 + $0xa8] sm:$0xff]  }
 0x51c   : > { %4395 = vmatprep.subr.bf16.mxu0 %v4898_v57 }
 0x51f   : > { %4396 = vmatpush3.bf16.msra.mxu0 %v4898_v57  ;;  %v4919_v57 = vld [vmem:[#allocation4 + $0xb8] sm:$0xff]  }
 0x520   : > { %4397 = vmatprep.subr.bf16.mxu0 %v4899_v58 }
 0x523   : > { %4398 = vmatpush3.bf16.msra.mxu0 %v4899_v58  ;;  %v5683_v58 = vsel %vm1431_vm11, 1.0, %v5199_v31 }
 0x524   : > { %4399 = vmatprep.subr.bf16.mxu0 %v4900_v47 }
 0x527   : > { %4400 = vmatpush3.bf16.msra.mxu0 %v4900_v47 }
 0x528   : > { %4401 = vmatprep.subr.bf16.mxu0 %v4901_v28 }
 0x52b   : > { %4402 = vmatpush3.bf16.msra.mxu0 %v4901_v28  ;;  %v5688_v28 = vsel %vm1430_vm12, 1.0, %v5199_v31  ;;  %v4921_v31 = vld [vmem:[#allocation4 + $0xc8] sm:$0xff]  }
 0x52c   : > { %4403 = vmatprep.subr.bf16.mxu0 %v4902_v59 }
 0x52f   : > { %4404 = vmatpush3.bf16.msra.mxu0 %v4902_v59 }
 0x530   : > { %4405 = vmatprep.subr.bf16.mxu0 %v4903_v60 }
 0x533   : > { %4406 = vmatpush3.bf16.msra.mxu0 %v4903_v60 }
 0x534   : > { %4411 = vmatprep.subr.bf16.mxu0 %v4904_v61 }
 0x5e9   : > { %v1350_v5 = vpop.f32.mrb[8].mxu0 }
 0x5ea   : > { %v1351_v6 = vadd.f32 %v5607_v15, %v1350_v5  ;;  %v4389_v24 = vpop.f32.mrb[9].mxu0  ;;  %v4923_v5 = vld [vmem:[#allocation4 + $0xd8] sm:$0xff]  }
 0x5eb   : > { %v1353_v48 = vpop.f32.mrb[10].mxu0  ;;  %v4925_v24 = vld [vmem:[#allocation4 + $0xe8] sm:$0xff]  }
 0x5ec   : > { %v5642_v10 = vmax.f32 %v1351_v6, 0.0  ;;  %v1354_v12 = vadd.f32 %v5607_v15, %v1353_v48  ;;  %v4390_v13 = vpop.f32.mrb[11].mxu0  ;;  %v4906_v15 = vld [vmem:[#allocation4 + $0x10] sm:$0xff]   ;;  %v4924_v6 = vld [vmem:[#allocation4 + $0xe0] sm:$0xff]   ;;  %v4927_v48 = vld [vmem:[#allocation4 + $0xf8] sm:$0xff]  }
 0x5ed   : > { %v4928_v13 = vld [vmem:[#allocation4 + $0x100] sm:$0xff]  }
 0x5ee   : > { %1361 = vst [vmem:[#allocation2 + $0x20] sm:$0xff] %v5642_v10  ;;  %v5646_v14 = vmax.f32 %v1354_v12, 0.0  ;;  %v5650_v16 = vpack.c.bf16 %v5642_v10, %v5614_v26 }
 0x5f0   : > { %1362 = vst [vmem:[#allocation2 + $0x28] sm:$0xff] %v5646_v14  ;;  %4408 = vmatmul.mubr.bf16.vlgmr.msra.gmra.mrb[12].mxu0 %v5650_v16  ;;  %v1941_v19 = vpack.c.bf16 %v5646_v14, %v5642_v10  ;;  %v4940_v10 = vld [vmem:[#allocation4 + $0x160] sm:$0xff]  }
 0x5f1   : > { %4412 = vmatpush3.bf16.msra.mxu0 %v4904_v61  ;;  %4427 = vmatprep.mubr.bf16.mxu0 %v1448_v11  ;;  %v4920_v61 = vld [vmem:[#allocation4 + $0xc0] sm:$0xff]  }
 0x5f2   : > { %4413 = vmatprep.subr.bf16.mxu0 %v4905_v18 }
 0x5f5   : > { %4414 = vmatpush3.bf16.msra.mxu0 %v4905_v18  ;;  %v5660_v36 = vld [vmem:[#allocation2 + $0x1f] sm:$0xff] }
 0x5f6   : > { %4415 = vmatprep.subr.bf16.mxu0 %v4906_v15  ;;  %v1447_v41 = vmul.f32 %v5658_v35, %v5660_v36  ;;  %v5690_v59 = vld [vmem:[#allocation2 + $0x19] sm:$0xff]  ;;  %v1815_v18 = vmul.f32 %v5668_v39, %v5660_v36 }
 0x5f7   : > { %v5685_v47 = vld [vmem:[#allocation2 + $0x21] sm:$0xff]  ;;  %v1688_v63 = vmul.f32 %v5688_v28, %v5690_v59 }
 0x5f8   : > { %v1449_v49 = vpack.c.bf16 %v1447_v41, %v1446_v45  ;;  %v1689_v60 = vmul.f32 %v5683_v58, %v5685_v47  ;;  %v5700_v9 = vld [vmem:[#allocation2 + $0x27] sm:$0xff]  ;;  %v4970_v45 = vld [vmem:[#allocation7 + $0x50] sm:$0xff]  }
 0x5f9   : > { %4416 = vmatpush3.bf16.msra.mxu0 %v4906_v15  ;;  %v1816_v12 = vmul.f32 %v5658_v35, %v5700_v9  ;;  %v4929_v15 = vld [vmem:[#allocation4 + $0x108] sm:$0xff]  }
 0x5fa   : > { %4417 = vmatprep.subr.bf16.mxu0 %v4907_v21  ;;  %v1691_v1 = vpack.c.bf16 %v1689_v60, %v1688_v63  ;;  %v4945_v60 = vld [vmem:[#allocation4 + $0x188] sm:$0xff]   ;;  %v4947_v63 = vld [vmem:[#allocation4 + $0x198] sm:$0xff]  }
 0x5fb   : > { %v1818_v11 = vpack.c.bf16 %v1816_v12, %v1815_v18  ;;  %v4956_v12 = vld [vmem:[#allocation4 + $0x1e0] sm:$0xff]   ;;  %v4959_v18 = vld [vmem:[#allocation4 + $0x1f8] sm:$0xff]  }
 0x5fd   : > { %4418 = vmatpush3.bf16.msra.mxu0 %v4907_v21  ;;  %v1940_v21 = vpack.c.bf16 %v5614_v26, %v5610_v7  ;;  %v4935_v7 = vld [vmem:[#allocation4 + $0x138] sm:$0xff]   ;;  %v4936_v26 = vld [vmem:[#allocation4 + $0x140] sm:$0xff]  }
 0x5fe   : > { %4419 = vmatprep.subr.bf16.mxu0 %v4908_v22 }
 0x601   : > { %4420 = vmatpush3.bf16.msra.mxu0 %v4908_v22  ;;  %v4930_v22 = vld [vmem:[#allocation4 + $0x110] sm:$0xff]  }
 0x602   : > { %4421 = vmatprep.subr.bf16.mxu0 %v4909_v27 }
 0x605   : > { %4422 = vmatpush3.bf16.msra.mxu0 %v4909_v27  ;;  %v4932_v27 = vld [vmem:[#allocation4 + $0x120] sm:$0xff]  }
 0x606   : > { %4423 = vmatprep.subr.bf16.mxu0 %v4910_v32 }
 0x609   : > { %4424 = vmatpush3.bf16.msra.mxu0 %v4910_v32  ;;  %v2064_v32 = vmul.f32 %v5663_v37, %v5690_v59 }
 0x60a   : > { %4425 = vmatprep.subr.bf16.mxu0 %v4911_v34 }
 0x60b   : > { %v2067_v41 = vpack.c.bf16 %v2064_v32, %v2063_v33 }
 0x60d   : > { %4426 = vmatpush3.bf16.msra.mxu0 %v4911_v34  ;;  %v4937_v34 = vld [vmem:[#allocation4 + $0x148] sm:$0xff]  }
 0x60e   : > { %4431 = vmatprep.subr.bf16.mxu0 %v4912_v42 }
 0x610   : > { %4428 = vmatmul.mubr.bf16.vlgmr.msra.gmra.mrb[12].mxu0 %v1449_v49  ;;  %v4942_v49 = vld [vmem:[#allocation4 + $0x170] sm:$0xff]  }
 0x611   : > { %4432 = vmatpush3.bf16.msra.mxu0 %v4912_v42  ;;  %4447 = vmatprep.mubr.bf16.mxu0 %v1690_v51  ;;  %v4968_v42 = vld [vmem:[#allocation7 + $0x40] sm:$0xff]   ;;  %v5715_v51 = vld [vmem:[#allocation2 + $0x29] sm:$0xff] }
 0x612   : > { %4433 = vmatprep.subr.bf16.mxu0 %v4913_v50  ;;  %4571 = vmatprep.subr.bf16.mxu1 %v4968_v42  ;;  %v2442_v32 = vmul.f32 %v5688_v28, %v5715_v51 }
 0x613   : > { %4572 = vmatpush3.bf16.msra.mxu1 %v4968_v42  ;;  %v4973_v42 = vld [vmem:[#allocation7 + $0x68] sm:$0xff]  }
 0x614   : > { %4573 = vmatprep.subr.bf16.mxu1 %v4969_v44 }
 0x615   : > { %4434 = vmatpush3.bf16.msra.mxu0 %v4913_v50  ;;  %v4943_v50 = vld [vmem:[#allocation4 + $0x178] sm:$0xff]  }
 0x616   : > { %4435 = vmatprep.subr.bf16.mxu0 %v4914_v52 }
 0x617   : > { %4574 = vmatpush3.bf16.msra.mxu1 %v4969_v44  ;;  %v4974_v44 = vld [vmem:[#allocation7 + $0x70] sm:$0xff]  }
 0x618   : > { %4575 = vmatprep.subr.bf16.mxu1 %v4970_v45 }
 0x619   : > { %4436 = vmatpush3.bf16.msra.mxu0 %v4914_v52  ;;  %v2065_v52 = vmul.f32 %v5688_v28, %v5685_v47 }
 0x61a   : > { %4437 = vmatprep.subr.bf16.mxu0 %v4915_v53 }
 0x61b   : > { %4576 = vmatpush3.bf16.msra.mxu1 %v4970_v45  ;;  %v4976_v45 = vld [vmem:[#allocation7] sm:$0xff]  }
 0x61c   : > { %4577 = vmatprep.subr.bf16.mxu1 %v4971_v46 }
 0x61d   : > { %4438 = vmatpush3.bf16.msra.mxu0 %v4915_v53  ;;  %v2066_v53 = vmul.f32 %v5683_v58, %v5715_v51 }
 0x61e   : > { %4439 = vmatprep.subr.bf16.mxu0 %v4916_v54 }
 0x61f   : > { %4578 = vmatpush3.bf16.msra.mxu1 %v4971_v46 }
 0x621   : > { %4440 = vmatpush3.bf16.msra.mxu0 %v4916_v54  ;;  %v4944_v54 = vld [vmem:[#allocation4 + $0x180] sm:$0xff]  }
 0x622   : > { %4441 = vmatprep.subr.bf16.mxu0 %v4917_v55 }
 0x625   : > { %4442 = vmatpush3.bf16.msra.mxu0 %v4917_v55  ;;  %v2191_v55 = vmul.f32 %v5632_v38, %v5660_v36  ;;  %v4949_v36 = vld [vmem:[#allocation4 + $0x1a8] sm:$0xff]  }
 0x626   : > { %4443 = vmatprep.subr.bf16.mxu0 %v4918_v56 }
 0x629   : > { %4444 = vmatpush3.bf16.msra.mxu0 %v4918_v56  ;;  %v2190_v56 = vmul.f32 %v5629_v2, %v5670_v40  ;;  %v4950_v40 = vld [vmem:[#allocation4 + $0x1b0] sm:$0xff]  }
 0x62a   : > { %4445 = vmatprep.subr.bf16.mxu0 %v4919_v57 }
 0x62d   : > { %4446 = vmatpush3.bf16.msra.mxu0 %v4919_v57  ;;  %v2068_v57 = vpack.c.bf16 %v2066_v53, %v2065_v52 }
 0x62e   : > { %4451 = vmatprep.subr.bf16.mxu0 %v4920_v61 }
 0x630   : > { %4448 = vmatmul.mubr.bf16.vlgmr.msra.gmra.mrb[12].mxu0 %v1691_v1  ;;  %v4951_v1 = vld [vmem:[#allocation4 + $0x1b8] sm:$0xff]  }
 0x631   : > { %4452 = vmatpush3.bf16.msra.mxu0 %v4920_v61  ;;  %4467 = vmatprep.mubr.bf16.mxu0 %v1817_v20  ;;  %v2194_v61 = vpack.c.bf16 %v2191_v55, %v2190_v56  ;;  %v2192_v20 = vmul.f32 %v5668_v39, %v5700_v9  ;;  %v4957_v9 = vld [vmem:[#allocation4 + $0x1e8] sm:$0xff]  }
 0x632   : > { %4453 = vmatprep.subr.bf16.mxu0 %v4921_v31 }
 0x635   : > { %4454 = vmatpush3.bf16.msra.mxu0 %v4921_v31  ;;  %v2189_v31 = vld [vmem:[#allocation2 + $0x2f] sm:$0xff] }
 0x636   : > { %4455 = vmatprep.subr.bf16.mxu0 %v4922_v3 }
 0x639   : > { %4456 = vmatpush3.bf16.msra.mxu0 %v4922_v3  ;;  %v2193_v3 = vmul.f32 %v5658_v35, %v2189_v31  ;;  %v4977_v31 = vld [vmem:[#allocation7 + $0x8] sm:$0xff]  }
 0x63a   : > { %4457 = vmatprep.subr.bf16.mxu0 %v4923_v5 }
 0x63d   : > { %4458 = vmatpush3.bf16.msra.mxu0 %v4923_v5  ;;  %v4952_v5 = vld [vmem:[#allocation4 + $0x1c0] sm:$0xff]  }
 0x63e   : > { %4459 = vmatprep.subr.bf16.mxu0 %v4924_v6 }
 0x641   : > { %4460 = vmatpush3.bf16.msra.mxu0 %v4924_v6  ;;  %v2195_v6 = vpack.c.bf16 %v2193_v3, %v2192_v20  ;;  %v4978_v3 = vld [vmem:[#allocation7 + $0x10] sm:$0xff]  }
 0x642   : > { %4461 = vmatprep.subr.bf16.mxu0 %v4925_v24 }
 0x645   : > { %4462 = vmatpush3.bf16.msra.mxu0 %v4925_v24  ;;  %v4953_v24 = vld [vmem:[#allocation4 + $0x1c8] sm:$0xff]  }
 0x646   : > { %4463 = vmatprep.subr.bf16.mxu0 %v4926_v4 }
 0x649   : > { %4464 = vmatpush3.bf16.msra.mxu0 %v4926_v4  ;;  %v4954_v4 = vld [vmem:[#allocation4 + $0x1d0] sm:$0xff]  }
 0x64a   : > { %4465 = vmatprep.subr.bf16.mxu0 %v4927_v48 }
 0x64d   : > { %4466 = vmatpush3.bf16.msra.mxu0 %v4927_v48  ;;  %v4955_v48 = vld [vmem:[#allocation4 + $0x1d8] sm:$0xff]  }
 0x64e   : > { %4471 = vmatprep.subr.bf16.mxu0 %v4928_v13 }
 0x650   : > { %4468 = vmatmul.mubr.bf16.vlgmr.msra.gmra.mrb[12].mxu0 %v1818_v11  ;;  %v2441_v11 = vmul.f32 %v5663_v37, %v5685_v47  ;;  %v4963_v47 = vld [vmem:[#allocation4 + $0x218] sm:$0xff]  }
 0x651   : > { %4472 = vmatpush3.bf16.msra.mxu0 %v4928_v13  ;;  %4487 = vmatprep.mubr.bf16.mxu0 %v1940_v21  ;;  %v4958_v13 = vld [vmem:[#allocation4 + $0x1f0] sm:$0xff]   ;;  %v5733_v21 = vld [vmem:[#allocation2] sm:$0xff] }
 0x652   : > { %4473 = vmatprep.subr.bf16.mxu0 %v4929_v15 }
 0x655   : > { %4474 = vmatpush3.bf16.msra.mxu0 %v4929_v15  ;;  %v2440_v15 = vmul.f32 %v5675_v43, %v5690_v59  ;;  %v4965_v59 = vld [vmem:[#allocation4 + $0x228] sm:$0xff]  }
 0x656   : > { %4475 = vmatprep.subr.bf16.mxu0 %v4930_v22 }
 0x659   : > { %4476 = vmatpush3.bf16.msra.mxu0 %v4930_v22  ;;  %v2318_v22 = vpack.c.bf16 %v5733_v21, %v5646_v14  ;;  %v4966_v14 = vld [vmem:[#allocation4 + $0x230] sm:$0xff]  }
 0x65a   : > { %4477 = vmatprep.subr.bf16.mxu0 %v4931_v25 }
 0x65d   : > { %4478 = vmatpush3.bf16.msra.mxu0 %v4931_v25  ;;  %v4961_v25 = vld [vmem:[#allocation4 + $0x208] sm:$0xff]  }
 0x65e   : > { %4479 = vmatprep.subr.bf16.mxu0 %v4932_v27 }
 0x661   : > { %4480 = vmatpush3.bf16.msra.mxu0 %v4932_v27  ;;  %v2444_v27 = vpack.c.bf16 %v2441_v11, %v2440_v15  ;;  %v4980_v15 = vld [vmem:[#allocation7 + $0x20] sm:$0xff]  }
 0x662   : > { %4481 = vmatprep.subr.bf16.mxu0 %v4933_v29 }
 0x665   : > { %4482 = vmatpush3.bf16.msra.mxu0 %v4933_v29  ;;  %v4962_v29 = vld [vmem:[#allocation4 + $0x210] sm:$0xff]  }
 0x666   : > { %4483 = vmatprep.subr.bf16.mxu0 %v4934_v30 }
 0x669   : > { %4484 = vmatpush3.bf16.msra.mxu0 %v4934_v30  ;;  %v4964_v30 = vld [vmem:[#allocation4 + $0x220] sm:$0xff]  }
 0x66a   : > { %4485 = vmatprep.subr.bf16.mxu0 %v4935_v7 }
 0x66d   : > { %4486 = vmatpush3.bf16.msra.mxu0 %v4935_v7  ;;  %v4967_v7 = vld [vmem:[#allocation4 + $0x238] sm:$0xff]  }
 0x66e   : > { %4491 = vmatprep.subr.bf16.mxu0 %v4936_v26 }
 0x670   : > { %4488 = vmatmul.mubr.bf16.vlgmr.msra.gmra.mrb[12].mxu0 %v1941_v19  ;;  %v4941_v19 = vld [vmem:[#allocation4 + $0x168] sm:$0xff]  }
 0x671   : > { %4492 = vmatpush3.bf16.msra.mxu0 %v4936_v26  ;;  %4507 = vmatprep.mubr.bf16.mxu0 %v2067_v41  ;;  %v2439_v26 = vld [vmem:[#allocation2 + $0x31] sm:$0xff]  ;;  %v4972_v41 = vld [vmem:[#allocation7 + $0x60] sm:$0xff]  }
 0x672   : > { %4493 = vmatprep.subr.bf16.mxu0 %v4937_v34  ;;  %v5740_v33 = vmul.f32 %v5683_v58, %v2439_v26  ;;  %4579 = vmatprep.subr.bf16.mxu1 %v4972_v41 }
 0x673   : > { %4580 = vmatpush3.bf16.msra.mxu1 %v4972_v41 }
 0x674   : > { %4581 = vmatprep.subr.bf16.mxu1 %v4973_v42 }
 0x675   : > { %4494 = vmatpush3.bf16.msra.mxu0 %v4937_v34  ;;  %v2445_v34 = vpack.c.bf16 %v5740_v33, %v2442_v32 }
 0x676   : > { %4495 = vmatprep.subr.bf16.mxu0 %v4938_v23 }
 0x677   : > { %4582 = vmatpush3.bf16.msra.mxu1 %v4973_v42 }
 0x678   : > { %4583 = vmatprep.subr.bf16.mxu1 %v4974_v44 }
 0x679   : > { %4496 = vmatpush3.bf16.msra.mxu0 %v4938_v23  ;;  %v4975_v23 = vld [vmem:[#allocation7 + $0x78] sm:$0xff]  }
 0x67a   : > { %4497 = vmatprep.subr.bf16.mxu0 %v4939_v17 }
 0x67b   : > { %4584 = vmatpush3.bf16.msra.mxu1 %v4974_v44 }
 0x67c   : > { %4585 = vmatprep.subr.bf16.mxu1 %v4975_v23 }
 0x67d   : > { %4498 = vmatpush3.bf16.msra.mxu0 %v4939_v17  ;;  %v4057_v17 = vld [vmem:[%s5948_s17] ss:$0 sm:$0xff] }
 0x67e   : > { %4499 = vmatprep.subr.bf16.mxu0 %v4940_v10 }
 0x67f   : > { %4586 = vmatpush3.bf16.msra.mxu1 %v4975_v23 }
 0x680   : > { %4591 = vmatprep.subr.bf16.mxu1 %v4976_v45 }
 0x681   : > { %4500 = vmatpush3.bf16.msra.mxu0 %v4940_v10  ;;  %v4058_v10 = vld [vmem:[%s5949_s18] ss:$0 sm:$0xff] }
 0x682   : > { %4501 = vmatprep.subr.bf16.mxu0 %v4941_v19 }
 0x685   : > { %4502 = vmatpush3.bf16.msra.mxu0 %v4941_v19 }
 0x686   : > { %4503 = vmatprep.subr.bf16.mxu0 %v4942_v49 }
 0x689   : > { %4504 = vmatpush3.bf16.msra.mxu0 %v4942_v49 }
 0x68a   : > { %4505 = vmatprep.subr.bf16.mxu0 %v4943_v50 }
 0x68d   : > { %4506 = vmatpush3.bf16.msra.mxu0 %v4943_v50 }
 0x68e   : > { %4511 = vmatprep.subr.bf16.mxu0 %v4944_v54 }
 0x690   : > { %4508 = vmatmul.mubr.bf16.vlgmr.msra.gmra.mrb[12].mxu0 %v2068_v57 }
 0x691   : > { %4512 = vmatpush3.bf16.msra.mxu0 %v4944_v54  ;;  %4527 = vmatprep.mubr.bf16.mxu0 %v2194_v61 }
 0x692   : > { %4513 = vmatprep.subr.bf16.mxu0 %v4945_v60 }
 0x695   : > { %4514 = vmatpush3.bf16.msra.mxu0 %v4945_v60 }
 0x696   : > { %4515 = vmatprep.subr.bf16.mxu0 %v4946_v62 }
 0x699   : > { %4516 = vmatpush3.bf16.msra.mxu0 %v4946_v62 }
 0x69a   : > { %4517 = vmatprep.subr.bf16.mxu0 %v4947_v63 }
 0x69d   : > { %4518 = vmatpush3.bf16.msra.mxu0 %v4947_v63 }
 0x69e   : > { %4519 = vmatprep.subr.bf16.mxu0 %v4948_v0 }
 0x6a1   : > { %4520 = vmatpush3.bf16.msra.mxu0 %v4948_v0 }
 0x6a2   : > { %4521 = vmatprep.subr.bf16.mxu0 %v4949_v36 }
 0x6a5   : > { %4522 = vmatpush3.bf16.msra.mxu0 %v4949_v36 }
 0x6a6   : > { %4523 = vmatprep.subr.bf16.mxu0 %v4950_v40 }
 0x6a9   : > { %4524 = vmatpush3.bf16.msra.mxu0 %v4950_v40 }
 0x6aa   : > { %4525 = vmatprep.subr.bf16.mxu0 %v4951_v1 }
 0x6ad   : > { %4526 = vmatpush3.bf16.msra.mxu0 %v4951_v1 }
 0x6ae   : > { %4531 = vmatprep.subr.bf16.mxu0 %v4952_v5 }
 0x6b0   : > { %4528 = vmatmul.mubr.bf16.vlgmr.msra.gmra.mrb[12].mxu0 %v2195_v6 }
 0x6b1   : > { %4532 = vmatpush3.bf16.msra.mxu0 %v4952_v5  ;;  %4547 = vmatprep.mubr.bf16.mxu0 %v5650_v16  ;;  %v4960_v16 = vld [vmem:[#allocation4 + $0x200] sm:$0xff]  }
 0x6b2   : > { %4533 = vmatprep.subr.bf16.mxu0 %v4953_v24 }
 0x6b5   : > { %4534 = vmatpush3.bf16.msra.mxu0 %v4953_v24 }
 0x6b6   : > { %4535 = vmatprep.subr.bf16.mxu0 %v4954_v4 }
 0x6b9   : > { %4536 = vmatpush3.bf16.msra.mxu0 %v4954_v4 }
 0x6ba   : > { %4537 = vmatprep.subr.bf16.mxu0 %v4955_v48 }
 0x6bd   : > { %4538 = vmatpush3.bf16.msra.mxu0 %v4955_v48  ;;  %v4979_v48 = vld [vmem:[#allocation7 + $0x18] sm:$0xff]  }
 0x6be   : > { %4539 = vmatprep.subr.bf16.mxu0 %v4956_v12 }
 0x6c1   : > { %4540 = vmatpush3.bf16.msra.mxu0 %v4956_v12 }
 0x6c2   : > { %4541 = vmatprep.subr.bf16.mxu0 %v4957_v9 }
 0x6c5   : > { %4542 = vmatpush3.bf16.msra.mxu0 %v4957_v9 }
 0x6c6   : > { %4543 = vmatprep.subr.bf16.mxu0 %v4958_v13 }
 0x6c9   : > { %4544 = vmatpush3.bf16.msra.mxu0 %v4958_v13 }
 0x6ca   : > { %4545 = vmatprep.subr.bf16.mxu0 %v4959_v18 }
 0x6cd   : > { %4546 = vmatpush3.bf16.msra.mxu0 %v4959_v18 }
 0x6ce   : > { %4551 = vmatprep.subr.bf16.mxu0 %v4960_v16 }
 0x6d0   : > { %4548 = vmatmul.mubr.bf16.vlgmr.msra.gmra.mrb[12].mxu0 %v2318_v22 }
 0x6d1   : > { %4552 = vmatpush3.bf16.msra.mxu0 %v4960_v16  ;;  %4567 = vmatprep.mubr.bf16.mxu0 %v2444_v27 }
 0x6d2   : > { %4553 = vmatprep.subr.bf16.mxu0 %v4961_v25 }
 0x6d5   : > { %4554 = vmatpush3.bf16.msra.mxu0 %v4961_v25 }
 0x6d6   : > { %4555 = vmatprep.subr.bf16.mxu0 %v4962_v29 }
 0x6d9   : > { %4556 = vmatpush3.bf16.msra.mxu0 %v4962_v29 }
 0x6da   : > { %4557 = vmatprep.subr.bf16.mxu0 %v4963_v47 }
 0x6dd   : > { %4558 = vmatpush3.bf16.msra.mxu0 %v4963_v47 }
 0x6de   : > { %4559 = vmatprep.subr.bf16.mxu0 %v4964_v30 }
 0x6e1   : > { %4560 = vmatpush3.bf16.msra.mxu0 %v4964_v30 }
 0x6e2   : > { %4561 = vmatprep.subr.bf16.mxu0 %v4965_v59 }
 0x6e5   : > { %4562 = vmatpush3.bf16.msra.mxu0 %v4965_v59  ;;  %v4981_v59 = vld [vmem:[#allocation7 + $0x28] sm:$0xff]  }
 0x6e6   : > { %4563 = vmatprep.subr.bf16.mxu0 %v4966_v14 }
 0x6e9   : > { %4564 = vmatpush3.bf16.msra.mxu0 %v4966_v14  ;;  %v4982_v14 = vld [vmem:[#allocation7 + $0x30] sm:$0xff]  }
 0x6ea   : > { %4565 = vmatprep.subr.bf16.mxu0 %v4967_v7 }
 0x6ed   : > { %4566 = vmatpush3.bf16.msra.mxu0 %v4967_v7  ;;  %v4983_v7 = vld [vmem:[#allocation7 + $0x38] sm:$0xff]  }
 0x6f0   : > { %4568 = vmatmul.mubr.bf16.vlgmr.msra.gmra.mrb[12].mxu0 %v2445_v34  ;;  %v4984_v34 = vld [vmem:[#allocation7 + $0x80] sm:$0xff]  }
 0x7c3   : > { %v4569_v46 = vpop.f32.mrb[12].mxu0 }
 0x7c4   : > { %v2572_v19 = vmul.f32 %v4569_v46, %v4057_v17  ;;  %v2544_v49 = vpop.f32.mrb[13].mxu0  ;;  %v4986_v46 = vld [vmem:[#allocation7 + $0x90] sm:$0xff]  }
 0x7c5   : > { %v2570_v50 = vmul.f32 %v4057_v17, %v2544_v49  ;;  %v4570_v51 = vpop.f32.mrb[14].mxu0  ;;  %v4991_v49 = vld [vmem:[#allocation7 + $0xb8] sm:$0xff]  }
 0x7c6   : > { %v2583_v52 = vadd.f32 %v4058_v10, %v2572_v19  ;;  %v2573_v53 = vmul.f32 %v4570_v51, %v4057_v17  ;;  %v2547_v54 = vpop.f32.mrb[15].mxu0  ;;  %v4988_v19 = vld [vmem:[#allocation7 + $0xa0] sm:$0xff]  }
 0x7c7   : > { %v2581_v55 = vadd.f32 %v4058_v10, %v2570_v50  ;;  %v2571_v56 = vmul.f32 %v4057_v17, %v2547_v54 }
 0x7c8   : > { %v5749_v57 = vmax.f32 %v2583_v52, 0.0  ;;  %v2584_v60 = vadd.f32 %v4058_v10, %v2573_v53  ;;  %v4992_v52 = vld [vmem:[#allocation7 + $0xc0] sm:$0xff]  }
 0x7c9   : > { %v5751_v61 = vmax.f32 %v2581_v55, 0.0  ;;  %v2582_v62 = vadd.f32 %v4058_v10, %v2571_v56  ;;  %v4987_v10 = vld [vmem:[#allocation7 + $0x98] sm:$0xff]   ;;  %v4993_v56 = vld [vmem:[#allocation7 + $0xc8] sm:$0xff]  }
 0x7ca   : > { %2591 = vst [vmem:[#allocation2 + $0x20] sm:$0xff] %v5749_v57  ;;  %v5754_v63 = vmax.f32 %v2584_v60, 0.0 }
 0x7cb   : > { %2589 = vst [vmem:[#allocation2 + $0x10] sm:$0xff] %v5751_v61  ;;  %v5757_v0 = vmax.f32 %v2582_v62, 0.0  ;;  %v2623_v36 = vpack.c.bf16 %v5751_v61, %v5733_v21  ;;  %v4994_v62 = vld [vmem:[#allocation7 + $0xd0] sm:$0xff]  }
 0x7cc   : > { %2592 = vst [vmem:[#allocation2 + $0x28] sm:$0xff] %v5754_v63  ;;  %v3094_v40 = vpack.c.bf16 %v5754_v63, %v5749_v57 }
 0x7cd   : > { %2590 = vst [vmem:[#allocation2 + $0x18] sm:$0xff] %v5757_v0  ;;  %4587 = vmatprep.mubr.bf16.mxu1 %v2623_v36  ;;  %v5767_v1 = vpack.c.bf16 %v5749_v57, %v5757_v0  ;;  %v3093_v20 = vpack.c.bf16 %v5757_v0, %v5751_v61  ;;  %v4995_v36 = vld [vmem:[#allocation7 + $0xd8] sm:$0xff]   ;;  %v3742_v0 = vld [vmem:[%s5996_s5] sm:$0xf]  ;;  %v5014_v57 = vld [vmem:[#allocation7 + $0x170] sm:$0xff]  }
 0x7ce   : > { %v5007_v61 = vld [vmem:[#allocation7 + $0x138] sm:$0xff]   ;;  %4822 = vmatprep.subr.msk.bf16.mxu0 %vm766_vm1, %v3742_v0 }
 0x7cf   : > { %4588 = vmatmul.mubr.bf16.vlgmr.msra.gmra.mrb[12].mxu1 %v5767_v1 }
 0x7d0   : > { %4592 = vmatpush3.bf16.msra.mxu1 %v4976_v45  ;;  %v4985_v45 = vld [vmem:[#allocation7 + $0x88] sm:$0xff]  }
 0x7d1   : > { %4593 = vmatprep.subr.bf16.mxu1 %v4977_v31 }
 0x7d2   : > { %v5772_v5 = vld [vmem:[#allocation2 + $0xf] sm:$0xff] }
 0x7d3   : > { %v2598_v6 = vmul.f32 %v5632_v38, %v5772_v5  ;;  %v5784_v16 = vld [vmem:[#allocation2 + $0x21] sm:$0xff]  ;;  %v2835_v41 = vld [vmem:[#allocation2 + $0x9] sm:$0xff]  ;;  %v2966_v54 = vmul.f32 %v5629_v2, %v5772_v5 }
 0x7d4   : > { %4594 = vmatpush3.bf16.msra.mxu1 %v4977_v31  ;;  %v2836_v24 = vld [vmem:[#allocation2 + $0x11] sm:$0xff]  ;;  %v2837_v9 = vld [vmem:[#allocation2 + $0x19] sm:$0xff]  ;;  %v5804_v29 = vmul.f32 %v5663_v37, %v5784_v16  ;;  %v2839_v44 = vmul.f32 %v5675_v43, %v2835_v41  ;;  %v2842_v51 = vmul.f32 %v5683_v58, %v5784_v16  ;;  %v5823_v5 = vld [vmem:[#allocation2 + $0x27] sm:$0xff] }
 0x7d5   : > { %v2601_v4 = vpack.c.bf16 %v2598_v6, %v5638_v8  ;;  %4595 = vmatprep.subr.bf16.mxu1 %v4978_v3  ;;  %v5777_v12 = vld [vmem:[#allocation2 + $0x17] sm:$0xff]  ;;  %v5779_v13 = vld [vmem:[#allocation2 + $0x1f] sm:$0xff]  ;;  %v5782_v18 = vmul.f32 %v5675_v43, %v2836_v24  ;;  %v5787_v11 = vmul.f32 %v5663_v37, %v2837_v9  ;;  %v5800_v27 = vmul.f32 %v5675_v43, %v2837_v9 }
 0x7d6   : > { %v5791_v8 = vmul.f32 %v5629_v2, %v5777_v12  ;;  %v5797_v25 = vmul.f32 %v5632_v38, %v5779_v13  ;;  %v2599_v26 = vmul.f32 %v5668_v39, %v5777_v12  ;;  %v2600_v32 = vmul.f32 %v5658_v35, %v5779_v13  ;;  %v4990_v43 = vld [vmem:[#allocation7 + $0xb0] sm:$0xff]   ;;  %v4996_v31 = vld [vmem:[#allocation7 + $0xe0] sm:$0xff]  }
 0x7d7   : > { %4607 = vmatprep.mubr.bf16.mxu1 %v2601_v4  ;;  %v3220_v22 = vpack.c.bf16 %v5787_v11, %v5782_v18  ;;  %v3597_v30 = vpack.c.bf16 %v5804_v29, %v5800_v27  ;;  %v2840_v42 = vmul.f32 %v5663_v37, %v2836_v24  ;;  %v4989_v37 = vld [vmem:[#allocation7 + $0xa8] sm:$0xff]   ;;  %v2841_v50 = vmul.f32 %v5688_v28, %v2837_v9  ;;  %v4998_v2 = vld [vmem:[#allocation7 + $0xf0] sm:$0xff]   ;;  %v5000_v4 = vld [vmem:[#allocation7 + $0x100] sm:$0xff]  }
 0x7d8   : > { %4596 = vmatpush3.bf16.msra.mxu1 %v4978_v3  ;;  %v3347_v47 = vpack.c.bf16 %v5797_v25, %v5791_v8  ;;  %v2602_v23 = vpack.c.bf16 %v2600_v32, %v2599_v26  ;;  %v2967_v53 = vmul.f32 %v5632_v38, %v5777_v12  ;;  %v4997_v38 = vld [vmem:[#allocation7 + $0xe8] sm:$0xff]   ;;  %v4999_v3 = vld [vmem:[#allocation7 + $0xf8] sm:$0xff]   ;;  %v2968_v6 = vmul.f32 %v5668_v39, %v5779_v13  ;;  %v5002_v9 = vld [vmem:[#allocation7 + $0x110] sm:$0xff]  }
 0x7d9   : > { %4597 = vmatprep.subr.bf16.mxu1 %v4979_v48  ;;  %v2843_v17 = vpack.c.bf16 %v2840_v42, %v2839_v44  ;;  %v2844_v55 = vpack.c.bf16 %v2842_v51, %v2841_v50  ;;  %v2969_v24 = vmul.f32 %v5658_v35, %v5823_v5  ;;  %v5001_v12 = vld [vmem:[#allocation7 + $0x108] sm:$0xff]   ;;  %v5004_v13 = vld [vmem:[#allocation7 + $0x120] sm:$0xff]   ;;  %v5010_v41 = vld [vmem:[#allocation7 + $0x150] sm:$0xff]   ;;  %v3218_v18 = vmul.f32 %v5688_v28, %v5784_v16 }
 0x7da   : > { %v2970_v60 = vpack.c.bf16 %v2967_v53, %v2966_v54  ;;  %v5040_v26 = vld [vmem:[%s5450_s27] sm:$0xff]   ;;  %v5041_v32 = vld [vmem:[%s5450_s27 + $0x8] sm:$0xff]   ;;  %v5011_v42 = vld [vmem:[#allocation7 + $0x158] sm:$0xff]   ;;  %v3345_v8 = vmul.f32 %v5668_v39, %v5823_v5 }
 0x7db   : > { %4753 = vmatprep.mubr.msk.bf16.mxu0 %vm759_vm2, %v5040_v26  ;;  %v5012_v44 = vld [vmem:[#allocation7 + $0x160] sm:$0xff]   ;;  %v5025_v51 = vld [vmem:[#allocation7 + $0x1c8] sm:$0xff]   ;;  %v5027_v53 = vld [vmem:[#allocation7 + $0x1d8] sm:$0xff]  }
 0x7dc   : > { %4598 = vmatpush3.bf16.msra.mxu1 %v4979_v48  ;;  %v2971_v48 = vpack.c.bf16 %v2969_v24, %v2968_v6  ;;  %v5020_v16 = vld [vmem:[#allocation7 + $0x1a0] sm:$0xff]   ;;  %v5030_v39 = vld [vmem:[#allocation7 + $0x1f0] sm:$0xff]  }
 0x7dd   : > { %4599 = vmatprep.subr.bf16.mxu1 %v4980_v15  ;;  %v5028_v54 = vld [vmem:[#allocation7 + $0x1e0] sm:$0xff]  }
 0x7de   : > { %v4133_v6 = vld [vmem:[%s5997_s29] ss:$0 sm:$0xff]  ;;  %s5886_s29 = scalar_lea.hbm %s6000_s26, %s4145_s0 }
 0x7df   : > { %v4131_v24 = vld [vmem:[%s5951_s20] ss:$0 sm:$0xff] }
 0x7e0   : > { %4600 = vmatpush3.bf16.msra.mxu1 %v4980_v15  ;;  %v5003_v15 = vld [vmem:[#allocation7 + $0x118] sm:$0xff]  }
 0x7e1   : > { %4601 = vmatprep.subr.bf16.mxu1 %v4981_v59 }
 0x7e4   : > { %4602 = vmatpush3.bf16.msra.mxu1 %v4981_v59  ;;  %v5005_v59 = vld [vmem:[#allocation7 + $0x128] sm:$0xff]  }
 0x7e5   : > { %4603 = vmatprep.subr.bf16.mxu1 %v4982_v14 }
 0x7e8   : > { %4604 = vmatpush3.bf16.msra.mxu1 %v4982_v14  ;;  %v5006_v14 = vld [vmem:[#allocation7 + $0x130] sm:$0xff]  }
 0x7e9   : > { %4605 = vmatprep.subr.bf16.mxu1 %v4983_v7 }
 0x7ec   : > { %4606 = vmatpush3.bf16.msra.mxu1 %v4983_v7  ;;  %v3767_v7 = vsel %vm766_vm1, %v3742_v0, 0 }
 0x7ed   : > { %4611 = vmatprep.subr.bf16.mxu1 %v4984_v34  ;;  %4752 = vmatpush3.bf16.msra.mxu0 %v3767_v7 }
 0x7ef   : > { %4608 = vmatmul.mubr.bf16.vlgmr.msra.gmra.mrb[12].mxu1 %v2602_v23  ;;  %v5013_v23 = vld [vmem:[#allocation7 + $0x168] sm:$0xff]  }
 0x7f0   : > { %4612 = vmatpush3.bf16.msra.mxu1 %v4984_v34  ;;  %4627 = vmatprep.mubr.bf16.mxu1 %v2843_v17  ;;  %v5009_v34 = vld [vmem:[#allocation7 + $0x148] sm:$0xff]  }
 0x7f1   : > { %4613 = vmatprep.subr.bf16.mxu1 %v4985_v45  ;;  %4754 = vmatmul.mubr.msk.bf16.vlgmr.msra.gmra.mrb[16].mxu0 %vm759_vm2, %v5041_v32 }
 0x7f4   : > { %4614 = vmatpush3.bf16.msra.mxu1 %v4985_v45  ;;  %v5847_v45 = vld [vmem:[#allocation2 + $0x29] sm:$0xff] }
 0x7f5   : > { %4615 = vmatprep.subr.bf16.mxu1 %v4986_v46  ;;  %v3219_v11 = vmul.f32 %v5683_v58, %v5847_v45  ;;  %v5021_v58 = vld [vmem:[#allocation7 + $0x1a8] sm:$0xff]   ;;  %v3595_v27 = vmul.f32 %v5688_v28, %v5847_v45  ;;  %v4132_v28 = vld [vmem:[%s5998_s2] ss:$0 sm:$0xff] }
 0x7f7   : > { %v3221_v17 = vpack.c.bf16 %v3219_v11, %v3218_v18  ;;  %v3598_v29 = vpack.c.bf16 %v5740_v33, %v3595_v27 }
 0x7f8   : > { %4616 = vmatpush3.bf16.msra.mxu1 %v4986_v46  ;;  %v5017_v46 = vld [vmem:[#allocation7 + $0x188] sm:$0xff]  }
 0x7f9   : > { %4617 = vmatprep.subr.bf16.mxu1 %v4987_v10 }
 0x7fc   : > { %4618 = vmatpush3.bf16.msra.mxu1 %v4987_v10  ;;  %v5018_v10 = vld [vmem:[#allocation7 + $0x190] sm:$0xff]  }
 0x7fd   : > { %4619 = vmatprep.subr.bf16.mxu1 %v4988_v19 }
 0x800   : > { %4620 = vmatpush3.bf16.msra.mxu1 %v4988_v19  ;;  %v5019_v19 = vld [vmem:[#allocation7 + $0x198] sm:$0xff]  }
 0x801   : > { %4621 = vmatprep.subr.bf16.mxu1 %v4989_v37 }
 0x804   : > { %4622 = vmatpush3.bf16.msra.mxu1 %v4989_v37  ;;  %v5022_v37 = vld [vmem:[#allocation7 + $0x1b0] sm:$0xff]  }
 0x805   : > { %4623 = vmatprep.subr.bf16.mxu1 %v4990_v43 }
 0x808   : > { %4624 = vmatpush3.bf16.msra.mxu1 %v4990_v43  ;;  %v5023_v43 = vld [vmem:[#allocation7 + $0x1b8] sm:$0xff]  }
 0x809   : > { %4625 = vmatprep.subr.bf16.mxu1 %v4991_v49 }
 0x80c   : > { %4626 = vmatpush3.bf16.msra.mxu1 %v4991_v49  ;;  %v3342_v49 = vld [vmem:[#allocation2 + $0x2f] sm:$0xff] }
 0x80d   : > { %4631 = vmatprep.subr.bf16.mxu1 %v4992_v52  ;;  %v3346_v25 = vmul.f32 %v5658_v35, %v3342_v49  ;;  %v5029_v35 = vld [vmem:[#allocation7 + $0x1e8] sm:$0xff]  }
 0x80f   : > { %4628 = vmatmul.mubr.bf16.vlgmr.msra.gmra.mrb[12].mxu1 %v2844_v55  ;;  %v3348_v50 = vpack.c.bf16 %v3346_v25, %v3345_v8  ;;  %v5031_v55 = vld [vmem:[#allocation7 + $0x1f8] sm:$0xff]  }
 0x810   : > { %4632 = vmatpush3.bf16.msra.mxu1 %v4992_v52  ;;  %4647 = vmatprep.mubr.bf16.mxu1 %v2970_v60  ;;  %v5026_v52 = vld [vmem:[#allocation7 + $0x1d0] sm:$0xff]   ;;  %v5033_v60 = vld [vmem:[#allocation7 + $0x208] sm:$0xff]  }
 0x811   : > { %4633 = vmatprep.subr.bf16.mxu1 %v4993_v56 }
 0x814   : > { %4634 = vmatpush3.bf16.msra.mxu1 %v4993_v56  ;;  %v3471_v56 = vpack.c.bf16 %v5733_v21, %v5754_v63  ;;  %v5038_v21 = vld [vmem:[#allocation7 + $0x230] sm:$0xff]   ;;  %v5039_v63 = vld [vmem:[#allocation7 + $0x238] sm:$0xff]  }
 0x815   : > { %4635 = vmatprep.subr.bf16.mxu1 %v4994_v62 }
 0x818   : > { %4636 = vmatpush3.bf16.msra.mxu1 %v4994_v62  ;;  %v5034_v62 = vld [vmem:[#allocation7 + $0x210] sm:$0xff]  }
 0x819   : > { %4637 = vmatprep.subr.bf16.mxu1 %v4995_v36 }
 0x81c   : > { %4638 = vmatpush3.bf16.msra.mxu1 %v4995_v36  ;;  %v5035_v36 = vld [vmem:[#allocation7 + $0x218] sm:$0xff]  }
 0x81d   : > { %4639 = vmatprep.subr.bf16.mxu1 %v4996_v31 }
 0x820   : > { %4640 = vmatpush3.bf16.msra.mxu1 %v4996_v31  ;;  %v5036_v31 = vld [vmem:[#allocation7 + $0x220] sm:$0xff]  }
 0x821   : > { %4641 = vmatprep.subr.bf16.mxu1 %v4997_v38 }
 0x824   : > { %4642 = vmatpush3.bf16.msra.mxu1 %v4997_v38  ;;  %v5037_v38 = vld [vmem:[#allocation7 + $0x228] sm:$0xff]  }
 0x825   : > { %4643 = vmatprep.subr.bf16.mxu1 %v4998_v2 }
 0x828   : > { %4644 = vmatpush3.bf16.msra.mxu1 %v4998_v2 }
 0x829   : > { %4645 = vmatprep.subr.bf16.mxu1 %v4999_v3 }
 0x82c   : > { %4646 = vmatpush3.bf16.msra.mxu1 %v4999_v3 }
 0x82d   : > { %4651 = vmatprep.subr.bf16.mxu1 %v5000_v4 }
 0x82f   : > { %4648 = vmatmul.mubr.bf16.vlgmr.msra.gmra.mrb[12].mxu1 %v2971_v48 }
 0x830   : > { %4652 = vmatpush3.bf16.msra.mxu1 %v5000_v4  ;;  %4667 = vmatprep.mubr.bf16.mxu1 %v3093_v20  ;;  %v5008_v20 = vld [vmem:[#allocation7 + $0x140] sm:$0xff]  }
 0x831   : > { %4653 = vmatprep.subr.bf16.mxu1 %v5001_v12 }
 0x834   : > { %4654 = vmatpush3.bf16.msra.mxu1 %v5001_v12 }
 0x835   : > { %4655 = vmatprep.subr.bf16.mxu1 %v5002_v9 }
 0x838   : > { %4656 = vmatpush3.bf16.msra.mxu1 %v5002_v9 }
 0x839   : > { %4657 = vmatprep.subr.bf16.mxu1 %v5003_v15 }
 0x83c   : > { %4658 = vmatpush3.bf16.msra.mxu1 %v5003_v15 }
 0x83d   : > { %4659 = vmatprep.subr.bf16.mxu1 %v5004_v13 }
 0x840   : > { %4660 = vmatpush3.bf16.msra.mxu1 %v5004_v13 }
 0x841   : > { %4661 = vmatprep.subr.bf16.mxu1 %v5005_v59 }
 0x844   : > { %4662 = vmatpush3.bf16.msra.mxu1 %v5005_v59 }
 0x845   : > { %4663 = vmatprep.subr.bf16.mxu1 %v5006_v14 }
 0x848   : > { %4664 = vmatpush3.bf16.msra.mxu1 %v5006_v14 }
 0x849   : > { %4665 = vmatprep.subr.bf16.mxu1 %v5007_v61 }
 0x84c   : > { %4666 = vmatpush3.bf16.msra.mxu1 %v5007_v61 }
 0x84d   : > { %4671 = vmatprep.subr.bf16.mxu1 %v5008_v20 }
 0x84f   : > { %4668 = vmatmul.mubr.bf16.vlgmr.msra.gmra.mrb[12].mxu1 %v3094_v40  ;;  %v5015_v40 = vld [vmem:[#allocation7 + $0x178] sm:$0xff]  }
 0x850   : > { %4672 = vmatpush3.bf16.msra.mxu1 %v5008_v20  ;;  %4687 = vmatprep.mubr.bf16.mxu1 %v3220_v22  ;;  %v5016_v22 = vld [vmem:[#allocation7 + $0x180] sm:$0xff]  }
 0x851   : > { %4673 = vmatprep.subr.bf16.mxu1 %v5009_v34 }
 0x854   : > { %4674 = vmatpush3.bf16.msra.mxu1 %v5009_v34 }
 0x855   : > { %4675 = vmatprep.subr.bf16.mxu1 %v5010_v41 }
 0x858   : > { %4676 = vmatpush3.bf16.msra.mxu1 %v5010_v41 }
 0x859   : > { %4677 = vmatprep.subr.bf16.mxu1 %v5011_v42 }
 0x85c   : > { %4678 = vmatpush3.bf16.msra.mxu1 %v5011_v42 }
 0x85d   : > { %4679 = vmatprep.subr.bf16.mxu1 %v5012_v44 }
 0x860   : > { %4680 = vmatpush3.bf16.msra.mxu1 %v5012_v44 }
 0x861   : > { %4681 = vmatprep.subr.bf16.mxu1 %v5013_v23 }
 0x864   : > { %4682 = vmatpush3.bf16.msra.mxu1 %v5013_v23 }
 0x865   : > { %4683 = vmatprep.subr.bf16.mxu1 %v5014_v57 }
 0x868   : > { %4684 = vmatpush3.bf16.msra.mxu1 %v5014_v57 }
 0x869   : > { %4685 = vmatprep.subr.bf16.mxu1 %v5015_v40 }
 0x86c   : > { %4686 = vmatpush3.bf16.msra.mxu1 %v5015_v40 }
 0x86d   : > { %4691 = vmatprep.subr.bf16.mxu1 %v5016_v22 }
 0x86f   : > { %4688 = vmatmul.mubr.bf16.vlgmr.msra.gmra.mrb[12].mxu1 %v3221_v17 }
 0x870   : > { %4692 = vmatpush3.bf16.msra.mxu1 %v5016_v22  ;;  %4707 = vmatprep.mubr.bf16.mxu1 %v3347_v47  ;;  %v5024_v47 = vld [vmem:[#allocation7 + $0x1c0] sm:$0xff]  }
 0x871   : > { %4693 = vmatprep.subr.bf16.mxu1 %v5017_v46 }
 0x874   : > { %4694 = vmatpush3.bf16.msra.mxu1 %v5017_v46 }
 0x875   : > { %4695 = vmatprep.subr.bf16.mxu1 %v5018_v10 }
 0x878   : > { %4696 = vmatpush3.bf16.msra.mxu1 %v5018_v10 }
 0x879   : > { %4697 = vmatprep.subr.bf16.mxu1 %v5019_v19 }
 0x87c   : > { %4698 = vmatpush3.bf16.msra.mxu1 %v5019_v19 }
 0x87d   : > { %4699 = vmatprep.subr.bf16.mxu1 %v5020_v16 }
 0x880   : > { %4700 = vmatpush3.bf16.msra.mxu1 %v5020_v16 }
 0x881   : > { %4701 = vmatprep.subr.bf16.mxu1 %v5021_v58 }
 0x884   : > { %4702 = vmatpush3.bf16.msra.mxu1 %v5021_v58 }
 0x885   : > { %4703 = vmatprep.subr.bf16.mxu1 %v5022_v37 }
 0x888   : > { %4704 = vmatpush3.bf16.msra.mxu1 %v5022_v37 }
 0x889   : > { %4705 = vmatprep.subr.bf16.mxu1 %v5023_v43 }
 0x88c   : > { %4706 = vmatpush3.bf16.msra.mxu1 %v5023_v43 }
 0x88d   : > { %4711 = vmatprep.subr.bf16.mxu1 %v5024_v47 }
 0x88f   : > { %4708 = vmatmul.mubr.bf16.vlgmr.msra.gmra.mrb[12].mxu1 %v3348_v50 }
 0x890   : > { %4712 = vmatpush3.bf16.msra.mxu1 %v5024_v47  ;;  %4727 = vmatprep.mubr.bf16.mxu1 %v5767_v1  ;;  %v5032_v1 = vld [vmem:[#allocation7 + $0x200] sm:$0xff]  }
 0x891   : > { %4713 = vmatprep.subr.bf16.mxu1 %v5025_v51 }
 0x894   : > { %4714 = vmatpush3.bf16.msra.mxu1 %v5025_v51 }
 0x895   : > { %4715 = vmatprep.subr.bf16.mxu1 %v5026_v52 }
 0x898   : > { %4716 = vmatpush3.bf16.msra.mxu1 %v5026_v52 }
 0x899   : > { %4717 = vmatprep.subr.bf16.mxu1 %v5027_v53 }
 0x89c   : > { %4718 = vmatpush3.bf16.msra.mxu1 %v5027_v53 }
 0x89d   : > { %4719 = vmatprep.subr.bf16.mxu1 %v5028_v54 }
 0x8a0   : > { %4720 = vmatpush3.bf16.msra.mxu1 %v5028_v54 }
 0x8a1   : > { %4721 = vmatprep.subr.bf16.mxu1 %v5029_v35 }
 0x8a4   : > { %4722 = vmatpush3.bf16.msra.mxu1 %v5029_v35 }
 0x8a5   : > { %4723 = vmatprep.subr.bf16.mxu1 %v5030_v39 }
 0x8a8   : > { %4724 = vmatpush3.bf16.msra.mxu1 %v5030_v39 }
 0x8a9   : > { %4725 = vmatprep.subr.bf16.mxu1 %v5031_v55 }
 0x8ac   : > { %4726 = vmatpush3.bf16.msra.mxu1 %v5031_v55 }
 0x8ad   : > { %4731 = vmatprep.subr.bf16.mxu1 %v5032_v1 }
 0x8af   : > { %4728 = vmatmul.mubr.bf16.vlgmr.msra.gmra.mrb[12].mxu1 %v3471_v56 }
 0x8b0   : > { %4732 = vmatpush3.bf16.msra.mxu1 %v5032_v1  ;;  %4747 = vmatprep.mubr.bf16.mxu1 %v3597_v30 }
 0x8b1   : > { %4733 = vmatprep.subr.bf16.mxu1 %v5033_v60 }
 0x8b4   : > { %4734 = vmatpush3.bf16.msra.mxu1 %v5033_v60 }
 0x8b5   : > { %4735 = vmatprep.subr.bf16.mxu1 %v5034_v62 }
 0x8b8   : > { %4736 = vmatpush3.bf16.msra.mxu1 %v5034_v62 }
 0x8b9   : > { %4737 = vmatprep.subr.bf16.mxu1 %v5035_v36 }
 0x8bc   : > { %4738 = vmatpush3.bf16.msra.mxu1 %v5035_v36 }
 0x8bd   : > { %4739 = vmatprep.subr.bf16.mxu1 %v5036_v31 }
 0x8c0   : > { %4740 = vmatpush3.bf16.msra.mxu1 %v5036_v31 }
 0x8c1   : > { %4741 = vmatprep.subr.bf16.mxu1 %v5037_v38 }
 0x8c4   : > { %4742 = vmatpush3.bf16.msra.mxu1 %v5037_v38  ;;  %v4755_v30 = vpop.f32.mrb[16].mxu0 }
 0x8c5   : > { %4743 = vmatprep.subr.bf16.mxu1 %v5038_v21  ;;  %v3803_v2 = vpop.f32.mrb[17].mxu0  ;;  %v3812_v33 = vadd.f32 %v4755_v30, %v4133_v6 }
 0x8c6   : > { %v4756_v3 = vpop.f32.mrb[18].mxu0  ;;  %v3804_v9 = vadd.f32 %v4133_v6, %v3803_v2 }
 0x8c7   : > { %v3806_v5 = vpop.f32.mrb[19].mxu0  ;;  %v3815_v26 = vadd.f32 %v4756_v3, %v4133_v6 }
 0x8c8   : > { %4744 = vmatpush3.bf16.msra.mxu1 %v5038_v21  ;;  %v3807_v41 = vadd.f32 %v4133_v6, %v3806_v5 }
 0x8c9   : > { %4745 = vmatprep.subr.bf16.mxu1 %v5039_v63 }
 0x8cc   : > { %4746 = vmatpush3.bf16.msra.mxu1 %v5039_v63 }
 0x8cf   : > { %4748 = vmatmul.mubr.bf16.vlgmr.msra.gmra.mrb[12].mxu1 %v3598_v29 }
 0x9a2   : > { %v4749_v4 = vpop.f32.mrb[12].mxu1 }
 0x9a3   : > { %v3725_v48 = vmul.f32 %v4749_v4, %v4131_v24  ;;  %v3697_v12 = vpop.f32.mrb[13].mxu1 }
 0x9a4   : > { %v3723_v15 = vmul.f32 %v4131_v24, %v3697_v12  ;;  %v4750_v13 = vpop.f32.mrb[14].mxu1 }
 0x9a5   : > { %v3736_v59 = vadd.f32 %v4132_v28, %v3725_v48  ;;  %v3726_v14 = vmul.f32 %v4750_v13, %v4131_v24  ;;  %v3700_v61 = vpop.f32.mrb[15].mxu1 }
 0x9a6   : > { %v3734_v0 = vadd.f32 %v4132_v28, %v3723_v15  ;;  %v3724_v20 = vmul.f32 %v4131_v24, %v3700_v61 }
 0x9a7   : > { %v3820_v7 = vadd.f32 %v3812_v33, %v3736_v59  ;;  %v3737_v32 = vadd.f32 %v4132_v28, %v3726_v14 }
 0x9a8   : > { %v3818_v34 = vadd.f32 %v3804_v9, %v3734_v0  ;;  %v3735_v42 = vadd.f32 %v4132_v28, %v3724_v20 }
 0x9a9   : > { %v3824_v44 = vmax.f32 %v3820_v7, 0.0  ;;  %v3821_v23 = vadd.f32 %v3815_v26, %v3737_v32 }
 0x9aa   : > { %v3822_v57 = vmax.f32 %v3818_v34, 0.0  ;;  %v3819_v40 = vadd.f32 %v3807_v41, %v3735_v42 }
 0x9ab   : > { %3828 = vst [vmem:[%s721_s21 + $0x10] sm:$0xff] %v3824_v44  ;;  %v3825_v45 = vmax.f32 %v3821_v23, 0.0 }
 0x9ac   : > { %3826 = vst [vmem:[%s721_s21] sm:$0xff] %v3822_v57  ;;  %v3823_v18 = vmax.f32 %v3819_v40, 0.0 }
 0x9ad   : > { %3829 = vst [vmem:[%s721_s21 + $0x18] sm:$0xff] %v3825_v45 }
 0x9ae   : > { %3827 = vst [vmem:[%s721_s21 + $0x8] sm:$0xff] %v3823_v18 }
 0x9af   : > { %5136 = shalt.err (!%p5133_p11)
}
 0x9b0   : > { %s5137_s30 = scalar_lea.hbm %s5886_s29, 512  ;;  %s5141_s21 = scalar_lea.hbm %s6000_s26, 1024 }
 0x9b1   : > { %p5138_p13 = scmp.ne.s32.totalorder %s5886_s29, %s5137_s30  ;;  %p5142_p6 = scmp.lt.u32.totalorder %s5886_s29, %s6000_s26 }
 0x9b2   : > { %p5143_p9 = scmp.lt.u32.totalorder %s5141_s21, %s5137_s30  ;;  %p5145_p12 = scmp.lt.u32.totalorder %s5137_s30, %s5886_s29 }
 0x9b3   : > { %p5139_p5 = pnand %p5138_p13, %p6001_p1 }
 0x9b4   : > { %p5144_p10 = por %p5143_p9, %p5142_p6 }
 0x9b5   : > { %p5140_p0 = pneg %p5139_p5 }
 0x9b6   : > { %p5146_p2 = por %p5145_p12, %p5144_p10 }
 0x9b8   : > { %p5147_p3 = pnand %p5146_p2, %p5140_p0 }
 0x9ba   : > { %5150 = shalt.err (!%p5147_p3)
}
 0x9bb   : > { %s5202_s27 = smov 128   ;;  %s5203_s24 = smov 8  }
 0x9bc   : > { %4831 = dma.vmem_to_hbm [thread:$0]  (%p6001_p1), %s5881_s22, 512, %s5886_s29, %s5890_s4, %s5202_s27, %s5202_s27, %s5203_s24  }
 0x9bd PF: > { %s6002_s3 = sld [smem:[#allocation15_spill]]  ;;  %s6003_s23 = sld [smem:[#allocation13_spill]] }
 0x9be   : > { %s6004_s25 = sld [smem:[#allocation19_spill]] }
 0x9c3   : > { %p4848_p4 = scmp.ge.s32.totalorder %s6002_s3, 2  ;;  %s3859_s2 = sand.u32 1, %s6003_s23  }
 0x9c4   : > { %p6005_p7 = scmp.ne.s32.totalorder %s6004_s25, 0  ;;  %s3860_s30 = scalar_lea.sflag [#allocation6], %s3859_s2 }
 0x9c6   : > { %p4841_p8 = pnand %p4848_p4, %p6005_p7 }
 0x9c8   : > { %5176 = dma.done.wait (!%p4841_p8), %s3860_s30, 512  }
 0x9c9   : > { %5178 = vsyncadd (!%p4841_p8), %s3860_s30, 4294966784  ;;  %s6006_s30 = sld [smem:[#allocation16_spill]]  ;;  %s6007_s1 = sld [smem:[#allocation14_spill]] }
 0x9ca   : > { %s6008_s29 = sld [smem:[#allocation17_spill]]  ;;  %s6009_s3 = smov %s5185_s28 }
 0x9cf   : > { %p34_p11 = scmp.ge.s32.totalorder %s6006_s30, 4   ;;  %s6010_s28 = smov %s6007_s1 }
 0x9d1   :  { %36 = sbr.rel (!%p34_p11) target bundleno = 15 (0xf), region = 158 }
 0x9d8   :  { %3865 = vsyncpa [#allocation5], 1 }
 0x9d9   :  { %3867 = vsyncpa [#allocation5 + $0x1], 1 }
 0x9da   :  { %3868 = vsyncpa [#allocation8], 1 }
 0x9db   :  { %3869 = vsyncpa [#allocation6], 1 }
 0x9dc   :  { %3871 = vsyncpa [#allocation6 + $0x1], 1 }

// kernel: tpu_custom_call.1
= control target key start
LH: loop header
LB: loop body
LE: loop exit
PB: predicated region body
PF: predicated region fallthrough
CT: control target
= control target key end

     0   :  { %s5931_s0 = inlined_call_operand.vmem [shape: bf16[2,32,8], index: 0, kind: input, shape index: {}]   ;;  %s5932_s1 = inlined_call_operand.vmem [shape: bf16[2,32,16], index: 1, kind: input, shape index: {}]   ;;  %s5933_s2 = inlined_call_operand.vmem [shape: bf16[8,128], index: 2, kind: input, shape index: {}]   ;;  %s5934_s3 = inlined_call_operand.vmem [shape: f32[1,128], index: 3, kind: input, shape index: {}]   ;;  %s5935_s4 = inlined_call_operand.vmem [shape: bf16[8,128], index: 4, kind: input, shape index: {}]   ;;  %s5936_s5 = inlined_call_operand.vmem [shape: f32[1,128], index: 5, kind: input, shape index: {}]   ;;  %s5937_s6 = inlined_call_operand.vmem [shape: bf16[16,128], index: 6, kind: input, shape index: {}]   ;;  %s5938_s7 = inlined_call_operand.vmem [shape: f32[1,128], index: 7, kind: input, shape index: {}]   ;;  %s5939_s8 = inlined_call_operand.vmem [shape: f32[1,128], index: 8, kind: input, shape index: {}]   ;;  %s5940_s9 = inlined_call_operand.vmem [shape: f32[1,128], index: 9, kind: input, shape index: {}]   ;;  %s5941_s10 = inlined_call_operand.vmem [shape: f32[1,128], index: 10, kind: input, shape index: {}]   ;;  %s5942_s11 = inlined_call_operand.vmem [shape: f32[1,128], index: 11, kind: input, shape index: {}]   ;;  %s5943_s12 = inlined_call_operand.vmem [shape: f32[1,32], index: 12, kind: input, shape index: {}]   ;;  %s5944_s13 = inlined_call_operand.vmem [shape: f32[1,32], index: 13, kind: input, shape index: {}]   ;;  %s5945_s14 = inlined_call_operand.vmem [shape: bf16[32,128], index: 14, kind: input, shape index: {}]   ;;  %s5946_s15 = inlined_call_operand.vmem [shape: f32[1,128], index: 15, kind: input, shape index: {}]   ;;  %s5947_s16 = inlined_call_operand.hbm [shape: bf16[1152,128], index: 16, kind: input, shape index: {}]   ;;  %s5948_s17 = inlined_call_operand.vmem [shape: f32[1,128], index: 17, kind: input, shape index: {}]   ;;  %s5949_s18 = inlined_call_operand.vmem [shape: f32[1,128], index: 18, kind: input, shape index: {}]   ;;  %s5950_s19 = inlined_call_operand.hbm [shape: bf16[1152,128], index: 19, kind: input, shape index: {}]   ;;  %s5951_s20 = inlined_call_operand.vmem [shape: f32[1,128], index: 20, kind: input, shape index: {}]   ;;  %s5952_s21 = inlined_call_operand.vmem [shape: f32[1,128], index: 21, kind: input, shape index: {}]   ;;  %s5953_s22 = inlined_call_operand.hbm [shape: f32[2,32,128], index: 22, kind: output, shape index: {}]  }
   0x1   :  { %5966 = sst [smem:[#allocation20_spill]] %s5931_s0 }
   0x2   :  { %5967 = sst [smem:[#allocation21_spill]] %s5932_s1 }
   0x3   :  { %5968 = sst [smem:[#allocation22_spill]] %s5933_s2 }
   0x4   :  { %5969 = sst [smem:[#allocation23_spill]] %s5934_s3 }
   0x5   :  { %5970 = sst [smem:[#allocation24_spill]] %s5935_s4 }
   0x6   :  { %5971 = sst [smem:[#allocation25_spill]] %s5936_s5 }
   0x7   :  { %5972 = sst [smem:[#allocation26_spill]] %s5937_s6 }
   0x8   :  { %5973 = sst [smem:[#allocation27_spill]] %s5952_s21 }
   0x9   :  { %5974 = sst [smem:[#allocation28_spill]] %s5953_s22 }
   0xa   :  { %27 = vsyncpa [#allocation5], 0 }
   0xb   :  { %28 = vsyncpa [#allocation8], 0 }
   0xc   :  { %29 = vsyncpa [#allocation6], 0 }
   0xd   :  { %31 = vsyncpa [#allocation6 + $0x1], 0  ;;  %s5319_s3 = smov 0   ;;  %s5321_s28 = smov 0  }
   0xe   :  { %s5323_s29 = smov 0   ;;  %s5325_s30 = smov 0  }
   0xf LB: > { %5975 = sst [smem:[#allocation13_spill]] %s5181_s3  ;;  %s5340_s4 = sadd.s32 4294967295, %s5193_s30   ;;  %s5193_s30 = sphi %s5325_s30, %s6006_s30   ;;  %s5189_s29 = sphi %s5323_s29, %s6008_s29   ;;  %s5185_s28 = sphi %s5321_s28, %s6010_s28   ;;  %s5181_s3 = sphi %s5319_s3, %s6009_s3  }
  0x10   : > { %5976 = sst [smem:[#allocation14_spill]] %s5189_s29  ;;  %s3942_s0 = sadd.s32 4294967294, %s5193_s30  }
  0x11   : > { %5977 = sst [smem:[#allocation15_spill]] %s5193_s30  ;;  %s5344_s23 = sadd.s32 1, %s5193_s30  }
  0x12   : > { %5978 = sst [smem:[#allocation16_spill]] %s5344_s23  ;;  %s516_s1 = sadd.s32 1, %s5189_s29 }
  0x13   : > { %s513_s5 = ssub.s32 %s5193_s30, %s5344_s23  ;;  %p526_p0 = scmp.ne.s32.totalorder %s5189_s29, %s5185_s28 }
  0x14   : > { %p514_p1 = scmp.eq.s32.totalorder %s513_s5, 0  ;;  %p527_p2 = scmp.eq.s32.totalorder %s5340_s4, 1 }
  0x15   : > { %p532_p3 = scmp.ne.s32.totalorder %s5185_s28, %s5181_s3  ;;  %p533_p4 = scmp.eq.s32.totalorder %s3942_s0, 1 }
  0x16   : > { %s5355_s24 = scalar_select %p514_p1, %s5189_s29, %s516_s1  }
  0x17   : > { %p5357_p5 = por %p527_p2, %p526_p0  ;;  %p5361_p6 = por %p533_p4, %p532_p3 }
  0x18   : > { %5979 = sst [smem:[#allocation17_spill]] %s5355_s24  ;;  %p3943_p7 = scmp.ge.s32.totalorder %s5193_s30, 1 }
  0x19   : > { %s5980_s6 = scalar_select %p5357_p5, 1, 0 }
  0x1a   : > { %s5982_s25 = scalar_select %p5361_p6, 1, 0 }
  0x1b   : > { %5981 = sst [smem:[#allocation18_spill]] %s5980_s6  ;;  %p540_p8 = scmp.lt.s32.totalorder %s5193_s30, 3 }
  0x1c   : > { %5983 = sst [smem:[#allocation19_spill]] %s5982_s25  ;;  %p5960_p9 = scmp.eq.s32.totalorder %s5340_s4, 0 }
  0x1d   : > { %p5368_p10 = pnand %p3943_p7, %p540_p8  ;;  %s5195_s2 = smov [#allocation4]  }
  0x1e   : > { %s594_s27 = sshll.u32 %s5195_s2, 4  ;;  %s5196_s1 = smov [#allocation7]   ;;  %s595_s27 = int_to_ptr.vmem [resolvable:$true] %s594_s27 }
  0x1f   : > { %s5984_s26 = scalar_select %p5368_p10, 1, 0 }
  0x20   : > { %p4833_p11 = pneg %p5368_p10  ;;  %s613_s5 = sshll.u32 %s5196_s1, 4  ;;  %s5380_s5 = int_to_ptr.vmem [resolvable:$true] %s613_s5 }
  0x21   : > { %s5067_s23 = scalar_lea.hbm %s5947_s16, 9216 }
  0x22   : > { %p5376_p12 = pnand %p5960_p9, %p4833_p11  ;;  %p5068_p13 = scmp.ne.s32.totalorder %s5947_s16, %s5067_s23 }
  0x23   : > { %p5074_p3 = scmp.lt.u32.totalorder %s5067_s23, %s5947_s16 }
  0x24   : > { %p5069_p0 = pneg %p5376_p12 }
  0x26   : > { %p5070_p1 = pnand %p5069_p0, %p5068_p13 }
  0x28   : > { %p5071_p2 = pneg %p5070_p1 }
  0x2a   : > { %p5076_p4 = pnand %p5074_p3, %p5071_p2 }
  0x2c   : > { %5079 = shalt.err (!%p5076_p4)
}
  0x2d   : > { %s5080_s1 = scalar_lea.vmem %s595_s27, 9216  ;;  %p5088_p9 = scmp.lt.s32.totalorder %s595_s27, %s595_s27 }
  0x2e   : > { %p5081_p7 = scmp.ne.s32.totalorder %s595_s27, %s5080_s1  ;;  %p5089_p6 = scmp.lt.s32.totalorder %s5080_s1, %s5080_s1 }
  0x30   : > { %p5083_p8 = pnand %p5081_p7, %p5069_p0  ;;  %p5090_p5 = por %p5089_p6, %p5088_p9 }
  0x32   : > { %p5084_p11 = pneg %p5083_p8 }
  0x34   : > { %p5091_p10 = pnand %p5090_p5, %p5084_p11 }
  0x36   : > { %5094 = shalt.err (!%p5091_p10)
}
  0x37   : > { %s5197_s29 = smov 64   ;;  %s5198_s24 = smov 4  }
  0x38   : > { %4836 = dma.hbm_to_vmem [thread:$0]  (!%p5376_p12), %s5947_s16, 9216, %s595_s27, [#allocation5], %s5197_s29, %s5197_s29, %s5198_s24  }
  0x39   : > { %s5095_s2 = scalar_lea.hbm %s5950_s19, 9216 }
  0x3a   : > { %p5096_p13 = scmp.ne.s32.totalorder %s5950_s19, %s5095_s2  ;;  %p5102_p9 = scmp.lt.u32.totalorder %s5095_s2, %s5950_s19 }
  0x3c   : > { %p5098_p5 = pnand %p5096_p13, %p5069_p0 }
  0x3e   : > { %p5099_p6 = pneg %p5098_p5 }
  0x40   : > { %p5104_p10 = pnand %p5102_p9, %p5099_p6 }
  0x42   : > { %5107 = shalt.err (!%p5104_p10)
}
  0x43   : > { %s5108_s27 = scalar_lea.vmem %s5380_s5, 9216  ;;  %p5116_p4 = scmp.lt.s32.totalorder %s5380_s5, %s5380_s5 }
  0x44   : > { %p5109_p1 = scmp.ne.s32.totalorder %s5380_s5, %s5108_s27  ;;  %p5117_p7 = scmp.lt.s32.totalorder %s5108_s27, %s5108_s27 }
  0x46   : > { %p5111_p2 = pnand %p5109_p1, %p5069_p0  ;;  %p5118_p8 = por %p5117_p7, %p5116_p4 }
  0x48   : > { %p5112_p3 = pneg %p5111_p2 }
  0x4a   : > { %p5119_p11 = pnand %p5118_p8, %p5112_p3 }
  0x4c   : > { %5122 = shalt.err (!%p5119_p11)
}
  0x4d   : > { %4839 = dma.hbm_to_vmem [thread:$0]  (!%p5376_p12), %s5950_s19, 9216, %s5380_s5, [#allocation8], %s5197_s29, %s5197_s29, %s5198_s24  }
  0x4e   : > { %p5986_p13 = scmp.ne.s32.totalorder %s5984_s26, 0 }
  0x4f   : > { %p5987_p5 = scmp.eq.s32.totalorder (!%p5986_p13), %s5340_s4, 0 }
  0x50   : > { %651 = sbr.rel (%p5986_p13) target bundleno = 2493 (0x9bd), region = 108 }
  0x57   : > { %5168 = dma.done.wait (%p5987_p5), [#allocation5], 9216   ;;  %p5988_p0 = pmov %p5987_p5 }
  0x59   : > { %5170 = vsyncadd (%p5988_p0), [#allocation5], 4294958080  ;;  %p5989_p6 = pmov %p5988_p0 }
  0x5a   : > { %p5990_p9 = pmov %p5988_p0 }
  0x5b   : > { %5172 = dma.done.wait (%p5989_p6), [#allocation8], 9216  }
  0x5c   : > { %5174 = vsyncadd (%p5990_p9), [#allocation8], 4294958080  ;;  %p722_p10 = scmp.lt.s32.totalorder %s5340_s4, 1  ;;  %s5991_s29 = sld [smem:[#allocation21_spill]]  ;;  %vm848_vm0 = vcmask 130048   ;;  %vm766_vm1 = vcmask 1043456  }
  0x5d   : > { %s5992_s23 = sld [smem:[#allocation26_spill]]  ;;  %s5993_s1 = sld [smem:[#allocation20_spill]]  ;;  %vm759_vm2 = vcmask 64512   ;;  %v3960_v7 = vld [vmem:[%s5938_s7] ss:$0 sm:$0xff]  ;;  %v5199_v31 = vmov 0.0  }
  0x5e   : > { %s723_s6 = scalar_select %p722_p10, %s5340_s4, 1  ;;  %733 = vst [vmem:[#allocation2] sm:$0xff] %v5199_v31  ;;  %734 = vst [vmem:[#allocation2 + $0x8] sm:$0xff] %v5199_v31  ;;  %vm5200_vm3 = vmmov 0   ;;  %vm1115_vm4 = vcmask 261120  }
  0x5f   : > { %735 = vst [vmem:[#allocation2 + $0x30] sm:$0xff] %v5199_v31  ;;  %736 = vst [vmem:[#allocation2 + $0x38] sm:$0x1] %v5199_v31  ;;  %s5996_s5 = sld [smem:[#allocation22_spill]]  ;;  %s719_s30 = sand.u32 1, %s5185_s28  }
  0x60   : > { %s4143_s0 = sshll.u32 %s723_s6, 4  ;;  %s5994_s6 = sld [smem:[#allocation24_spill]] }
  0x61   : > { %s5998_s2 = sld [smem:[#allocation27_spill]]  ;;  %s6000_s26 = sld [smem:[#allocation28_spill]] }
  0x62   : > { %s731_s24 = scalar_lea.vmem %s5991_s29, %s4143_s0  ;;  %s5997_s29 = sld [smem:[#allocation23_spill]] }
  0x63   : > { %v4889_v0 = vld [vmem:[%s5992_s23] sm:$0xff]   ;;  %s5450_s27 = scalar_lea.vmem %s5993_s1, %s4143_s0  ;;  %v4891_v2 = vld [vmem:[%s731_s24 + $0x8] sm:$0xff]   ;;  %s3950_s1 = sshll.u32 %s719_s30, 5 }
  0x64   : > { %v4890_v1 = vld [vmem:[%s731_s24] sm:$0xff]   ;;  %4353 = vmatprep.subr.bf16.mxu1 %v4889_v0  ;;  %v4893_v6 = vld [vmem:[%s5450_s27 + $0x8] sm:$0xff]   ;;  %s5995_s24 = sld [smem:[#allocation25_spill]]  ;;  %s721_s21 = scalar_lea.vmem [#allocation9], %s3950_s1 }
  0x65   : > { %4354 = vmatpush3.bf16.msra.mxu1 %v4889_v0  ;;  %4355 = vmatprep.mubr.msk.bf16.mxu1 %vm848_vm0, %v4890_v1  ;;  %v4892_v5 = vld [vmem:[%s5450_s27] sm:$0xff]   ;;  %s3844_s22 = sshll.u32 %s721_s21, 4  ;;  %s4145_s0 = sshll.u32 %s5340_s4, 9  ;;  %s5881_s22 = int_to_ptr.vmem [resolvable:$true] %s3844_s22 }
  0x66   : > { %v741_v3 = vld [vmem:[%s5994_s6] sm:$0xf]  ;;  %4349 = vmatprep.mubr.msk.bf16.mxu0 %vm759_vm2, %v4892_v5  ;;  %4367 = vmatprep.subr.bf16.mxu1 %v5199_v31  ;;  %s5999_s6 = sld [smem:[#allocation18_spill]]  ;;  %s5890_s4 = scalar_lea.sflag [#allocation6], %s719_s30 }
  0x67   : > { %4821 = vmatprep.subr.msk.bf16.mxu0 %vm766_vm1, %v741_v3  ;;  %v768_v4 = vsel %vm766_vm1, %v741_v3, 0  ;;  %s5201_s3 = smov [#allocation9]  }
  0x68   : > { %4348 = vmatpush3.bf16.msra.mxu0 %v768_v4  ;;  %4356 = vmatmul.mubr.msk.bf16.vlgmr.msra.gmra.mrb[0].mxu1 %vm848_vm0, %v4891_v2  ;;  %s5127_s23 = sshll.u32 %s5201_s3, 4  ;;  %s5128_s23 = int_to_ptr.vmem [resolvable:$false] %s5127_s23 }
  0x69   : > { %4359 = vmatprep.subr.bf16.mxu0 %v5199_v31  ;;  %4371 = vmatprep.mubr.msk.bf16.mxu1 %vm5200_vm3, %v5199_v31  ;;  %s5129_s25 = scalar_lea.vmem %s5128_s23, 1024  ;;  %p5130_p4 = scmp.lt.s32.totalorder %s5881_s22, %s5128_s23 }
  0x6a   : > { %v3955_v9 = vld [vmem:[%s5995_s24] ss:$0 sm:$0xff]  ;;  %s5123_s24 = scalar_lea.vmem %s5881_s22, 512 }
  0x6b   : > { %4350 = vmatmul.mubr.msk.bf16.vlgmr.msra.gmra.mrb[0].mxu0 %vm759_vm2, %v4893_v6  ;;  %p5124_p12 = scmp.ne.s32.totalorder %s5881_s22, %s5123_s24  ;;  %p5131_p7 = scmp.lt.s32.totalorder %s5129_s25, %s5123_s24 }
  0x6c   : > { %4363 = vmatprep.mubr.msk.bf16.mxu0 %vm5200_vm3, %v5199_v31  ;;  %p6001_p1 = scmp.ne.s32.totalorder %s5999_s6, 0 }
  0x6d   : > { %p5132_p8 = por %p5131_p7, %p5130_p4 }
  0x6e   : > { %p5125_p2 = pnand %p5124_p12, %p6001_p1 }
  0x70   : > { %p5126_p3 = pneg %p5125_p2 }
  0x72   : > { %p5133_p11 = pnand %p5132_p8, %p5126_p3 }
 0x13b   : > { %v4357_v8 = vpop.f32.mrb[0].mxu1 }
 0x13c   : > { %v889_v10 = vpop.f32.mrb[1].mxu1  ;;  %v5481_v23 = vadd.f32 %v4357_v8, %v3960_v7 }
 0x13d   : > { %v5467_v11 = vadd.f32 %v3960_v7, %v889_v10  ;;  %v4358_v12 = vpop.f32.mrb[2].mxu1 }
 0x13e   : > { %v4351_v13 = vpop.f32.mrb[0].mxu0  ;;  %v892_v14 = vpop.f32.mrb[3].mxu1  ;;  %v5483_v24 = vadd.f32 %v4358_v12, %v3960_v7  ;;  %v996_v25 = vmul.f32 %v5481_v23, %v5481_v23 }
 0x13f   : > { %v5469_v15 = vadd.f32 %v4351_v13, %v3955_v9  ;;  %v804_v16 = vpop.f32.mrb[1].mxu0  ;;  %v5471_v17 = vadd.f32 %v3960_v7, %v892_v14  ;;  %986 = vadd.xlane.f32.xlu0 %v5467_v11  ;;  %v994_v18 = vmul.f32 %v5467_v11, %v5467_v11 }
 0x140   : > { %v4352_v19 = vpop.f32.mrb[2].mxu0  ;;  %v5489_v26 = vadd.f32 %v3955_v9, %v804_v16  ;;  %v997_v27 = vmul.f32 %v5483_v24, %v5483_v24  ;;  %v3968_v16 = vld [vmem:[%s5941_s10] ss:$0 sm:$0xff] }
 0x141   : > { %v5476_v20 = vadd.f32 %v4352_v19, %v3955_v9  ;;  %v807_v21 = vpop.f32.mrb[3].mxu0  ;;  %998 = vadd.xlane.f32.xlu1 %v994_v18  ;;  %v995_v22 = vmul.f32 %v5471_v17, %v5471_v17 }
 0x142   : > { %v5493_v28 = vadd.f32 %v3955_v9, %v807_v21  ;;  %v914_v29 = vmul.f32 %v5489_v26, %v5489_v26 }
 0x143   : > { %988 = vadd.xlane.f32.xlu0 %v5471_v17 }
 0x144   : > { %v915_v30 = vmul.f32 %v5493_v28, %v5493_v28 }
 0x145   : > { %1000 = vadd.xlane.f32.xlu1 %v995_v22 }
 0x147   : > { %990 = vadd.xlane.f32.xlu0 %v5481_v23 }
 0x149   : > { %992 = vadd.xlane.f32.xlu1 %v5483_v24 }
 0x14b   : > { %1002 = vadd.xlane.f32.xlu0 %v996_v25 }
 0x14d   : > { %1004 = vadd.xlane.f32.xlu1 %v997_v27 }
 0x14f   : > { %906 = vadd.xlane.f32.xlu0 %v5489_v26 }
 0x151   : > { %908 = vadd.xlane.f32.xlu1 %v5493_v28 }
 0x153   : > { %918 = vadd.xlane.f32.xlu0 %v914_v29 }
 0x155   : > { %920 = vadd.xlane.f32.xlu1 %v915_v30  ;;  %v3969_v30 = vld [vmem:[%s5942_s11] ss:$0 sm:$0xff] }
 0x1cc   : > { %v987_v32 = vpop.xlane.xlu0 %986 }
 0x1cd   : > { %v1006_v33 = vmul.f32 0.125, %v987_v32 }
 0x1ce   : > { %v999_v34 = vpop.xlane.xlu1 %998 }
 0x1cf   : > { %v1014_v35 = vmul.f32 %v1006_v33, %v1006_v33  ;;  %v1010_v36 = vmul.f32 0.125, %v999_v34  ;;  %v1026_v2 = vsub.f32 %v5467_v11, %v1006_v33 }
 0x1d0   : > { %v989_v37 = vpop.xlane.xlu0 %988 }
 0x1d1   : > { %v1018_v38 = vsub.f32 %v1010_v36, %v1014_v35  ;;  %v1007_v39 = vmul.f32 0.125, %v989_v37 }
 0x1d2   : > { %v1001_v40 = vpop.xlane.xlu1 %1000 }
 0x1d3   : > { %v1022_v41 = vmax.f32 %v1018_v38, 0.0  ;;  %v1015_v42 = vmul.f32 %v1007_v39, %v1007_v39  ;;  %v1011_v43 = vmul.f32 0.125, %v1001_v40  ;;  %v1027_v18 = vsub.f32 %v5471_v17, %v1007_v39 }
 0x1d4   : > { %v991_v44 = vpop.xlane.xlu0 %990 }
 0x1d5   : > { %v1030_v45 = vadd.f32 1e-05, %v1022_v41  ;;  %v1019_v46 = vsub.f32 %v1011_v43, %v1015_v42  ;;  %v1008_v47 = vmul.f32 0.125, %v991_v44 }
 0x1d6   : > { %v993_v48 = vpop.xlane.xlu1 %992 }
 0x1d7   : > { %5042 = vrsqrt.f32 %v1030_v45  ;;  %v1023_v49 = vmax.f32 %v1019_v46, 0.0  ;;  %v1009_v50 = vmul.f32 0.125, %v993_v48  ;;  %v1016_v53 = vmul.f32 %v1008_v47, %v1008_v47 }
 0x1d8   : > { %v1003_v51 = vpop.xlane.xlu0 %1002  ;;  %v1028_v34 = vsub.f32 %v5481_v23, %v1008_v47 }
 0x1d9   : > { %v1031_v52 = vadd.f32 1e-05, %v1023_v49  ;;  %v1012_v54 = vmul.f32 0.125, %v1003_v51  ;;  %v1017_v56 = vmul.f32 %v1009_v50, %v1009_v50  ;;  %v1029_v17 = vsub.f32 %v5483_v24, %v1009_v50  ;;  %v5529_v24 = vld [vmem:[%s5939_s8] ss:$0 sm:$0xff] }
 0x1da   : > { %v1005_v55 = vpop.xlane.xlu1 %1004 }
 0x1db   : > { %5044 = vrsqrt.f32 %v1031_v52  ;;  %v1020_v57 = vsub.f32 %v1012_v54, %v1016_v53  ;;  %v1013_v58 = vmul.f32 0.125, %v1005_v55 }
 0x1dc   : > { %v907_v59 = vpop.xlane.xlu0 %906 }
 0x1dd   : > { %v1024_v60 = vmax.f32 %v1020_v57, 0.0  ;;  %v1021_v61 = vsub.f32 %v1013_v58, %v1017_v56  ;;  %v926_v62 = vmul.f32 0.125, %v907_v59 }
 0x1de   : > { %v909_v63 = vpop.xlane.xlu1 %908 }
 0x1df   : > { %v1032_v0 = vadd.f32 1e-05, %v1024_v60  ;;  %v1025_v1 = vmax.f32 %v1021_v61, 0.0  ;;  %v927_v3 = vmul.f32 0.125, %v909_v63  ;;  %v934_v7 = vmul.f32 %v926_v62, %v926_v62 }
 0x1e0   : > { %v919_v4 = vpop.xlane.xlu0 %918  ;;  %v946_v44 = vsub.f32 %v5489_v26, %v926_v62  ;;  %v5539_v26 = vld [vmem:[%s5940_s9] ss:$0 sm:$0xff] }
 0x1e1   : > { %v5043_v5 = vpop.eup %5042  ;;  %5046 = vrsqrt.f32 %v1032_v0  ;;  %v1033_v6 = vadd.f32 1e-05, %v1025_v1  ;;  %v930_v8 = vmul.f32 0.125, %v919_v4  ;;  %v935_v12 = vmul.f32 %v927_v3, %v927_v3  ;;  %v4894_v4 = vld [vmem:[%s5945_s14] sm:$0xff]  }
 0x1e2   : > { %v921_v9 = vpop.xlane.xlu1 %920  ;;  %v1038_v10 = vmul.f32 %v5043_v5, %v1026_v2  ;;  %v947_v47 = vsub.f32 %v5493_v28, %v927_v3  ;;  %v916_v2 = vmul.f32 %v5469_v15, %v5469_v15  ;;  %v917_v3 = vmul.f32 %v5476_v20, %v5476_v20  ;;  %4368 = vmatpush3.bf16.msra.mxu1 %v4894_v4  ;;  %v4895_v5 = vld [vmem:[%s5945_s14 + $0x8] sm:$0xff]  }
 0x1e3   : > { %5048 = vrsqrt.f32 %v1033_v6  ;;  %v938_v13 = vsub.f32 %v930_v8, %v934_v7  ;;  %v931_v14 = vmul.f32 0.125, %v921_v9  ;;  %4369 = vmatprep.subr.bf16.mxu1 %v5199_v31 }
 0x1e4   : > { %v1048_v25 = vmul.f32 %v3968_v16, %v1038_v10 }
 0x1e5   : > { %v5045_v11 = vpop.eup %5044  ;;  %v942_v19 = vmax.f32 %v938_v13, 0.0  ;;  %v939_v21 = vsub.f32 %v931_v14, %v935_v12 }
 0x1e6   : > { %v1039_v22 = vmul.f32 %v5045_v11, %v1027_v18  ;;  %v1058_v35 = vadd.f32 %v3969_v30, %v1048_v25  ;;  %4370 = vmatpush3.bf16.msra.mxu1 %v4895_v5 }
 0x1e7   : > { %v950_v27 = vadd.f32 1e-05, %v942_v19  ;;  %v943_v29 = vmax.f32 %v939_v21, 0.0  ;;  %4375 = vmatprep.subr.bf16.mxu1 %v5199_v31 }
 0x1e8   : > { %v1049_v32 = vmul.f32 %v3968_v16, %v1039_v22 }
 0x1e9   : > { %5050 = vrsqrt.f32 %v950_v27  ;;  %v951_v33 = vadd.f32 1e-05, %v943_v29 }
 0x1ea   : > { %v1059_v36 = vadd.f32 %v3969_v30, %v1049_v32 }
 0x1eb   : > { %v5047_v37 = vpop.eup %5046  ;;  %5052 = vrsqrt.f32 %v951_v33 }
 0x1ec   : > { %v5521_v38 = vpack.c.bf16 %v1059_v36, %v1058_v35  ;;  %v1040_v39 = vmul.f32 %v5047_v37, %v1028_v34 }
 0x1ed   : > { %v5049_v40 = vpop.eup %5048 }
 0x1ee   : > { %4360 = vmatpush3.bf16.xpose.msra.mxu0 %v5521_v38  ;;  %v1041_v41 = vmul.f32 %v5049_v40, %v1029_v17  ;;  %v1050_v42 = vmul.f32 %v3968_v16, %v1040_v39 }
 0x1ef   : > { %4361 = vmatprep.subr.bf16.mxu0 %v5199_v31 }
 0x1f0   : > { %v1051_v43 = vmul.f32 %v3968_v16, %v1041_v41  ;;  %v1060_v23 = vadd.f32 %v3969_v30, %v1050_v42 }
 0x1f2   : > { %v1061_v45 = vadd.f32 %v3969_v30, %v1051_v43 }
 0x1f3   : > { %v5051_v46 = vpop.eup %5050 }
 0x1f4   : > { %v5532_v48 = vpack.c.bf16 %v1061_v45, %v1060_v23  ;;  %v958_v49 = vmul.f32 %v5051_v46, %v946_v44 }
 0x1f5   : > { %v5053_v50 = vpop.eup %5052 }
 0x1f6   : > { %4362 = vmatpush3.bf16.xpose.msra.mxu0 %v5532_v48  ;;  %v959_v51 = vmul.f32 %v5053_v50, %v947_v47  ;;  %v968_v52 = vmul.f32 %v5529_v24, %v958_v49  ;;  %v5580_v47 = vld [vmem:[%s5943_s12] ss:$0 sm:$0xff] }
 0x1f7   : > { %4383 = vmatprep.subr.bf16.mxu0 %v5199_v31 }
 0x1f8   : > { %v969_v53 = vmul.f32 %v5529_v24, %v959_v51  ;;  %v978_v28 = vadd.f32 %v5539_v26, %v968_v52 }
 0x1fa   : > { %v979_v54 = vadd.f32 %v5539_v26, %v969_v53 }
 0x1fc   : > { %v982_v55 = vpack.c.bf16 %v979_v54, %v978_v28  ;;  %v5587_v28 = vld [vmem:[%s5944_s13] ss:$0 sm:$0xff] }
 0x1fe   : > { %4364 = vmatmul.mubr.bf16.vlgmr.msra.gmra.mrb[4].mxu0 %v982_v55 }
 0x1ff   : > { %4387 = vmatprep.mubr.msk.bf16.mxu0 %vm5200_vm3, %v5199_v31  ;;  %4384 = vmatpush3.bf16.msra.mxu0 %v4894_v4 }
 0x200   : > { %4385 = vmatprep.subr.bf16.mxu0 %v5199_v31 }
 0x203   : > { %4386 = vmatpush3.bf16.msra.mxu0 %v4895_v5 }
 0x2d1   : > { %v5547_v56 = vpop.f32.mrb[4].mxu0 }
 0x2d2   : > { %v4365_v57 = vpop.f32.mrb[5].mxu0  ;;  %v1116_v58 = vsel %vm1115_vm4, %v5547_v56, 0.0  ;;  %v1122_v59 = vmul.f32 %v5547_v56, %v5547_v56 }
 0x2d3   : > { %1117 = vadd.xlane.f32.xlu0 %v1116_v58  ;;  %v5553_v60 = vpop.f32.mrb[6].mxu0 }
 0x2d4   : > { %v4366_v61 = vpop.f32.mrb[7].mxu0  ;;  %v1119_v62 = vsel %vm1115_vm4, %v5553_v60, 0.0  ;;  %v1123_v63 = vmul.f32 %v5553_v60, %v5553_v60  ;;  %v1124_v0 = vsel %vm1115_vm4, %v1122_v59, 0.0 }
 0x2d5   : > { %1120 = vadd.xlane.f32.xlu1 %v1119_v62 }
 0x2d6   : > { %v1127_v1 = vsel %vm1115_vm4, %v1123_v63, 0.0 }
 0x2d7   : > { %1125 = vadd.xlane.f32.xlu0 %v1124_v0 }
 0x2d9   : > { %1128 = vadd.xlane.f32.xlu1 %v1127_v1 }
 0x2db   : > { %910 = vadd.xlane.f32.xlu0 %v5469_v15 }
 0x2dd   : > { %912 = vadd.xlane.f32.xlu1 %v5476_v20 }
 0x2df   : > { %922 = vadd.xlane.f32.xlu0 %v916_v2 }
 0x2e1   : > { %924 = vadd.xlane.f32.xlu1 %v917_v3 }
 0x360   : > { %v1118_v6 = vpop.xlane.xlu0 %1117 }
 0x361   : > { %v1130_v7 = vmul.f32 0.03125, %v1118_v6 }
 0x362   : > { %v1121_v8 = vpop.xlane.xlu1 %1120 }
 0x363   : > { %v1131_v9 = vmul.f32 0.03125, %v1121_v8  ;;  %v1134_v12 = vmul.f32 %v1130_v7, %v1130_v7  ;;  %v1140_v45 = vsub.f32 %v5547_v56, %v1130_v7 }
 0x364   : > { %v1126_v10 = vpop.xlane.xlu0 %1125 }
 0x365   : > { %v1132_v13 = vmul.f32 0.03125, %v1126_v10  ;;  %v1135_v16 = vmul.f32 %v1131_v9, %v1131_v9  ;;  %v1141_v49 = vsub.f32 %v5553_v60, %v1131_v9 }
 0x366   : > { %v1129_v14 = vpop.xlane.xlu1 %1128 }
 0x367   : > { %v1136_v18 = vsub.f32 %v1132_v13, %v1134_v12  ;;  %v1133_v11 = vmul.f32 0.03125, %v1129_v14 }
 0x368   : > { %v911_v19 = vpop.xlane.xlu0 %910 }
 0x369   : > { %v1138_v21 = vmax.f32 %v1136_v18, 0.0  ;;  %v1137_v22 = vsub.f32 %v1133_v11, %v1135_v16  ;;  %v928_v25 = vmul.f32 0.125, %v911_v19 }
 0x36a   : > { %v913_v27 = vpop.xlane.xlu1 %912 }
 0x36b   : > { %v1142_v29 = vadd.f32 1e-05, %v1138_v21  ;;  %v1139_v30 = vmax.f32 %v1137_v22, 0.0  ;;  %v929_v32 = vmul.f32 0.125, %v913_v27  ;;  %v936_v35 = vmul.f32 %v928_v25, %v928_v25  ;;  %v4896_v21 = vld [vmem:[#allocation4 + $0x40] sm:$0xff]  }
 0x36c   : > { %v923_v33 = vpop.xlane.xlu0 %922  ;;  %v948_v61 = vsub.f32 %v5469_v15, %v928_v25  ;;  %v5607_v15 = vld [vmem:[%s5946_s15] ss:$0 sm:$0xff]  ;;  %4391 = vmatprep.subr.bf16.mxu0 %v4896_v21 }
 0x36d   : > { %5054 = vrsqrt.f32 %v1142_v29  ;;  %v1143_v34 = vadd.f32 1e-05, %v1139_v30  ;;  %v932_v36 = vmul.f32 0.125, %v923_v33  ;;  %v937_v17 = vmul.f32 %v929_v32, %v929_v32 }
 0x36e   : > { %v925_v37 = vpop.xlane.xlu1 %924  ;;  %v949_v59 = vsub.f32 %v5476_v20, %v929_v32 }
 0x36f   : > { %5056 = vrsqrt.f32 %v1143_v34  ;;  %v940_v39 = vsub.f32 %v932_v36, %v936_v35  ;;  %v933_v40 = vmul.f32 0.125, %v925_v37 }
 0x371   : > { %v944_v41 = vmax.f32 %v940_v39, 0.0  ;;  %v941_v42 = vsub.f32 %v933_v40, %v937_v17 }
 0x373   : > { %v945_v43 = vmax.f32 %v941_v42, 0.0  ;;  %v952_v44 = vadd.f32 1e-05, %v944_v41 }
 0x375   : > { %v953_v23 = vadd.f32 1e-05, %v945_v43 }
 0x377   : > { %v5055_v46 = vpop.eup %5054  ;;  %5058 = vrsqrt.f32 %v953_v23 }
 0x378   : > { %v1146_v50 = vmul.f32 %v5055_v46, %v1140_v45  ;;  %5060 = vrsqrt.f32 %v952_v44 }
 0x379   : > { %v5057_v51 = vpop.eup %5056 }
 0x37a   : > { %v1147_v52 = vmul.f32 %v5057_v51, %v1141_v49  ;;  %v1154_v53 = vmul.f32 %v5580_v47, %v1146_v50 }
 0x37c   : > { %v1155_v54 = vmul.f32 %v5580_v47, %v1147_v52  ;;  %v1162_v55 = vadd.f32 %v5587_v28, %v1154_v53 }
 0x37e   : > { %v1163_v56 = vadd.f32 %v5587_v28, %v1155_v54 }
 0x380   : > { %v1164_v57 = vpack.c.bf16 %v1163_v56, %v1162_v55  ;;  %v4897_v55 = vld [vmem:[#allocation4 + $0x48] sm:$0xff]  }
 0x381   : > { %v5059_v58 = vpop.eup %5058 }
 0x382   : > { %4372 = vmatmul.mubr.msk.bf16.vlgmr.msra.gmra.mrb[4].mxu1 %vm1115_vm4, %v1164_v57  ;;  %v5061_v60 = vpop.eup %5060  ;;  %v961_v62 = vmul.f32 %v5059_v58, %v949_v59  ;;  %v4898_v57 = vld [vmem:[#allocation4 + $0x50] sm:$0xff]   ;;  %v4899_v58 = vld [vmem:[#allocation4 + $0x58] sm:$0xff]  }
 0x383   : > { %4376 = vmatpush3.bf16.xpose.msra.mxu1 %v5521_v38  ;;  %4379 = vmatprep.mubr.msk.bf16.mxu1 %vm5200_vm3, %v5199_v31  ;;  %v960_v63 = vmul.f32 %v5061_v60, %v948_v61  ;;  %v4902_v59 = vld [vmem:[#allocation4 + $0x70] sm:$0xff]   ;;  %v4903_v60 = vld [vmem:[#allocation4 + $0x78] sm:$0xff]   ;;  %v4904_v61 = vld [vmem:[#allocation4] sm:$0xff]  }
 0x384   : > { %4377 = vmatprep.subr.bf16.mxu1 %v5199_v31  ;;  %v971_v0 = vmul.f32 %v5529_v24, %v961_v62  ;;  %v1363_v62 = vlaneseq }
 0x385   : > { %v970_v1 = vmul.f32 %v5529_v24, %v960_v63 }
 0x386   : > { %v981_v20 = vadd.f32 %v5539_v26, %v971_v0  ;;  %v1364_v63 = vshrl.u32 %v1363_v62, 7 }
 0x387   : > { %v980_v2 = vadd.f32 %v5539_v26, %v970_v1 }
 0x388   : > { %v1365_v0 = vadd.s32 8, %v1364_v63  ;;  %v1372_v1 = vand.u32 7, %v1364_v63 }
 0x389   : > { %v983_v38 = vpack.c.bf16 %v981_v20, %v980_v2 }
 0x38a   : > { %v1379_v20 = vand.u32 7, %v1365_v0  ;;  %vm1416_vm5 = vcmp.gt.s32.totalorder %v1372_v1, 0  ;;  %vm1428_vm10 = vcmp.lt.s32.totalorder %v1372_v1, 7 }
 0x38b   : > { %4378 = vmatpush3.bf16.xpose.msra.mxu1 %v5532_v48  ;;  %v5629_v2 = vsel %vm1416_vm5, 1.0, %v5199_v31 }
 0x38c   : > { %vm1417_vm6 = vcmp.gt.s32.totalorder %v1379_v20, 0  ;;  %vm1429_vm8 = vcmp.lt.s32.totalorder %v1379_v20, 7 }
 0x392   : > { %4380 = vmatmul.mubr.bf16.vlgmr.msra.gmra.mrb[8].mxu1 %v983_v38  ;;  %v5632_v38 = vsel %vm1417_vm6, 1.0, %v5199_v31 }
 0x455   : > { %v1220_v3 = vpop.f32.mrb[4].mxu1 }
 0x456   : > { %v1221_v4 = vadd.f32 %v5607_v15, %v1220_v3  ;;  %v4373_v5 = vpop.f32.mrb[5].mxu1  ;;  %v1440_v3 = vld [vmem:[#allocation2 + $0x7] sm:$0xff] }
 0x457   : > { %v1223_v6 = vpop.f32.mrb[6].mxu1 }
 0x458   : > { %v5610_v7 = vmax.f32 %v1221_v4, 0.0  ;;  %v1224_v24 = vadd.f32 %v5607_v15, %v1223_v6  ;;  %v4374_v48 = vpop.f32.mrb[7].mxu1 }
 0x45a   : > { %1231 = vst [vmem:[#allocation2 + $0x10] sm:$0xff] %v5610_v7  ;;  %v5614_v26 = vmax.f32 %v1224_v24, 0.0  ;;  %v1470_v56 = vpack.c.bf16 %v5610_v7, %v5199_v31 }
 0x45c   : > { %1232 = vst [vmem:[#allocation2 + $0x18] sm:$0xff] %v5614_v26 }
 0x461   : > { %v5634_v4 = vld [vmem:[#allocation2 + $0xf] sm:$0xff] }
 0x462   : > { %v1813_v0 = vmul.f32 %v5629_v2, %v5634_v4 }
 0x465   : > { %v1269_v8 = vpop.f32.mrb[8].mxu1 }
 0x466   : > { %v4381_v9 = vpop.f32.mrb[9].mxu1  ;;  %v1276_v10 = vsel %vm1115_vm4, %v1269_v8, 0.0  ;;  %v1282_v12 = vmul.f32 %v1269_v8, %v1269_v8 }
 0x467   : > { %1277 = vadd.xlane.f32.xlu0 %v1276_v10  ;;  %v1272_v13 = vpop.f32.mrb[10].mxu1  ;;  %v1445_v9 = vmul.f32 %v5632_v38, %v5634_v4  ;;  %v4926_v4 = vld [vmem:[#allocation4 + $0xf0] sm:$0xff]  }
 0x468   : > { %v4382_v14 = vpop.f32.mrb[11].mxu1  ;;  %v1279_v16 = vsel %vm1115_vm4, %v1272_v13, 0.0  ;;  %v1283_v18 = vmul.f32 %v1272_v13, %v1272_v13  ;;  %v1284_v11 = vsel %vm1115_vm4, %v1282_v12, 0.0 }
 0x469   : > { %1280 = vadd.xlane.f32.xlu1 %v1279_v16 }
 0x46a   : > { %v1287_v19 = vsel %vm1115_vm4, %v1283_v18, 0.0  ;;  %v4905_v18 = vld [vmem:[#allocation4 + $0x8] sm:$0xff]  }
 0x46b   : > { %1285 = vadd.xlane.f32.xlu0 %v1284_v11 }
 0x46d   : > { %1288 = vadd.xlane.f32.xlu1 %v1287_v19 }
 0x4f4   : > { %v1278_v22 = vpop.xlane.xlu0 %1277 }
 0x4f5   : > { %v1290_v25 = vmul.f32 0.03125, %v1278_v22  ;;  %v4908_v22 = vld [vmem:[#allocation4 + $0x20] sm:$0xff]  }
 0x4f6   : > { %v1281_v27 = vpop.xlane.xlu1 %1280 }
 0x4f7   : > { %v1291_v29 = vmul.f32 0.03125, %v1281_v27  ;;  %v1294_v32 = vmul.f32 %v1290_v25, %v1290_v25  ;;  %v1300_v43 = vsub.f32 %v1269_v8, %v1290_v25  ;;  %v5638_v8 = vmul.f32 %v5629_v2, %v1440_v3  ;;  %v4909_v27 = vld [vmem:[#allocation4 + $0x28] sm:$0xff]   ;;  %v4922_v3 = vld [vmem:[#allocation4 + $0xd0] sm:$0xff]  }
 0x4f8   : > { %v1286_v30 = vpop.xlane.xlu0 %1285  ;;  %v1367_v25 = vadd.s32 24, %v1364_v63 }
 0x4f9   : > { %v1292_v33 = vmul.f32 0.03125, %v1286_v30  ;;  %v1295_v35 = vmul.f32 %v1291_v29, %v1291_v29  ;;  %v1301_v23 = vsub.f32 %v1272_v13, %v1291_v29  ;;  %v1448_v11 = vpack.c.bf16 %v1445_v9, %v5638_v8 }
 0x4fa   : > { %v1289_v34 = vpop.xlane.xlu1 %1288  ;;  %v1366_v29 = vadd.s32 16, %v1364_v63  ;;  %v1393_v30 = vand.u32 7, %v1367_v25  ;;  %v4931_v25 = vld [vmem:[#allocation4 + $0x118] sm:$0xff]  }
 0x4fb   : > { %v1296_v36 = vsub.f32 %v1292_v33, %v1294_v32  ;;  %v1293_v37 = vmul.f32 0.03125, %v1289_v34  ;;  %v4910_v32 = vld [vmem:[#allocation4 + $0x30] sm:$0xff]   ;;  %v4911_v34 = vld [vmem:[#allocation4 + $0x38] sm:$0xff]  }
 0x4fc   : > { %v1386_v33 = vand.u32 7, %v1366_v29  ;;  %vm1419_vm7 = vcmp.gt.s32.totalorder %v1393_v30, 0  ;;  %vm1431_vm11 = vcmp.lt.s32.totalorder %v1393_v30, 7  ;;  %v4933_v29 = vld [vmem:[#allocation4 + $0x128] sm:$0xff]   ;;  %v4934_v30 = vld [vmem:[#allocation4 + $0x130] sm:$0xff]  }
 0x4fd   : > { %v1298_v17 = vmax.f32 %v1296_v36, 0.0  ;;  %v1297_v39 = vsub.f32 %v1293_v37, %v1295_v35  ;;  %v5658_v35 = vsel %vm1419_vm7, 1.0, %v5199_v31  ;;  %v5663_v37 = vsel %vm1429_vm8, 1.0, %v5199_v31 }
 0x4fe   : > { %vm1418_vm9 = vcmp.gt.s32.totalorder %v1386_v33, 0  ;;  %vm1430_vm12 = vcmp.lt.s32.totalorder %v1386_v33, 7 }
 0x4ff   : > { %v1302_v40 = vadd.f32 1e-05, %v1298_v17  ;;  %v1299_v41 = vmax.f32 %v1297_v39, 0.0  ;;  %v5665_v17 = vld [vmem:[#allocation2 + $0x11] sm:$0xff]  ;;  %v5668_v39 = vsel %vm1418_vm9, 1.0, %v5199_v31 }
 0x501   : > { %5062 = vrsqrt.f32 %v1302_v40  ;;  %v1303_v42 = vadd.f32 1e-05, %v1299_v41  ;;  %v5670_v40 = vld [vmem:[#allocation2 + $0x17] sm:$0xff] }
 0x502   : > { %v1814_v62 = vmul.f32 %v5632_v38, %v5670_v40 }
 0x503   : > { %5064 = vrsqrt.f32 %v1303_v42  ;;  %v4912_v42 = vld [vmem:[#allocation4 + $0x80] sm:$0xff]  }
 0x504   : > { %v1817_v20 = vpack.c.bf16 %v1814_v62, %v1813_v0  ;;  %v4946_v62 = vld [vmem:[#allocation4 + $0x190] sm:$0xff]   ;;  %v4948_v0 = vld [vmem:[#allocation4 + $0x1a0] sm:$0xff]  }
 0x50b   : > { %v5063_v44 = vpop.eup %5062 }
 0x50c   : > { %v1306_v45 = vmul.f32 %v5063_v44, %v1300_v43  ;;  %v5675_v43 = vsel %vm1428_vm10, 1.0, %v5199_v31  ;;  %v1682_v44 = vld [vmem:[#allocation2 + $0x9] sm:$0xff] }
 0x50d   : > { %v5065_v46 = vpop.eup %5064  ;;  %v2063_v33 = vmul.f32 %v5675_v43, %v5665_v17 }
 0x50e   : > { %v1307_v49 = vmul.f32 %v5065_v46, %v1301_v23  ;;  %v1308_v50 = vmul.f32 %v5580_v47, %v1306_v45  ;;  %v1687_v23 = vmul.f32 %v5663_v37, %v5665_v17  ;;  %v1446_v45 = vmul.f32 %v5668_v39, %v5670_v40  ;;  %v4939_v17 = vld [vmem:[#allocation4 + $0x158] sm:$0xff]  }
 0x50f   : > { %v1686_v46 = vmul.f32 %v5675_v43, %v1682_v44  ;;  %v4969_v44 = vld [vmem:[#allocation7 + $0x48] sm:$0xff]  }
 0x510   : > { %v1309_v51 = vmul.f32 %v5580_v47, %v1307_v49  ;;  %v1310_v52 = vadd.f32 %v5587_v28, %v1308_v50  ;;  %v4900_v47 = vld [vmem:[#allocation4 + $0x60] sm:$0xff]   ;;  %v4913_v50 = vld [vmem:[#allocation4 + $0x88] sm:$0xff]  }
 0x512   : > { %v1311_v53 = vadd.f32 %v5587_v28, %v1309_v51  ;;  %v4901_v28 = vld [vmem:[#allocation4 + $0x68] sm:$0xff]   ;;  %v1690_v51 = vpack.c.bf16 %v1687_v23, %v1686_v46  ;;  %v4938_v23 = vld [vmem:[#allocation4 + $0x150] sm:$0xff]   ;;  %v4971_v46 = vld [vmem:[#allocation7 + $0x58] sm:$0xff]  }
 0x514   : > { %v1312_v54 = vpack.c.bf16 %v1311_v53, %v1310_v52  ;;  %v4914_v52 = vld [vmem:[#allocation4 + $0x90] sm:$0xff]   ;;  %v4915_v53 = vld [vmem:[#allocation4 + $0x98] sm:$0xff]  }
 0x516   : > { %4388 = vmatmul.mubr.msk.bf16.vlgmr.msra.gmra.mrb[8].mxu0 %vm1115_vm4, %v1312_v54  ;;  %v4916_v54 = vld [vmem:[#allocation4 + $0xa0] sm:$0xff]  }
 0x517   : > { %4407 = vmatprep.mubr.bf16.mxu0 %v1470_v56  ;;  %4392 = vmatpush3.bf16.msra.mxu0 %v4896_v21  ;;  %v4907_v21 = vld [vmem:[#allocation4 + $0x18] sm:$0xff]   ;;  %v4918_v56 = vld [vmem:[#allocation4 + $0xb0] sm:$0xff]  }
 0x518   : > { %4393 = vmatprep.subr.bf16.mxu0 %v4897_v55 }
 0x51b   : > { %4394 = vmatpush3.bf16.msra.mxu0 %v4897_v55  ;;  %v4917_v55 = vld [vmem:[#allocation4 + $0xa8] sm:$0xff]  }
 0x51c   : > { %4395 = vmatprep.subr.bf16.mxu0 %v4898_v57 }
 0x51f   : > { %4396 = vmatpush3.bf16.msra.mxu0 %v4898_v57  ;;  %v4919_v57 = vld [vmem:[#allocation4 + $0xb8] sm:$0xff]  }
 0x520   : > { %4397 = vmatprep.subr.bf16.mxu0 %v4899_v58 }
 0x523   : > { %4398 = vmatpush3.bf16.msra.mxu0 %v4899_v58  ;;  %v5683_v58 = vsel %vm1431_vm11, 1.0, %v5199_v31 }
 0x524   : > { %4399 = vmatprep.subr.bf16.mxu0 %v4900_v47 }
 0x527   : > { %4400 = vmatpush3.bf16.msra.mxu0 %v4900_v47 }
 0x528   : > { %4401 = vmatprep.subr.bf16.mxu0 %v4901_v28 }
 0x52b   : > { %4402 = vmatpush3.bf16.msra.mxu0 %v4901_v28  ;;  %v5688_v28 = vsel %vm1430_vm12, 1.0, %v5199_v31  ;;  %v4921_v31 = vld [vmem:[#allocation4 + $0xc8] sm:$0xff]  }
 0x52c   : > { %4403 = vmatprep.subr.bf16.mxu0 %v4902_v59 }
 0x52f   : > { %4404 = vmatpush3.bf16.msra.mxu0 %v4902_v59 }
 0x530   : > { %4405 = vmatprep.subr.bf16.mxu0 %v4903_v60 }
 0x533   : > { %4406 = vmatpush3.bf16.msra.mxu0 %v4903_v60 }
 0x534   : > { %4411 = vmatprep.subr.bf16.mxu0 %v4904_v61 }
 0x5e9   : > { %v1350_v5 = vpop.f32.mrb[8].mxu0 }
 0x5ea   : > { %v1351_v6 = vadd.f32 %v5607_v15, %v1350_v5  ;;  %v4389_v24 = vpop.f32.mrb[9].mxu0  ;;  %v4923_v5 = vld [vmem:[#allocation4 + $0xd8] sm:$0xff]  }
 0x5eb   : > { %v1353_v48 = vpop.f32.mrb[10].mxu0  ;;  %v4925_v24 = vld [vmem:[#allocation4 + $0xe8] sm:$0xff]  }
 0x5ec   : > { %v5642_v10 = vmax.f32 %v1351_v6, 0.0  ;;  %v1354_v12 = vadd.f32 %v5607_v15, %v1353_v48  ;;  %v4390_v13 = vpop.f32.mrb[11].mxu0  ;;  %v4906_v15 = vld [vmem:[#allocation4 + $0x10] sm:$0xff]   ;;  %v4924_v6 = vld [vmem:[#allocation4 + $0xe0] sm:$0xff]   ;;  %v4927_v48 = vld [vmem:[#allocation4 + $0xf8] sm:$0xff]  }
 0x5ed   : > { %v4928_v13 = vld [vmem:[#allocation4 + $0x100] sm:$0xff]  }
 0x5ee   : > { %1361 = vst [vmem:[#allocation2 + $0x20] sm:$0xff] %v5642_v10  ;;  %v5646_v14 = vmax.f32 %v1354_v12, 0.0  ;;  %v5650_v16 = vpack.c.bf16 %v5642_v10, %v5614_v26 }
 0x5f0   : > { %1362 = vst [vmem:[#allocation2 + $0x28] sm:$0xff] %v5646_v14  ;;  %4408 = vmatmul.mubr.bf16.vlgmr.msra.gmra.mrb[12].mxu0 %v5650_v16  ;;  %v1941_v19 = vpack.c.bf16 %v5646_v14, %v5642_v10  ;;  %v4940_v10 = vld [vmem:[#allocation4 + $0x160] sm:$0xff]  }
 0x5f1   : > { %4412 = vmatpush3.bf16.msra.mxu0 %v4904_v61  ;;  %4427 = vmatprep.mubr.bf16.mxu0 %v1448_v11  ;;  %v4920_v61 = vld [vmem:[#allocation4 + $0xc0] sm:$0xff]  }
 0x5f2   : > { %4413 = vmatprep.subr.bf16.mxu0 %v4905_v18 }
 0x5f5   : > { %4414 = vmatpush3.bf16.msra.mxu0 %v4905_v18  ;;  %v5660_v36 = vld [vmem:[#allocation2 + $0x1f] sm:$0xff] }
 0x5f6   : > { %4415 = vmatprep.subr.bf16.mxu0 %v4906_v15  ;;  %v1447_v41 = vmul.f32 %v5658_v35, %v5660_v36  ;;  %v5690_v59 = vld [vmem:[#allocation2 + $0x19] sm:$0xff]  ;;  %v1815_v18 = vmul.f32 %v5668_v39, %v5660_v36 }
 0x5f7   : > { %v5685_v47 = vld [vmem:[#allocation2 + $0x21] sm:$0xff]  ;;  %v1688_v63 = vmul.f32 %v5688_v28, %v5690_v59 }
 0x5f8   : > { %v1449_v49 = vpack.c.bf16 %v1447_v41, %v1446_v45  ;;  %v1689_v60 = vmul.f32 %v5683_v58, %v5685_v47  ;;  %v5700_v9 = vld [vmem:[#allocation2 + $0x27] sm:$0xff]  ;;  %v4970_v45 = vld [vmem:[#allocation7 + $0x50] sm:$0xff]  }
 0x5f9   : > { %4416 = vmatpush3.bf16.msra.mxu0 %v4906_v15  ;;  %v1816_v12 = vmul.f32 %v5658_v35, %v5700_v9  ;;  %v4929_v15 = vld [vmem:[#allocation4 + $0x108] sm:$0xff]  }
 0x5fa   : > { %4417 = vmatprep.subr.bf16.mxu0 %v4907_v21  ;;  %v1691_v1 = vpack.c.bf16 %v1689_v60, %v1688_v63  ;;  %v4945_v60 = vld [vmem:[#allocation4 + $0x188] sm:$0xff]   ;;  %v4947_v63 = vld [vmem:[#allocation4 + $0x198] sm:$0xff]  }
 0x5fb   : > { %v1818_v11 = vpack.c.bf16 %v1816_v12, %v1815_v18  ;;  %v4956_v12 = vld [vmem:[#allocation4 + $0x1e0] sm:$0xff]   ;;  %v4959_v18 = vld [vmem:[#allocation4 + $0x1f8] sm:$0xff]  }
 0x5fd   : > { %4418 = vmatpush3.bf16.msra.mxu0 %v4907_v21  ;;  %v1940_v21 = vpack.c.bf16 %v5614_v26, %v5610_v7  ;;  %v4935_v7 = vld [vmem:[#allocation4 + $0x138] sm:$0xff]   ;;  %v4936_v26 = vld [vmem:[#allocation4 + $0x140] sm:$0xff]  }
 0x5fe   : > { %4419 = vmatprep.subr.bf16.mxu0 %v4908_v22 }
 0x601   : > { %4420 = vmatpush3.bf16.msra.mxu0 %v4908_v22  ;;  %v4930_v22 = vld [vmem:[#allocation4 + $0x110] sm:$0xff]  }
 0x602   : > { %4421 = vmatprep.subr.bf16.mxu0 %v4909_v27 }
 0x605   : > { %4422 = vmatpush3.bf16.msra.mxu0 %v4909_v27  ;;  %v4932_v27 = vld [vmem:[#allocation4 + $0x120] sm:$0xff]  }
 0x606   : > { %4423 = vmatprep.subr.bf16.mxu0 %v4910_v32 }
 0x609   : > { %4424 = vmatpush3.bf16.msra.mxu0 %v4910_v32  ;;  %v2064_v32 = vmul.f32 %v5663_v37, %v5690_v59 }
 0x60a   : > { %4425 = vmatprep.subr.bf16.mxu0 %v4911_v34 }
 0x60b   : > { %v2067_v41 = vpack.c.bf16 %v2064_v32, %v2063_v33 }
 0x60d   : > { %4426 = vmatpush3.bf16.msra.mxu0 %v4911_v34  ;;  %v4937_v34 = vld [vmem:[#allocation4 + $0x148] sm:$0xff]  }
 0x60e   : > { %4431 = vmatprep.subr.bf16.mxu0 %v4912_v42 }
 0x610   : > { %4428 = vmatmul.mubr.bf16.vlgmr.msra.gmra.mrb[12].mxu0 %v1449_v49  ;;  %v4942_v49 = vld [vmem:[#allocation4 + $0x170] sm:$0xff]  }
 0x611   : > { %4432 = vmatpush3.bf16.msra.mxu0 %v4912_v42  ;;  %4447 = vmatprep.mubr.bf16.mxu0 %v1690_v51  ;;  %v4968_v42 = vld [vmem:[#allocation7 + $0x40] sm:$0xff]   ;;  %v5715_v51 = vld [vmem:[#allocation2 + $0x29] sm:$0xff] }
 0x612   : > { %4433 = vmatprep.subr.bf16.mxu0 %v4913_v50  ;;  %4571 = vmatprep.subr.bf16.mxu1 %v4968_v42  ;;  %v2442_v32 = vmul.f32 %v5688_v28, %v5715_v51 }
 0x613   : > { %4572 = vmatpush3.bf16.msra.mxu1 %v4968_v42  ;;  %v4973_v42 = vld [vmem:[#allocation7 + $0x68] sm:$0xff]  }
 0x614   : > { %4573 = vmatprep.subr.bf16.mxu1 %v4969_v44 }
 0x615   : > { %4434 = vmatpush3.bf16.msra.mxu0 %v4913_v50  ;;  %v4943_v50 = vld [vmem:[#allocation4 + $0x178] sm:$0xff]  }
 0x616   : > { %4435 = vmatprep.subr.bf16.mxu0 %v4914_v52 }
 0x617   : > { %4574 = vmatpush3.bf16.msra.mxu1 %v4969_v44  ;;  %v4974_v44 = vld [vmem:[#allocation7 + $0x70] sm:$0xff]  }
 0x618   : > { %4575 = vmatprep.subr.bf16.mxu1 %v4970_v45 }
 0x619   : > { %4436 = vmatpush3.bf16.msra.mxu0 %v4914_v52  ;;  %v2065_v52 = vmul.f32 %v5688_v28, %v5685_v47 }
 0x61a   : > { %4437 = vmatprep.subr.bf16.mxu0 %v4915_v53 }
 0x61b   : > { %4576 = vmatpush3.bf16.msra.mxu1 %v4970_v45  ;;  %v4976_v45 = vld [vmem:[#allocation7] sm:$0xff]  }
 0x61c   : > { %4577 = vmatprep.subr.bf16.mxu1 %v4971_v46 }
 0x61d   : > { %4438 = vmatpush3.bf16.msra.mxu0 %v4915_v53  ;;  %v2066_v53 = vmul.f32 %v5683_v58, %v5715_v51 }
 0x61e   : > { %4439 = vmatprep.subr.bf16.mxu0 %v4916_v54 }
 0x61f   : > { %4578 = vmatpush3.bf16.msra.mxu1 %v4971_v46 }
 0x621   : > { %4440 = vmatpush3.bf16.msra.mxu0 %v4916_v54  ;;  %v4944_v54 = vld [vmem:[#allocation4 + $0x180] sm:$0xff]  }
 0x622   : > { %4441 = vmatprep.subr.bf16.mxu0 %v4917_v55 }
 0x625   : > { %4442 = vmatpush3.bf16.msra.mxu0 %v4917_v55  ;;  %v2191_v55 = vmul.f32 %v5632_v38, %v5660_v36  ;;  %v4949_v36 = vld [vmem:[#allocation4 + $0x1a8] sm:$0xff]  }
 0x626   : > { %4443 = vmatprep.subr.bf16.mxu0 %v4918_v56 }
 0x629   : > { %4444 = vmatpush3.bf16.msra.mxu0 %v4918_v56  ;;  %v2190_v56 = vmul.f32 %v5629_v2, %v5670_v40  ;;  %v4950_v40 = vld [vmem:[#allocation4 + $0x1b0] sm:$0xff]  }
 0x62a   : > { %4445 = vmatprep.subr.bf16.mxu0 %v4919_v57 }
 0x62d   : > { %4446 = vmatpush3.bf16.msra.mxu0 %v4919_v57  ;;  %v2068_v57 = vpack.c.bf16 %v2066_v53, %v2065_v52 }
 0x62e   : > { %4451 = vmatprep.subr.bf16.mxu0 %v4920_v61 }
 0x630   : > { %4448 = vmatmul.mubr.bf16.vlgmr.msra.gmra.mrb[12].mxu0 %v1691_v1  ;;  %v4951_v1 = vld [vmem:[#allocation4 + $0x1b8] sm:$0xff]  }
 0x631   : > { %4452 = vmatpush3.bf16.msra.mxu0 %v4920_v61  ;;  %4467 = vmatprep.mubr.bf16.mxu0 %v1817_v20  ;;  %v2194_v61 = vpack.c.bf16 %v2191_v55, %v2190_v56  ;;  %v2192_v20 = vmul.f32 %v5668_v39, %v5700_v9  ;;  %v4957_v9 = vld [vmem:[#allocation4 + $0x1e8] sm:$0xff]  }
 0x632   : > { %4453 = vmatprep.subr.bf16.mxu0 %v4921_v31 }
 0x635   : > { %4454 = vmatpush3.bf16.msra.mxu0 %v4921_v31  ;;  %v2189_v31 = vld [vmem:[#allocation2 + $0x2f] sm:$0xff] }
 0x636   : > { %4455 = vmatprep.subr.bf16.mxu0 %v4922_v3 }
 0x639   : > { %4456 = vmatpush3.bf16.msra.mxu0 %v4922_v3  ;;  %v2193_v3 = vmul.f32 %v5658_v35, %v2189_v31  ;;  %v4977_v31 = vld [vmem:[#allocation7 + $0x8] sm:$0xff]  }
 0x63a   : > { %4457 = vmatprep.subr.bf16.mxu0 %v4923_v5 }
 0x63d   : > { %4458 = vmatpush3.bf16.msra.mxu0 %v4923_v5  ;;  %v4952_v5 = vld [vmem:[#allocation4 + $0x1c0] sm:$0xff]  }
 0x63e   : > { %4459 = vmatprep.subr.bf16.mxu0 %v4924_v6 }
 0x641   : > { %4460 = vmatpush3.bf16.msra.mxu0 %v4924_v6  ;;  %v2195_v6 = vpack.c.bf16 %v2193_v3, %v2192_v20  ;;  %v4978_v3 = vld [vmem:[#allocation7 + $0x10] sm:$0xff]  }
 0x642   : > { %4461 = vmatprep.subr.bf16.mxu0 %v4925_v24 }
 0x645   : > { %4462 = vmatpush3.bf16.msra.mxu0 %v4925_v24  ;;  %v4953_v24 = vld [vmem:[#allocation4 + $0x1c8] sm:$0xff]  }
 0x646   : > { %4463 = vmatprep.subr.bf16.mxu0 %v4926_v4 }
 0x649   : > { %4464 = vmatpush3.bf16.msra.mxu0 %v4926_v4  ;;  %v4954_v4 = vld [vmem:[#allocation4 + $0x1d0] sm:$0xff]  }
 0x64a   : > { %4465 = vmatprep.subr.bf16.mxu0 %v4927_v48 }
 0x64d   : > { %4466 = vmatpush3.bf16.msra.mxu0 %v4927_v48  ;;  %v4955_v48 = vld [vmem:[#allocation4 + $0x1d8] sm:$0xff]  }
 0x64e   : > { %4471 = vmatprep.subr.bf16.mxu0 %v4928_v13 }
 0x650   : > { %4468 = vmatmul.mubr.bf16.vlgmr.msra.gmra.mrb[12].mxu0 %v1818_v11  ;;  %v2441_v11 = vmul.f32 %v5663_v37, %v5685_v47  ;;  %v4963_v47 = vld [vmem:[#allocation4 + $0x218] sm:$0xff]  }
 0x651   : > { %4472 = vmatpush3.bf16.msra.mxu0 %v4928_v13  ;;  %4487 = vmatprep.mubr.bf16.mxu0 %v1940_v21  ;;  %v4958_v13 = vld [vmem:[#allocation4 + $0x1f0] sm:$0xff]   ;;  %v5733_v21 = vld [vmem:[#allocation2] sm:$0xff] }
 0x652   : > { %4473 = vmatprep.subr.bf16.mxu0 %v4929_v15 }
 0x655   : > { %4474 = vmatpush3.bf16.msra.mxu0 %v4929_v15  ;;  %v2440_v15 = vmul.f32 %v5675_v43, %v5690_v59  ;;  %v4965_v59 = vld [vmem:[#allocation4 + $0x228] sm:$0xff]  }
 0x656   : > { %4475 = vmatprep.subr.bf16.mxu0 %v4930_v22 }
 0x659   : > { %4476 = vmatpush3.bf16.msra.mxu0 %v4930_v22  ;;  %v2318_v22 = vpack.c.bf16 %v5733_v21, %v5646_v14  ;;  %v4966_v14 = vld [vmem:[#allocation4 + $0x230] sm:$0xff]  }
 0x65a   : > { %4477 = vmatprep.subr.bf16.mxu0 %v4931_v25 }
 0x65d   : > { %4478 = vmatpush3.bf16.msra.mxu0 %v4931_v25  ;;  %v4961_v25 = vld [vmem:[#allocation4 + $0x208] sm:$0xff]  }
 0x65e   : > { %4479 = vmatprep.subr.bf16.mxu0 %v4932_v27 }
 0x661   : > { %4480 = vmatpush3.bf16.msra.mxu0 %v4932_v27  ;;  %v2444_v27 = vpack.c.bf16 %v2441_v11, %v2440_v15  ;;  %v4980_v15 = vld [vmem:[#allocation7 + $0x20] sm:$0xff]  }
 0x662   : > { %4481 = vmatprep.subr.bf16.mxu0 %v4933_v29 }
 0x665   : > { %4482 = vmatpush3.bf16.msra.mxu0 %v4933_v29  ;;  %v4962_v29 = vld [vmem:[#allocation4 + $0x210] sm:$0xff]  }
 0x666   : > { %4483 = vmatprep.subr.bf16.mxu0 %v4934_v30 }
 0x669   : > { %4484 = vmatpush3.bf16.msra.mxu0 %v4934_v30  ;;  %v4964_v30 = vld [vmem:[#allocation4 + $0x220] sm:$0xff]  }
 0x66a   : > { %4485 = vmatprep.subr.bf16.mxu0 %v4935_v7 }
 0x66d   : > { %4486 = vmatpush3.bf16.msra.mxu0 %v4935_v7  ;;  %v4967_v7 = vld [vmem:[#allocation4 + $0x238] sm:$0xff]  }
 0x66e   : > { %4491 = vmatprep.subr.bf16.mxu0 %v4936_v26 }
 0x670   : > { %4488 = vmatmul.mubr.bf16.vlgmr.msra.gmra.mrb[12].mxu0 %v1941_v19  ;;  %v4941_v19 = vld [vmem:[#allocation4 + $0x168] sm:$0xff]  }
 0x671   : > { %4492 = vmatpush3.bf16.msra.mxu0 %v4936_v26  ;;  %4507 = vmatprep.mubr.bf16.mxu0 %v2067_v41  ;;  %v2439_v26 = vld [vmem:[#allocation2 + $0x31] sm:$0xff]  ;;  %v4972_v41 = vld [vmem:[#allocation7 + $0x60] sm:$0xff]  }
 0x672   : > { %4493 = vmatprep.subr.bf16.mxu0 %v4937_v34  ;;  %v5740_v33 = vmul.f32 %v5683_v58, %v2439_v26  ;;  %4579 = vmatprep.subr.bf16.mxu1 %v4972_v41 }
 0x673   : > { %4580 = vmatpush3.bf16.msra.mxu1 %v4972_v41 }
 0x674   : > { %4581 = vmatprep.subr.bf16.mxu1 %v4973_v42 }
 0x675   : > { %4494 = vmatpush3.bf16.msra.mxu0 %v4937_v34  ;;  %v2445_v34 = vpack.c.bf16 %v5740_v33, %v2442_v32 }
 0x676   : > { %4495 = vmatprep.subr.bf16.mxu0 %v4938_v23 }
 0x677   : > { %4582 = vmatpush3.bf16.msra.mxu1 %v4973_v42 }
 0x678   : > { %4583 = vmatprep.subr.bf16.mxu1 %v4974_v44 }
 0x679   : > { %4496 = vmatpush3.bf16.msra.mxu0 %v4938_v23  ;;  %v4975_v23 = vld [vmem:[#allocation7 + $0x78] sm:$0xff]  }
 0x67a   : > { %4497 = vmatprep.subr.bf16.mxu0 %v4939_v17 }
 0x67b   : > { %4584 = vmatpush3.bf16.msra.mxu1 %v4974_v44 }
 0x67c   : > { %4585 = vmatprep.subr.bf16.mxu1 %v4975_v23 }
 0x67d   : > { %4498 = vmatpush3.bf16.msra.mxu0 %v4939_v17  ;;  %v4057_v17 = vld [vmem:[%s5948_s17] ss:$0 sm:$0xff] }
 0x67e   : > { %4499 = vmatprep.subr.bf16.mxu0 %v4940_v10 }
 0x67f   : > { %4586 = vmatpush3.bf16.msra.mxu1 %v4975_v23 }
 0x680   : > { %4591 = vmatprep.subr.bf16.mxu1 %v4976_v45 }
 0x681   : > { %4500 = vmatpush3.bf16.msra.mxu0 %v4940_v10  ;;  %v4058_v10 = vld [vmem:[%s5949_s18] ss:$0 sm:$0xff] }
 0x682   : > { %4501 = vmatprep.subr.bf16.mxu0 %v4941_v19 }
 0x685   : > { %4502 = vmatpush3.bf16.msra.mxu0 %v4941_v19 }
 0x686   : > { %4503 = vmatprep.subr.bf16.mxu0 %v4942_v49 }
 0x689   : > { %4504 = vmatpush3.bf16.msra.mxu0 %v4942_v49 }
 0x68a   : > { %4505 = vmatprep.subr.bf16.mxu0 %v4943_v50 }
 0x68d   : > { %4506 = vmatpush3.bf16.msra.mxu0 %v4943_v50 }
 0x68e   : > { %4511 = vmatprep.subr.bf16.mxu0 %v4944_v54 }
 0x690   : > { %4508 = vmatmul.mubr.bf16.vlgmr.msra.gmra.mrb[12].mxu0 %v2068_v57 }
 0x691   : > { %4512 = vmatpush3.bf16.msra.mxu0 %v4944_v54  ;;  %4527 = vmatprep.mubr.bf16.mxu0 %v2194_v61 }
 0x692   : > { %4513 = vmatprep.subr.bf16.mxu0 %v4945_v60 }
 0x695   : > { %4514 = vmatpush3.bf16.msra.mxu0 %v4945_v60 }
 0x696   : > { %4515 = vmatprep.subr.bf16.mxu0 %v4946_v62 }
 0x699   : > { %4516 = vmatpush3.bf16.msra.mxu0 %v4946_v62 }
 0x69a   : > { %4517 = vmatprep.subr.bf16.mxu0 %v4947_v63 }
 0x69d   : > { %4518 = vmatpush3.bf16.msra.mxu0 %v4947_v63 }
 0x69e   : > { %4519 = vmatprep.subr.bf16.mxu0 %v4948_v0 }
 0x6a1   : > { %4520 = vmatpush3.bf16.msra.mxu0 %v4948_v0 }
 0x6a2   : > { %4521 = vmatprep.subr.bf16.mxu0 %v4949_v36 }
 0x6a5   : > { %4522 = vmatpush3.bf16.msra.mxu0 %v4949_v36 }
 0x6a6   : > { %4523 = vmatprep.subr.bf16.mxu0 %v4950_v40 }
 0x6a9   : > { %4524 = vmatpush3.bf16.msra.mxu0 %v4950_v40 }
 0x6aa   : > { %4525 = vmatprep.subr.bf16.mxu0 %v4951_v1 }
 0x6ad   : > { %4526 = vmatpush3.bf16.msra.mxu0 %v4951_v1 }
 0x6ae   : > { %4531 = vmatprep.subr.bf16.mxu0 %v4952_v5 }
 0x6b0   : > { %4528 = vmatmul.mubr.bf16.vlgmr.msra.gmra.mrb[12].mxu0 %v2195_v6 }
 0x6b1   : > { %4532 = vmatpush3.bf16.msra.mxu0 %v4952_v5  ;;  %4547 = vmatprep.mubr.bf16.mxu0 %v5650_v16  ;;  %v4960_v16 = vld [vmem:[#allocation4 + $0x200] sm:$0xff]  }
 0x6b2   : > { %4533 = vmatprep.subr.bf16.mxu0 %v4953_v24 }
 0x6b5   : > { %4534 = vmatpush3.bf16.msra.mxu0 %v4953_v24 }
 0x6b6   : > { %4535 = vmatprep.subr.bf16.mxu0 %v4954_v4 }
 0x6b9   : > { %4536 = vmatpush3.bf16.msra.mxu0 %v4954_v4 }
 0x6ba   : > { %4537 = vmatprep.subr.bf16.mxu0 %v4955_v48 }
 0x6bd   : > { %4538 = vmatpush3.bf16.msra.mxu0 %v4955_v48  ;;  %v4979_v48 = vld [vmem:[#allocation7 + $0x18] sm:$0xff]  }
 0x6be   : > { %4539 = vmatprep.subr.bf16.mxu0 %v4956_v12 }
 0x6c1   : > { %4540 = vmatpush3.bf16.msra.mxu0 %v4956_v12 }
 0x6c2   : > { %4541 = vmatprep.subr.bf16.mxu0 %v4957_v9 }
 0x6c5   : > { %4542 = vmatpush3.bf16.msra.mxu0 %v4957_v9 }
 0x6c6   : > { %4543 = vmatprep.subr.bf16.mxu0 %v4958_v13 }
 0x6c9   : > { %4544 = vmatpush3.bf16.msra.mxu0 %v4958_v13 }
 0x6ca   : > { %4545 = vmatprep.subr.bf16.mxu0 %v4959_v18 }
 0x6cd   : > { %4546 = vmatpush3.bf16.msra.mxu0 %v4959_v18 }
 0x6ce   : > { %4551 = vmatprep.subr.bf16.mxu0 %v4960_v16 }
 0x6d0   : > { %4548 = vmatmul.mubr.bf16.vlgmr.msra.gmra.mrb[12].mxu0 %v2318_v22 }
 0x6d1   : > { %4552 = vmatpush3.bf16.msra.mxu0 %v4960_v16  ;;  %4567 = vmatprep.mubr.bf16.mxu0 %v2444_v27 }
 0x6d2   : > { %4553 = vmatprep.subr.bf16.mxu0 %v4961_v25 }
 0x6d5   : > { %4554 = vmatpush3.bf16.msra.mxu0 %v4961_v25 }
 0x6d6   : > { %4555 = vmatprep.subr.bf16.mxu0 %v4962_v29 }
 0x6d9   : > { %4556 = vmatpush3.bf16.msra.mxu0 %v4962_v29 }
 0x6da   : > { %4557 = vmatprep.subr.bf16.mxu0 %v4963_v47 }
 0x6dd   : > { %4558 = vmatpush3.bf16.msra.mxu0 %v4963_v47 }
 0x6de   : > { %4559 = vmatprep.subr.bf16.mxu0 %v4964_v30 }
 0x6e1   : > { %4560 = vmatpush3.bf16.msra.mxu0 %v4964_v30 }
 0x6e2   : > { %4561 = vmatprep.subr.bf16.mxu0 %v4965_v59 }
 0x6e5   : > { %4562 = vmatpush3.bf16.msra.mxu0 %v4965_v59  ;;  %v4981_v59 = vld [vmem:[#allocation7 + $0x28] sm:$0xff]  }
 0x6e6   : > { %4563 = vmatprep.subr.bf16.mxu0 %v4966_v14 }
 0x6e9   : > { %4564 = vmatpush3.bf16.msra.mxu0 %v4966_v14  ;;  %v4982_v14 = vld [vmem:[#allocation7 + $0x30] sm:$0xff]  }
 0x6ea   : > { %4565 = vmatprep.subr.bf16.mxu0 %v4967_v7 }
 0x6ed   : > { %4566 = vmatpush3.bf16.msra.mxu0 %v4967_v7  ;;  %v4983_v7 = vld [vmem:[#allocation7 + $0x38] sm:$0xff]  }
 0x6f0   : > { %4568 = vmatmul.mubr.bf16.vlgmr.msra.gmra.mrb[12].mxu0 %v2445_v34  ;;  %v4984_v34 = vld [vmem:[#allocation7 + $0x80] sm:$0xff]  }
 0x7c3   : > { %v4569_v46 = vpop.f32.mrb[12].mxu0 }
 0x7c4   : > { %v2572_v19 = vmul.f32 %v4569_v46, %v4057_v17  ;;  %v2544_v49 = vpop.f32.mrb[13].mxu0  ;;  %v4986_v46 = vld [vmem:[#allocation7 + $0x90] sm:$0xff]  }
 0x7c5   : > { %v2570_v50 = vmul.f32 %v4057_v17, %v2544_v49  ;;  %v4570_v51 = vpop.f32.mrb[14].mxu0  ;;  %v4991_v49 = vld [vmem:[#allocation7 + $0xb8] sm:$0xff]  }
 0x7c6   : > { %v2583_v52 = vadd.f32 %v4058_v10, %v2572_v19  ;;  %v2573_v53 = vmul.f32 %v4570_v51, %v4057_v17  ;;  %v2547_v54 = vpop.f32.mrb[15].mxu0  ;;  %v4988_v19 = vld [vmem:[#allocation7 + $0xa0] sm:$0xff]  }
 0x7c7   : > { %v2581_v55 = vadd.f32 %v4058_v10, %v2570_v50  ;;  %v2571_v56 = vmul.f32 %v4057_v17, %v2547_v54 }
 0x7c8   : > { %v5749_v57 = vmax.f32 %v2583_v52, 0.0  ;;  %v2584_v60 = vadd.f32 %v4058_v10, %v2573_v53  ;;  %v4992_v52 = vld [vmem:[#allocation7 + $0xc0] sm:$0xff]  }
 0x7c9   : > { %v5751_v61 = vmax.f32 %v2581_v55, 0.0  ;;  %v2582_v62 = vadd.f32 %v4058_v10, %v2571_v56  ;;  %v4987_v10 = vld [vmem:[#allocation7 + $0x98] sm:$0xff]   ;;  %v4993_v56 = vld [vmem:[#allocation7 + $0xc8] sm:$0xff]  }
 0x7ca   : > { %2591 = vst [vmem:[#allocation2 + $0x20] sm:$0xff] %v5749_v57  ;;  %v5754_v63 = vmax.f32 %v2584_v60, 0.0 }
 0x7cb   : > { %2589 = vst [vmem:[#allocation2 + $0x10] sm:$0xff] %v5751_v61  ;;  %v5757_v0 = vmax.f32 %v2582_v62, 0.0  ;;  %v2623_v36 = vpack.c.bf16 %v5751_v61, %v5733_v21  ;;  %v4994_v62 = vld [vmem:[#allocation7 + $0xd0] sm:$0xff]  }
 0x7cc   : > { %2592 = vst [vmem:[#allocation2 + $0x28] sm:$0xff] %v5754_v63  ;;  %v3094_v40 = vpack.c.bf16 %v5754_v63, %v5749_v57 }
 0x7cd   : > { %2590 = vst [vmem:[#allocation2 + $0x18] sm:$0xff] %v5757_v0  ;;  %4587 = vmatprep.mubr.bf16.mxu1 %v2623_v36  ;;  %v5767_v1 = vpack.c.bf16 %v5749_v57, %v5757_v0  ;;  %v3093_v20 = vpack.c.bf16 %v5757_v0, %v5751_v61  ;;  %v4995_v36 = vld [vmem:[#allocation7 + $0xd8] sm:$0xff]   ;;  %v3742_v0 = vld [vmem:[%s5996_s5] sm:$0xf]  ;;  %v5014_v57 = vld [vmem:[#allocation7 + $0x170] sm:$0xff]  }
 0x7ce   : > { %v5007_v61 = vld [vmem:[#allocation7 + $0x138] sm:$0xff]   ;;  %4822 = vmatprep.subr.msk.bf16.mxu0 %vm766_vm1, %v3742_v0 }
 0x7cf   : > { %4588 = vmatmul.mubr.bf16.vlgmr.msra.gmra.mrb[12].mxu1 %v5767_v1 }
 0x7d0   : > { %4592 = vmatpush3.bf16.msra.mxu1 %v4976_v45  ;;  %v4985_v45 = vld [vmem:[#allocation7 + $0x88] sm:$0xff]  }
 0x7d1   : > { %4593 = vmatprep.subr.bf16.mxu1 %v4977_v31 }
 0x7d2   : > { %v5772_v5 = vld [vmem:[#allocation2 + $0xf] sm:$0xff] }
 0x7d3   : > { %v2598_v6 = vmul.f32 %v5632_v38, %v5772_v5  ;;  %v5784_v16 = vld [vmem:[#allocation2 + $0x21] sm:$0xff]  ;;  %v2835_v41 = vld [vmem:[#allocation2 + $0x9] sm:$0xff]  ;;  %v2966_v54 = vmul.f32 %v5629_v2, %v5772_v5 }
 0x7d4   : > { %4594 = vmatpush3.bf16.msra.mxu1 %v4977_v31  ;;  %v2836_v24 = vld [vmem:[#allocation2 + $0x11] sm:$0xff]  ;;  %v2837_v9 = vld [vmem:[#allocation2 + $0x19] sm:$0xff]  ;;  %v5804_v29 = vmul.f32 %v5663_v37, %v5784_v16  ;;  %v2839_v44 = vmul.f32 %v5675_v43, %v2835_v41  ;;  %v2842_v51 = vmul.f32 %v5683_v58, %v5784_v16  ;;  %v5823_v5 = vld [vmem:[#allocation2 + $0x27] sm:$0xff] }
 0x7d5   : > { %v2601_v4 = vpack.c.bf16 %v2598_v6, %v5638_v8  ;;  %4595 = vmatprep.subr.bf16.mxu1 %v4978_v3  ;;  %v5777_v12 = vld [vmem:[#allocation2 + $0x17] sm:$0xff]  ;;  %v5779_v13 = vld [vmem:[#allocation2 + $0x1f] sm:$0xff]  ;;  %v5782_v18 = vmul.f32 %v5675_v43, %v2836_v24  ;;  %v5787_v11 = vmul.f32 %v5663_v37, %v2837_v9  ;;  %v5800_v27 = vmul.f32 %v5675_v43, %v2837_v9 }
 0x7d6   : > { %v5791_v8 = vmul.f32 %v5629_v2, %v5777_v12  ;;  %v5797_v25 = vmul.f32 %v5632_v38, %v5779_v13  ;;  %v2599_v26 = vmul.f32 %v5668_v39, %v5777_v12  ;;  %v2600_v32 = vmul.f32 %v5658_v35, %v5779_v13  ;;  %v4990_v43 = vld [vmem:[#allocation7 + $0xb0] sm:$0xff]   ;;  %v4996_v31 = vld [vmem:[#allocation7 + $0xe0] sm:$0xff]  }
 0x7d7   : > { %4607 = vmatprep.mubr.bf16.mxu1 %v2601_v4  ;;  %v3220_v22 = vpack.c.bf16 %v5787_v11, %v5782_v18  ;;  %v3597_v30 = vpack.c.bf16 %v5804_v29, %v5800_v27  ;;  %v2840_v42 = vmul.f32 %v5663_v37, %v2836_v24  ;;  %v4989_v37 = vld [vmem:[#allocation7 + $0xa8] sm:$0xff]   ;;  %v2841_v50 = vmul.f32 %v5688_v28, %v2837_v9  ;;  %v4998_v2 = vld [vmem:[#allocation7 + $0xf0] sm:$0xff]   ;;  %v5000_v4 = vld [vmem:[#allocation7 + $0x100] sm:$0xff]  }
 0x7d8   : > { %4596 = vmatpush3.bf16.msra.mxu1 %v4978_v3  ;;  %v3347_v47 = vpack.c.bf16 %v5797_v25, %v5791_v8  ;;  %v2602_v23 = vpack.c.bf16 %v2600_v32, %v2599_v26  ;;  %v2967_v53 = vmul.f32 %v5632_v38, %v5777_v12  ;;  %v4997_v38 = vld [vmem:[#allocation7 + $0xe8] sm:$0xff]   ;;  %v4999_v3 = vld [vmem:[#allocation7 + $0xf8] sm:$0xff]   ;;  %v2968_v6 = vmul.f32 %v5668_v39, %v5779_v13  ;;  %v5002_v9 = vld [vmem:[#allocation7 + $0x110] sm:$0xff]  }
 0x7d9   : > { %4597 = vmatprep.subr.bf16.mxu1 %v4979_v48  ;;  %v2843_v17 = vpack.c.bf16 %v2840_v42, %v2839_v44  ;;  %v2844_v55 = vpack.c.bf16 %v2842_v51, %v2841_v50  ;;  %v2969_v24 = vmul.f32 %v5658_v35, %v5823_v5  ;;  %v5001_v12 = vld [vmem:[#allocation7 + $0x108] sm:$0xff]   ;;  %v5004_v13 = vld [vmem:[#allocation7 + $0x120] sm:$0xff]   ;;  %v5010_v41 = vld [vmem:[#allocation7 + $0x150] sm:$0xff]   ;;  %v3218_v18 = vmul.f32 %v5688_v28, %v5784_v16 }
 0x7da   : > { %v2970_v60 = vpack.c.bf16 %v2967_v53, %v2966_v54  ;;  %v5040_v26 = vld [vmem:[%s5450_s27] sm:$0xff]   ;;  %v5041_v32 = vld [vmem:[%s5450_s27 + $0x8] sm:$0xff]   ;;  %v5011_v42 = vld [vmem:[#allocation7 + $0x158] sm:$0xff]   ;;  %v3345_v8 = vmul.f32 %v5668_v39, %v5823_v5 }
 0x7db   : > { %4753 = vmatprep.mubr.msk.bf16.mxu0 %vm759_vm2, %v5040_v26  ;;  %v5012_v44 = vld [vmem:[#allocation7 + $0x160] sm:$0xff]   ;;  %v5025_v51 = vld [vmem:[#allocation7 + $0x1c8] sm:$0xff]   ;;  %v5027_v53 = vld [vmem:[#allocation7 + $0x1d8] sm:$0xff]  }
 0x7dc   : > { %4598 = vmatpush3.bf16.msra.mxu1 %v4979_v48  ;;  %v2971_v48 = vpack.c.bf16 %v2969_v24, %v2968_v6  ;;  %v5020_v16 = vld [vmem:[#allocation7 + $0x1a0] sm:$0xff]   ;;  %v5030_v39 = vld [vmem:[#allocation7 + $0x1f0] sm:$0xff]  }
 0x7dd   : > { %4599 = vmatprep.subr.bf16.mxu1 %v4980_v15  ;;  %v5028_v54 = vld [vmem:[#allocation7 + $0x1e0] sm:$0xff]  }
 0x7de   : > { %v4133_v6 = vld [vmem:[%s5997_s29] ss:$0 sm:$0xff]  ;;  %s5886_s29 = scalar_lea.hbm %s6000_s26, %s4145_s0 }
 0x7df   : > { %v4131_v24 = vld [vmem:[%s5951_s20] ss:$0 sm:$0xff] }
 0x7e0   : > { %4600 = vmatpush3.bf16.msra.mxu1 %v4980_v15  ;;  %v5003_v15 = vld [vmem:[#allocation7 + $0x118] sm:$0xff]  }
 0x7e1   : > { %4601 = vmatprep.subr.bf16.mxu1 %v4981_v59 }
 0x7e4   : > { %4602 = vmatpush3.bf16.msra.mxu1 %v4981_v59  ;;  %v5005_v59 = vld [vmem:[#allocation7 + $0x128] sm:$0xff]  }
 0x7e5   : > { %4603 = vmatprep.subr.bf16.mxu1 %v4982_v14 }
 0x7e8   : > { %4604 = vmatpush3.bf16.msra.mxu1 %v4982_v14  ;;  %v5006_v14 = vld [vmem:[#allocation7 + $0x130] sm:$0xff]  }
 0x7e9   : > { %4605 = vmatprep.subr.bf16.mxu1 %v4983_v7 }
 0x7ec   : > { %4606 = vmatpush3.bf16.msra.mxu1 %v4983_v7  ;;  %v3767_v7 = vsel %vm766_vm1, %v3742_v0, 0 }
 0x7ed   : > { %4611 = vmatprep.subr.bf16.mxu1 %v4984_v34  ;;  %4752 = vmatpush3.bf16.msra.mxu0 %v3767_v7 }
 0x7ef   : > { %4608 = vmatmul.mubr.bf16.vlgmr.msra.gmra.mrb[12].mxu1 %v2602_v23  ;;  %v5013_v23 = vld [vmem:[#allocation7 + $0x168] sm:$0xff]  }
 0x7f0   : > { %4612 = vmatpush3.bf16.msra.mxu1 %v4984_v34  ;;  %4627 = vmatprep.mubr.bf16.mxu1 %v2843_v17  ;;  %v5009_v34 = vld [vmem:[#allocation7 + $0x148] sm:$0xff]  }
 0x7f1   : > { %4613 = vmatprep.subr.bf16.mxu1 %v4985_v45  ;;  %4754 = vmatmul.mubr.msk.bf16.vlgmr.msra.gmra.mrb[16].mxu0 %vm759_vm2, %v5041_v32 }
 0x7f4   : > { %4614 = vmatpush3.bf16.msra.mxu1 %v4985_v45  ;;  %v5847_v45 = vld [vmem:[#allocation2 + $0x29] sm:$0xff] }
 0x7f5   : > { %4615 = vmatprep.subr.bf16.mxu1 %v4986_v46  ;;  %v3219_v11 = vmul.f32 %v5683_v58, %v5847_v45  ;;  %v5021_v58 = vld [vmem:[#allocation7 + $0x1a8] sm:$0xff]   ;;  %v3595_v27 = vmul.f32 %v5688_v28, %v5847_v45  ;;  %v4132_v28 = vld [vmem:[%s5998_s2] ss:$0 sm:$0xff] }
 0x7f7   : > { %v3221_v17 = vpack.c.bf16 %v3219_v11, %v3218_v18  ;;  %v3598_v29 = vpack.c.bf16 %v5740_v33, %v3595_v27 }
 0x7f8   : > { %4616 = vmatpush3.bf16.msra.mxu1 %v4986_v46  ;;  %v5017_v46 = vld [vmem:[#allocation7 + $0x188] sm:$0xff]  }
 0x7f9   : > { %4617 = vmatprep.subr.bf16.mxu1 %v4987_v10 }
 0x7fc   : > { %4618 = vmatpush3.bf16.msra.mxu1 %v4987_v10  ;;  %v5018_v10 = vld [vmem:[#allocation7 + $0x190] sm:$0xff]  }
 0x7fd   : > { %4619 = vmatprep.subr.bf16.mxu1 %v4988_v19 }
 0x800   : > { %4620 = vmatpush3.bf16.msra.mxu1 %v4988_v19  ;;  %v5019_v19 = vld [vmem:[#allocation7 + $0x198] sm:$0xff]  }
 0x801   : > { %4621 = vmatprep.subr.bf16.mxu1 %v4989_v37 }
 0x804   : > { %4622 = vmatpush3.bf16.msra.mxu1 %v4989_v37  ;;  %v5022_v37 = vld [vmem:[#allocation7 + $0x1b0] sm:$0xff]  }
 0x805   : > { %4623 = vmatprep.subr.bf16.mxu1 %v4990_v43 }
 0x808   : > { %4624 = vmatpush3.bf16.msra.mxu1 %v4990_v43  ;;  %v5023_v43 = vld [vmem:[#allocation7 + $0x1b8] sm:$0xff]  }
 0x809   : > { %4625 = vmatprep.subr.bf16.mxu1 %v4991_v49 }
 0x80c   : > { %4626 = vmatpush3.bf16.msra.mxu1 %v4991_v49  ;;  %v3342_v49 = vld [vmem:[#allocation2 + $0x2f] sm:$0xff] }
 0x80d   : > { %4631 = vmatprep.subr.bf16.mxu1 %v4992_v52  ;;  %v3346_v25 = vmul.f32 %v5658_v35, %v3342_v49  ;;  %v5029_v35 = vld [vmem:[#allocation7 + $0x1e8] sm:$0xff]  }
 0x80f   : > { %4628 = vmatmul.mubr.bf16.vlgmr.msra.gmra.mrb[12].mxu1 %v2844_v55  ;;  %v3348_v50 = vpack.c.bf16 %v3346_v25, %v3345_v8  ;;  %v5031_v55 = vld [vmem:[#allocation7 + $0x1f8] sm:$0xff]  }
 0x810   : > { %4632 = vmatpush3.bf16.msra.mxu1 %v4992_v52  ;;  %4647 = vmatprep.mubr.bf16.mxu1 %v2970_v60  ;;  %v5026_v52 = vld [vmem:[#allocation7 + $0x1d0] sm:$0xff]   ;;  %v5033_v60 = vld [vmem:[#allocation7 + $0x208] sm:$0xff]  }
 0x811   : > { %4633 = vmatprep.subr.bf16.mxu1 %v4993_v56 }
 0x814   : > { %4634 = vmatpush3.bf16.msra.mxu1 %v4993_v56  ;;  %v3471_v56 = vpack.c.bf16 %v5733_v21, %v5754_v63  ;;  %v5038_v21 = vld [vmem:[#allocation7 + $0x230] sm:$0xff]   ;;  %v5039_v63 = vld [vmem:[#allocation7 + $0x238] sm:$0xff]  }
 0x815   : > { %4635 = vmatprep.subr.bf16.mxu1 %v4994_v62 }
 0x818   : > { %4636 = vmatpush3.bf16.msra.mxu1 %v4994_v62  ;;  %v5034_v62 = vld [vmem:[#allocation7 + $0x210] sm:$0xff]  }
 0x819   : > { %4637 = vmatprep.subr.bf16.mxu1 %v4995_v36 }
 0x81c   : > { %4638 = vmatpush3.bf16.msra.mxu1 %v4995_v36  ;;  %v5035_v36 = vld [vmem:[#allocation7 + $0x218] sm:$0xff]  }
 0x81d   : > { %4639 = vmatprep.subr.bf16.mxu1 %v4996_v31 }
 0x820   : > { %4640 = vmatpush3.bf16.msra.mxu1 %v4996_v31  ;;  %v5036_v31 = vld [vmem:[#allocation7 + $0x220] sm:$0xff]  }
 0x821   : > { %4641 = vmatprep.subr.bf16.mxu1 %v4997_v38 }
 0x824   : > { %4642 = vmatpush3.bf16.msra.mxu1 %v4997_v38  ;;  %v5037_v38 = vld [vmem:[#allocation7 + $0x228] sm:$0xff]  }
 0x825   : > { %4643 = vmatprep.subr.bf16.mxu1 %v4998_v2 }
 0x828   : > { %4644 = vmatpush3.bf16.msra.mxu1 %v4998_v2 }
 0x829   : > { %4645 = vmatprep.subr.bf16.mxu1 %v4999_v3 }
 0x82c   : > { %4646 = vmatpush3.bf16.msra.mxu1 %v4999_v3 }
 0x82d   : > { %4651 = vmatprep.subr.bf16.mxu1 %v5000_v4 }
 0x82f   : > { %4648 = vmatmul.mubr.bf16.vlgmr.msra.gmra.mrb[12].mxu1 %v2971_v48 }
 0x830   : > { %4652 = vmatpush3.bf16.msra.mxu1 %v5000_v4  ;;  %4667 = vmatprep.mubr.bf16.mxu1 %v3093_v20  ;;  %v5008_v20 = vld [vmem:[#allocation7 + $0x140] sm:$0xff]  }
 0x831   : > { %4653 = vmatprep.subr.bf16.mxu1 %v5001_v12 }
 0x834   : > { %4654 = vmatpush3.bf16.msra.mxu1 %v5001_v12 }
 0x835   : > { %4655 = vmatprep.subr.bf16.mxu1 %v5002_v9 }
 0x838   : > { %4656 = vmatpush3.bf16.msra.mxu1 %v5002_v9 }
 0x839   : > { %4657 = vmatprep.subr.bf16.mxu1 %v5003_v15 }
 0x83c   : > { %4658 = vmatpush3.bf16.msra.mxu1 %v5003_v15 }
 0x83d   : > { %4659 = vmatprep.subr.bf16.mxu1 %v5004_v13 }
 0x840   : > { %4660 = vmatpush3.bf16.msra.mxu1 %v5004_v13 }
 0x841   : > { %4661 = vmatprep.subr.bf16.mxu1 %v5005_v59 }
 0x844   : > { %4662 = vmatpush3.bf16.msra.mxu1 %v5005_v59 }
 0x845   : > { %4663 = vmatprep.subr.bf16.mxu1 %v5006_v14 }
 0x848   : > { %4664 = vmatpush3.bf16.msra.mxu1 %v5006_v14 }
 0x849   : > { %4665 = vmatprep.subr.bf16.mxu1 %v5007_v61 }
 0x84c   : > { %4666 = vmatpush3.bf16.msra.mxu1 %v5007_v61 }
 0x84d   : > { %4671 = vmatprep.subr.bf16.mxu1 %v5008_v20 }
 0x84f   : > { %4668 = vmatmul.mubr.bf16.vlgmr.msra.gmra.mrb[12].mxu1 %v3094_v40  ;;  %v5015_v40 = vld [vmem:[#allocation7 + $0x178] sm:$0xff]  }
 0x850   : > { %4672 = vmatpush3.bf16.msra.mxu1 %v5008_v20  ;;  %4687 = vmatprep.mubr.bf16.mxu1 %v3220_v22  ;;  %v5016_v22 = vld [vmem:[#allocation7 + $0x180] sm:$0xff]  }
 0x851   : > { %4673 = vmatprep.subr.bf16.mxu1 %v5009_v34 }
 0x854   : > { %4674 = vmatpush3.bf16.msra.mxu1 %v5009_v34 }
 0x855   : > { %4675 = vmatprep.subr.bf16.mxu1 %v5010_v41 }
 0x858   : > { %4676 = vmatpush3.bf16.msra.mxu1 %v5010_v41 }
 0x859   : > { %4677 = vmatprep.subr.bf16.mxu1 %v5011_v42 }
 0x85c   : > { %4678 = vmatpush3.bf16.msra.mxu1 %v5011_v42 }
 0x85d   : > { %4679 = vmatprep.subr.bf16.mxu1 %v5012_v44 }
 0x860   : > { %4680 = vmatpush3.bf16.msra.mxu1 %v5012_v44 }
 0x861   : > { %4681 = vmatprep.subr.bf16.mxu1 %v5013_v23 }
 0x864   : > { %4682 = vmatpush3.bf16.msra.mxu1 %v5013_v23 }
 0x865   : > { %4683 = vmatprep.subr.bf16.mxu1 %v5014_v57 }
 0x868   : > { %4684 = vmatpush3.bf16.msra.mxu1 %v5014_v57 }
 0x869   : > { %4685 = vmatprep.subr.bf16.mxu1 %v5015_v40 }
 0x86c   : > { %4686 = vmatpush3.bf16.msra.mxu1 %v5015_v40 }
 0x86d   : > { %4691 = vmatprep.subr.bf16.mxu1 %v5016_v22 }
 0x86f   : > { %4688 = vmatmul.mubr.bf16.vlgmr.msra.gmra.mrb[12].mxu1 %v3221_v17 }
 0x870   : > { %4692 = vmatpush3.bf16.msra.mxu1 %v5016_v22  ;;  %4707 = vmatprep.mubr.bf16.mxu1 %v3347_v47  ;;  %v5024_v47 = vld [vmem:[#allocation7 + $0x1c0] sm:$0xff]  }
 0x871   : > { %4693 = vmatprep.subr.bf16.mxu1 %v5017_v46 }
 0x874   : > { %4694 = vmatpush3.bf16.msra.mxu1 %v5017_v46 }
 0x875   : > { %4695 = vmatprep.subr.bf16.mxu1 %v5018_v10 }
 0x878   : > { %4696 = vmatpush3.bf16.msra.mxu1 %v5018_v10 }
 0x879   : > { %4697 = vmatprep.subr.bf16.mxu1 %v5019_v19 }
 0x87c   : > { %4698 = vmatpush3.bf16.msra.mxu1 %v5019_v19 }
 0x87d   : > { %4699 = vmatprep.subr.bf16.mxu1 %v5020_v16 }
 0x880   : > { %4700 = vmatpush3.bf16.msra.mxu1 %v5020_v16 }
 0x881   : > { %4701 = vmatprep.subr.bf16.mxu1 %v5021_v58 }
 0x884   : > { %4702 = vmatpush3.bf16.msra.mxu1 %v5021_v58 }
 0x885   : > { %4703 = vmatprep.subr.bf16.mxu1 %v5022_v37 }
 0x888   : > { %4704 = vmatpush3.bf16.msra.mxu1 %v5022_v37 }
 0x889   : > { %4705 = vmatprep.subr.bf16.mxu1 %v5023_v43 }
 0x88c   : > { %4706 = vmatpush3.bf16.msra.mxu1 %v5023_v43 }
 0x88d   : > { %4711 = vmatprep.subr.bf16.mxu1 %v5024_v47 }
 0x88f   : > { %4708 = vmatmul.mubr.bf16.vlgmr.msra.gmra.mrb[12].mxu1 %v3348_v50 }
 0x890   : > { %4712 = vmatpush3.bf16.msra.mxu1 %v5024_v47  ;;  %4727 = vmatprep.mubr.bf16.mxu1 %v5767_v1  ;;  %v5032_v1 = vld [vmem:[#allocation7 + $0x200] sm:$0xff]  }
 0x891   : > { %4713 = vmatprep.subr.bf16.mxu1 %v5025_v51 }
 0x894   : > { %4714 = vmatpush3.bf16.msra.mxu1 %v5025_v51 }
 0x895   : > { %4715 = vmatprep.subr.bf16.mxu1 %v5026_v52 }
 0x898   : > { %4716 = vmatpush3.bf16.msra.mxu1 %v5026_v52 }
 0x899   : > { %4717 = vmatprep.subr.bf16.mxu1 %v5027_v53 }
 0x89c   : > { %4718 = vmatpush3.bf16.msra.mxu1 %v5027_v53 }
 0x89d   : > { %4719 = vmatprep.subr.bf16.mxu1 %v5028_v54 }
 0x8a0   : > { %4720 = vmatpush3.bf16.msra.mxu1 %v5028_v54 }
 0x8a1   : > { %4721 = vmatprep.subr.bf16.mxu1 %v5029_v35 }
 0x8a4   : > { %4722 = vmatpush3.bf16.msra.mxu1 %v5029_v35 }
 0x8a5   : > { %4723 = vmatprep.subr.bf16.mxu1 %v5030_v39 }
 0x8a8   : > { %4724 = vmatpush3.bf16.msra.mxu1 %v5030_v39 }
 0x8a9   : > { %4725 = vmatprep.subr.bf16.mxu1 %v5031_v55 }
 0x8ac   : > { %4726 = vmatpush3.bf16.msra.mxu1 %v5031_v55 }
 0x8ad   : > { %4731 = vmatprep.subr.bf16.mxu1 %v5032_v1 }
 0x8af   : > { %4728 = vmatmul.mubr.bf16.vlgmr.msra.gmra.mrb[12].mxu1 %v3471_v56 }
 0x8b0   : > { %4732 = vmatpush3.bf16.msra.mxu1 %v5032_v1  ;;  %4747 = vmatprep.mubr.bf16.mxu1 %v3597_v30 }
 0x8b1   : > { %4733 = vmatprep.subr.bf16.mxu1 %v5033_v60 }
 0x8b4   : > { %4734 = vmatpush3.bf16.msra.mxu1 %v5033_v60 }
 0x8b5   : > { %4735 = vmatprep.subr.bf16.mxu1 %v5034_v62 }
 0x8b8   : > { %4736 = vmatpush3.bf16.msra.mxu1 %v5034_v62 }
 0x8b9   : > { %4737 = vmatprep.subr.bf16.mxu1 %v5035_v36 }
 0x8bc   : > { %4738 = vmatpush3.bf16.msra.mxu1 %v5035_v36 }
 0x8bd   : > { %4739 = vmatprep.subr.bf16.mxu1 %v5036_v31 }
 0x8c0   : > { %4740 = vmatpush3.bf16.msra.mxu1 %v5036_v31 }
 0x8c1   : > { %4741 = vmatprep.subr.bf16.mxu1 %v5037_v38 }
 0x8c4   : > { %4742 = vmatpush3.bf16.msra.mxu1 %v5037_v38  ;;  %v4755_v30 = vpop.f32.mrb[16].mxu0 }
 0x8c5   : > { %4743 = vmatprep.subr.bf16.mxu1 %v5038_v21  ;;  %v3803_v2 = vpop.f32.mrb[17].mxu0  ;;  %v3812_v33 = vadd.f32 %v4755_v30, %v4133_v6 }
 0x8c6   : > { %v4756_v3 = vpop.f32.mrb[18].mxu0  ;;  %v3804_v9 = vadd.f32 %v4133_v6, %v3803_v2 }
 0x8c7   : > { %v3806_v5 = vpop.f32.mrb[19].mxu0  ;;  %v3815_v26 = vadd.f32 %v4756_v3, %v4133_v6 }
 0x8c8   : > { %4744 = vmatpush3.bf16.msra.mxu1 %v5038_v21  ;;  %v3807_v41 = vadd.f32 %v4133_v6, %v3806_v5 }
 0x8c9   : > { %4745 = vmatprep.subr.bf16.mxu1 %v5039_v63 }
 0x8cc   : > { %4746 = vmatpush3.bf16.msra.mxu1 %v5039_v63 }
 0x8cf   : > { %4748 = vmatmul.mubr.bf16.vlgmr.msra.gmra.mrb[12].mxu1 %v3598_v29 }
 0x9a2   : > { %v4749_v4 = vpop.f32.mrb[12].mxu1 }
 0x9a3   : > { %v3725_v48 = vmul.f32 %v4749_v4, %v4131_v24  ;;  %v3697_v12 = vpop.f32.mrb[13].mxu1 }
 0x9a4   : > { %v3723_v15 = vmul.f32 %v4131_v24, %v3697_v12  ;;  %v4750_v13 = vpop.f32.mrb[14].mxu1 }
 0x9a5   : > { %v3736_v59 = vadd.f32 %v4132_v28, %v3725_v48  ;;  %v3726_v14 = vmul.f32 %v4750_v13, %v4131_v24  ;;  %v3700_v61 = vpop.f32.mrb[15].mxu1 }
 0x9a6   : > { %v3734_v0 = vadd.f32 %v4132_v28, %v3723_v15  ;;  %v3724_v20 = vmul.f32 %v4131_v24, %v3700_v61 }
 0x9a7   : > { %v3820_v7 = vadd.f32 %v3812_v33, %v3736_v59  ;;  %v3737_v32 = vadd.f32 %v4132_v28, %v3726_v14 }
 0x9a8   : > { %v3818_v34 = vadd.f32 %v3804_v9, %v3734_v0  ;;  %v3735_v42 = vadd.f32 %v4132_v28, %v3724_v20 }
 0x9a9   : > { %v3824_v44 = vmax.f32 %v3820_v7, 0.0  ;;  %v3821_v23 = vadd.f32 %v3815_v26, %v3737_v32 }
 0x9aa   : > { %v3822_v57 = vmax.f32 %v3818_v34, 0.0  ;;  %v3819_v40 = vadd.f32 %v3807_v41, %v3735_v42 }
 0x9ab   : > { %3828 = vst [vmem:[%s721_s21 + $0x10] sm:$0xff] %v3824_v44  ;;  %v3825_v45 = vmax.f32 %v3821_v23, 0.0 }
 0x9ac   : > { %3826 = vst [vmem:[%s721_s21] sm:$0xff] %v3822_v57  ;;  %v3823_v18 = vmax.f32 %v3819_v40, 0.0 }
 0x9ad   : > { %3829 = vst [vmem:[%s721_s21 + $0x18] sm:$0xff] %v3825_v45 }
 0x9ae   : > { %3827 = vst [vmem:[%s721_s21 + $0x8] sm:$0xff] %v3823_v18 }
 0x9af   : > { %5136 = shalt.err (!%p5133_p11)
}
 0x9b0   : > { %s5137_s30 = scalar_lea.hbm %s5886_s29, 512  ;;  %s5141_s21 = scalar_lea.hbm %s6000_s26, 1024 }
 0x9b1   : > { %p5138_p13 = scmp.ne.s32.totalorder %s5886_s29, %s5137_s30  ;;  %p5142_p6 = scmp.lt.u32.totalorder %s5886_s29, %s6000_s26 }
 0x9b2   : > { %p5143_p9 = scmp.lt.u32.totalorder %s5141_s21, %s5137_s30  ;;  %p5145_p12 = scmp.lt.u32.totalorder %s5137_s30, %s5886_s29 }
 0x9b3   : > { %p5139_p5 = pnand %p5138_p13, %p6001_p1 }
 0x9b4   : > { %p5144_p10 = por %p5143_p9, %p5142_p6 }
 0x9b5   : > { %p5140_p0 = pneg %p5139_p5 }
 0x9b6   : > { %p5146_p2 = por %p5145_p12, %p5144_p10 }
 0x9b8   : > { %p5147_p3 = pnand %p5146_p2, %p5140_p0 }
 0x9ba   : > { %5150 = shalt.err (!%p5147_p3)
}
 0x9bb   : > { %s5202_s27 = smov 128   ;;  %s5203_s24 = smov 8  }
 0x9bc   : > { %4831 = dma.vmem_to_hbm [thread:$0]  (%p6001_p1), %s5881_s22, 512, %s5886_s29, %s5890_s4, %s5202_s27, %s5202_s27, %s5203_s24  }
 0x9bd PF: > { %s6002_s3 = sld [smem:[#allocation15_spill]]  ;;  %s6003_s23 = sld [smem:[#allocation13_spill]] }
 0x9be   : > { %s6004_s25 = sld [smem:[#allocation19_spill]] }
 0x9c3   : > { %p4848_p4 = scmp.ge.s32.totalorder %s6002_s3, 2  ;;  %s3859_s2 = sand.u32 1, %s6003_s23  }
 0x9c4   : > { %p6005_p7 = scmp.ne.s32.totalorder %s6004_s25, 0  ;;  %s3860_s30 = scalar_lea.sflag [#allocation6], %s3859_s2 }
 0x9c6   : > { %p4841_p8 = pnand %p4848_p4, %p6005_p7 }
 0x9c8   : > { %5176 = dma.done.wait (!%p4841_p8), %s3860_s30, 512  }
 0x9c9   : > { %5178 = vsyncadd (!%p4841_p8), %s3860_s30, 4294966784  ;;  %s6006_s30 = sld [smem:[#allocation16_spill]]  ;;  %s6007_s1 = sld [smem:[#allocation14_spill]] }
 0x9ca   : > { %s6008_s29 = sld [smem:[#allocation17_spill]]  ;;  %s6009_s3 = smov %s5185_s28 }
 0x9cf   : > { %p34_p11 = scmp.ge.s32.totalorder %s6006_s30, 4   ;;  %s6010_s28 = smov %s6007_s1 }
 0x9d1   :  { %36 = sbr.rel (!%p34_p11) target bundleno = 15 (0xf), region = 158 }
 0x9d8   :  { %3865 = vsyncpa [#allocation5], 1 }
 0x9d9   :  { %3867 = vsyncpa [#allocation5 + $0x1], 1 }
 0x9da   :  { %3868 = vsyncpa [#allocation8], 1 }
 0x9db   :  { %3869 = vsyncpa [#allocation6], 1 }
 0x9dc   :  { %3871 = vsyncpa [#allocation6 + $0x1], 1 }

</bundles_post_ra>
